<compile_context>
chip_gen: v7x
topology: tpu7x:2x2x1
jax: 0.10.0
libtpu: 0.0.40
codegen_flags: <defaults>
</compile_context>

<pallas_src>
import functools

import jax
import jax.numpy as jnp
from jax import lax
from jax.experimental import pallas as pl
from jax.experimental.pallas import tpu as pltpu


def _sigmoid(x):
    # 1/(1+exp(-x)) with the reciprocal on the EUP (approx vrcp) instead of a
    # multi-op f32 VPU divide.
    return pl.reciprocal(1.0 + jnp.exp(-x), approx=True)


def decoder_kernel(h0_ref, c0_ref, cond_ref, wih0_ref, wcat_ref, b_ref,
                   wfc_ref, bfc_ref, out_ref, *, T, L, H, O, sos):
    """Autoregressive LSTM decoder, fully unrolled over T steps (T is small).

    Refs:
      h0_ref, c0_ref : (L, B, H)    initial LSTM state
      cond_ref       : (B, H)       conditionals (added to the embedded input)
      wih0_ref       : (H, 4H)      layer-0 input weights (cond / duration rows)
      wcat_ref       : (L, 2H, 4H)  fused per-layer [x ; h] -> gates weights;
                                    layer 0 rows 0..H-1 hold E @ Wih0 (zero-padded)
      b_ref          : (L, 1, 4H)   b_ih + b_hh per layer
      wfc_ref        : (H, O)       fc_out weight (pre-transposed)
      bfc_ref        : (1, O)       fc_out bias
      out_ref        : (B, T*O)     per-step log-prob outputs, lane-dense
    """
    B = cond_ref.shape[0]

    # ---- loop invariants: loaded / computed once, reused across the T unroll ----
    lane_h = lax.broadcasted_iota(jnp.int32, (B, H), 1)
    lane_o = lax.broadcasted_iota(jnp.int32, (B, O), 1)
    act_mask = lane_o < (O - 1)             # activity lanes vs. duration lane

    wih0 = wih0_ref[...]                    # (H, 4H)
    w_dur = wih0[H - 1:H, :]                # (1, 4H): duration-input weight row
    # conditionals and layer-0 biases folded into a single per-batch gate offset
    cond_term = jnp.dot(cond_ref[...], wih0,
                        preferred_element_type=jnp.float32) + b_ref[0]   # (B, 4H)
    wcat = [wcat_ref[l] for l in range(L)]  # each (2H, 4H)
    bias = [b_ref[l] for l in range(1, L)]  # layer-0 bias lives inside cond_term
    wfc = wfc_ref[...]
    bfc = bfc_ref[...]

    h = [h0_ref[l] for l in range(L)]
    c = [c0_ref[l] for l in range(L)]

    # decoder_input = zeros(B,1,2); [:,:,0] = sos  ->  one-hot(sos), duration 0
    act_oh = (lane_h == sos).astype(jnp.float32)        # (B, H)
    dur = jnp.zeros((B, 1), jnp.float32)                # (B, 1)

    for t in range(T):      # T small -> full unroll keeps LLO scheduler visibility
        for l in range(L):
            if l == 0:
                # gates0 = [onehot,h0] @ [[E@Wih0;0];Whh0] + dur*Wih0[H-1] + cond_term
                xh = jnp.concatenate([act_oh, h[0]], axis=-1)        # (B, 2H)
                extra = cond_term + dur * w_dur
            else:
                xh = jnp.concatenate([h[l - 1], h[l]], axis=-1)      # (B, 2H)
                extra = bias[l - 1]
            gates = jnp.dot(xh, wcat[l],
                            preferred_element_type=jnp.float32) + extra  # (B, 4H)
            # PyTorch gate order: i, f, g, o
            i_g = _sigmoid(gates[:, 0:H])
            f_g = _sigmoid(gates[:, H:2 * H])
            g_g = jnp.tanh(gates[:, 2 * H:3 * H])
            o_g = _sigmoid(gates[:, 3 * H:4 * H])
            c[l] = f_g * c[l] + i_g * g_g
            h[l] = o_g * jnp.tanh(c[l])

        # fc_out
        logits = jnp.dot(h[L - 1], wfc,
                         preferred_element_type=jnp.float32) + bfc    # (B, O)

        # log_softmax over activity lanes; stable log(sigmoid) on duration lane
        acts_masked = jnp.where(act_mask, logits, -jnp.inf)
        row_max = jnp.max(acts_masked, axis=-1, keepdims=True)
        lse = row_max + jnp.log(jnp.sum(jnp.exp(acts_masked - row_max),
                                        axis=-1, keepdims=True))
        dur_log = (jnp.minimum(logits, 0.0)
                   - jnp.log(1.0 + jnp.exp(-jnp.abs(logits))))    # = -softplus(-x)
        out_ref[:, t * O:(t + 1) * O] = jnp.where(act_mask, logits - lse, dur_log)

        # pack(): top-1 activity index + sigmoid(duration) -> next decoder input
        is_max = acts_masked == row_max
        cand = jnp.where(is_max, lane_o, O)                # smallest index on ties
        first_idx = jnp.min(cand, axis=-1, keepdims=True)  # (B, 1) int32
        act_oh = (lane_h == first_idx).astype(jnp.float32)
        dur = _sigmoid(logits[:, O - 1:O])                 # (B, 1)


def decoder_forward(params, hidden, cell, conditionals, *, max_length,
                    output_size, sos=0):
    L, B, H = hidden.shape
    IN = params["emb"].shape[0]
    O = output_size
    assert IN <= H and O - 1 <= H, "one-hot folding assumes small categorical dims"

    # Glue: parameter reshaping only (done once, outside the kernel).
    wih_t = jnp.transpose(params["w_ih"], (0, 2, 1))                  # (L, H, 4H)
    whh_t = jnp.transpose(params["w_hh"], (0, 2, 1))                  # (L, H, 4H)
    # Fold the activity-embedding table into the layer-0 input weights.
    ew = jnp.dot(params["emb"], wih_t[0, :H - 1, :])                  # (IN, 4H)
    ew_pad = jnp.pad(ew, ((0, H - IN), (0, 0)))                       # (H, 4H)
    # Fused per-layer [x ; h] -> gates weights.
    wcat = jnp.concatenate(
        [jnp.concatenate([ew_pad[None], wih_t[1:]], axis=0), whh_t],
        axis=1)                                                       # (L, 2H, 4H)
    b = (params["b_ih"] + params["b_hh"])[:, None, :]                 # (L, 1, 4H)
    wfc_t = params["w_fc"].T                                          # (H, O)
    bfc = params["b_fc"][None, :]                                     # (1, O)

    kernel = functools.partial(decoder_kernel, T=max_length, L=L, H=H, O=O,
                               sos=sos)
    vmem = pl.BlockSpec(memory_space=pltpu.MemorySpace.VMEM)
    out = pl.pallas_call(
        kernel,
        out_shape=jax.ShapeDtypeStruct((B, max_length * O), jnp.float32),
        in_specs=[vmem] * 8,
        out_specs=vmem,
    )(hidden, cell, conditionals, wih_t[0], wcat, b, wfc_t, bfc)

    # Free reshape (row-major compatible); matches torch stack(...).permute(1,0,2).
    return out.reshape(B, max_length, O)


if __name__ == "__main__":
    B, H, L, T = 2, 32, 2, 8
    IN = 6            # input_size: number of activity classes
    O = IN + 1        # output_size: activity logits + 1 duration channel

    key = jax.random.PRNGKey(0)
    keys = jax.random.split(key, 10)
    k = 1.0 / jnp.sqrt(jnp.float32(H))

    params = {
        "emb":  0.1 * jax.random.normal(keys[0], (IN, H - 1), jnp.float32),
        "w_ih": jax.random.uniform(keys[1], (L, 4 * H, H), jnp.float32, -k, k),
        "w_hh": jax.random.uniform(keys[2], (L, 4 * H, H), jnp.float32, -k, k),
        "b_ih": jax.random.uniform(keys[3], (L, 4 * H), jnp.float32, -k, k),
        "b_hh": jax.random.uniform(keys[4], (L, 4 * H), jnp.float32, -k, k),
        "w_fc": jax.random.uniform(keys[5], (O, H), jnp.float32, -k, k),
        "b_fc": jax.random.uniform(keys[6], (O,), jnp.float32, -k, k),
    }
    hidden = jax.random.normal(keys[7], (L, B, H), jnp.float32)
    cell = jax.random.normal(keys[8], (L, B, H), jnp.float32)
    conditionals = jax.random.normal(keys[9], (B, H), jnp.float32)

    out = decoder_forward(params, hidden, cell, conditionals,
                          max_length=T, output_size=O, sos=0)
    out = jax.block_until_ready(out)
    assert out.shape == (B, T, O), out.shape
    assert bool(jnp.all(jnp.isfinite(out)))
    print("KERNEL_OK")
</pallas_src>

<mosaic_0001>
module attributes {stable_mosaic.version = 11 : i64} {
  func.func @decoder_kernel(%arg0: memref<2x2x32xf32, #tpu.memory_space<vmem>>, %arg1: memref<2x2x32xf32, #tpu.memory_space<vmem>>, %arg2: memref<2x32xf32, #tpu.memory_space<vmem>>, %arg3: memref<32x128xf32, #tpu.memory_space<vmem>>, %arg4: memref<2x64x128xf32, #tpu.memory_space<vmem>>, %arg5: memref<2x1x128xf32, #tpu.memory_space<vmem>>, %arg6: memref<32x7xf32, #tpu.memory_space<vmem>>, %arg7: memref<1x7xf32, #tpu.memory_space<vmem>>, %arg8: memref<2x56xf32, #tpu.memory_space<vmem>>) attributes {dimension_semantics = [], scalar_prefetch = 0 : i64, scratch_operands = 0 : i64, tpu.core_type = #tpu.core_type<tc>} {
    %0 = tpu.iota {dimensions = array<i32: 1>} : vector<2x32xi32>
    %1 = tpu.iota {dimensions = array<i32: 1>} : vector<2x7xi32>
    %c6_i32 = arith.constant 6 : i32
    %2 = vector.broadcast %c6_i32 : i32 to vector<2x7xi32>
    %3 = arith.cmpi slt, %1, %2 : vector<2x7xi32>
    %c0 = arith.constant 0 : index
    %c0_0 = arith.constant 0 : index
    %4 = vector.load %arg3[%c0, %c0_0] : memref<32x128xf32, #tpu.memory_space<vmem>>, vector<32x128xf32>
    %5 = vector.extract_strided_slice %4 {offsets = [31, 0], sizes = [1, 128], strides = [1, 1]} : vector<32x128xf32> to vector<1x128xf32>
    %c0_1 = arith.constant 0 : index
    %c0_2 = arith.constant 0 : index
    %6 = vector.load %arg2[%c0_1, %c0_2] : memref<2x32xf32, #tpu.memory_space<vmem>>, vector<2x32xf32>
    %cst = arith.constant dense<0.000000e+00> : vector<2x128xf32>
    %7 = tpu.matmul %6, %4, %cst {dimension_numbers = #tpu.dot_dimension_numbers<[1], [0], [0], [1], [0, 0, 1, 1], [], []>} : vector<2x32xf32>, vector<32x128xf32>, vector<2x128xf32> -> vector<2x128xf32>
    %c0_3 = arith.constant 0 : index
    %c0_4 = arith.constant 0 : index
    %c0_5 = arith.constant 0 : index
    %8 = vector.load %arg5[%c0_3, %c0_4, %c0_5] : memref<2x1x128xf32, #tpu.memory_space<vmem>>, vector<1x1x128xf32>
    %9 = vector.shape_cast %8 : vector<1x1x128xf32> to vector<1x128xf32>
    %10 = vector.broadcast %9 : vector<1x128xf32> to vector<2x128xf32>
    %11 = arith.addf %7, %10 : vector<2x128xf32>
    %c0_6 = arith.constant 0 : index
    %c0_7 = arith.constant 0 : index
    %c0_8 = arith.constant 0 : index
    %12 = vector.load %arg4[%c0_6, %c0_7, %c0_8] : memref<2x64x128xf32, #tpu.memory_space<vmem>>, vector<1x64x128xf32>
    %13 = vector.shape_cast %12 : vector<1x64x128xf32> to vector<64x128xf32>
    %c1 = arith.constant 1 : index
    %c0_9 = arith.constant 0 : index
    %c0_10 = arith.constant 0 : index
    %14 = vector.load %arg4[%c1, %c0_9, %c0_10] : memref<2x64x128xf32, #tpu.memory_space<vmem>>, vector<1x64x128xf32>
    %15 = vector.shape_cast %14 : vector<1x64x128xf32> to vector<64x128xf32>
    %c1_11 = arith.constant 1 : index
    %c0_12 = arith.constant 0 : index
    %c0_13 = arith.constant 0 : index
    %16 = vector.load %arg5[%c1_11, %c0_12, %c0_13] : memref<2x1x128xf32, #tpu.memory_space<vmem>>, vector<1x1x128xf32>
    %17 = vector.shape_cast %16 : vector<1x1x128xf32> to vector<1x128xf32>
    %c0_14 = arith.constant 0 : index
    %c0_15 = arith.constant 0 : index
    %18 = vector.load %arg6[%c0_14, %c0_15] : memref<32x7xf32, #tpu.memory_space<vmem>>, vector<32x7xf32>
    %c0_16 = arith.constant 0 : index
    %c0_17 = arith.constant 0 : index
    %19 = vector.load %arg7[%c0_16, %c0_17] : memref<1x7xf32, #tpu.memory_space<vmem>>, vector<1x7xf32>
    %c0_18 = arith.constant 0 : index
    %c0_19 = arith.constant 0 : index
    %c0_20 = arith.constant 0 : index
    %20 = vector.load %arg0[%c0_18, %c0_19, %c0_20] : memref<2x2x32xf32, #tpu.memory_space<vmem>>, vector<1x2x32xf32>
    %21 = vector.shape_cast %20 : vector<1x2x32xf32> to vector<2x32xf32>
    %c1_21 = arith.constant 1 : index
    %c0_22 = arith.constant 0 : index
    %c0_23 = arith.constant 0 : index
    %22 = vector.load %arg0[%c1_21, %c0_22, %c0_23] : memref<2x2x32xf32, #tpu.memory_space<vmem>>, vector<1x2x32xf32>
    %23 = vector.shape_cast %22 : vector<1x2x32xf32> to vector<2x32xf32>
    %c0_24 = arith.constant 0 : index
    %c0_25 = arith.constant 0 : index
    %c0_26 = arith.constant 0 : index
    %24 = vector.load %arg1[%c0_24, %c0_25, %c0_26] : memref<2x2x32xf32, #tpu.memory_space<vmem>>, vector<1x2x32xf32>
    %25 = vector.shape_cast %24 : vector<1x2x32xf32> to vector<2x32xf32>
    %c1_27 = arith.constant 1 : index
    %c0_28 = arith.constant 0 : index
    %c0_29 = arith.constant 0 : index
    %26 = vector.load %arg1[%c1_27, %c0_28, %c0_29] : memref<2x2x32xf32, #tpu.memory_space<vmem>>, vector<1x2x32xf32>
    %27 = vector.shape_cast %26 : vector<1x2x32xf32> to vector<2x32xf32>
    %c0_i32 = arith.constant 0 : i32
    %28 = vector.broadcast %c0_i32 : i32 to vector<2x32xi32>
    %29 = arith.cmpi eq, %0, %28 : vector<2x32xi32>
    %30 = arith.extui %29 : vector<2x32xi1> to vector<2x32xi32>
    %31 = arith.sitofp %30 : vector<2x32xi32> to vector<2x32xf32>
    %cst_30 = arith.constant 0.000000e+00 : f32
    %32 = vector.broadcast %cst_30 : f32 to vector<2x1xf32>
    %33 = tpu.concatenate %31, %21 in 1 : vector<2x32xf32>, vector<2x32xf32> -> vector<2x64xf32>
    %34 = vector.broadcast %32 : vector<2x1xf32> to vector<2x128xf32>
    %35 = vector.broadcast %5 : vector<1x128xf32> to vector<2x128xf32>
    %36 = arith.mulf %34, %35 : vector<2x128xf32>
    %37 = arith.addf %11, %36 : vector<2x128xf32>
    %cst_31 = arith.constant dense<0.000000e+00> : vector<2x128xf32>
    %38 = tpu.matmul %33, %13, %cst_31 {dimension_numbers = #tpu.dot_dimension_numbers<[1], [0], [0], [1], [0, 0, 1, 1], [], []>} : vector<2x64xf32>, vector<64x128xf32>, vector<2x128xf32> -> vector<2x128xf32>
    %39 = arith.addf %38, %37 : vector<2x128xf32>
    %40 = vector.extract_strided_slice %39 {offsets = [0, 0], sizes = [2, 32], strides = [1, 1]} : vector<2x128xf32> to vector<2x32xf32>
    %cst_32 = arith.constant 0.000000e+00 : f32
    %41 = vector.broadcast %cst_32 : f32 to vector<2x32xf32>
    %42 = arith.subf %41, %40 : vector<2x32xf32>
    %43 = math.exp %42 : vector<2x32xf32>
    %cst_33 = arith.constant 1.000000e+00 : f32
    %44 = vector.broadcast %cst_33 : f32 to vector<2x32xf32>
    %45 = arith.addf %44, %43 : vector<2x32xf32>
    %46 = tpu.reciprocal %45 {approx = true} : vector<2x32xf32> -> vector<2x32xf32>
    %47 = vector.extract_strided_slice %39 {offsets = [0, 32], sizes = [2, 32], strides = [1, 1]} : vector<2x128xf32> to vector<2x32xf32>
    %cst_34 = arith.constant 0.000000e+00 : f32
    %48 = vector.broadcast %cst_34 : f32 to vector<2x32xf32>
    %49 = arith.subf %48, %47 : vector<2x32xf32>
    %50 = math.exp %49 : vector<2x32xf32>
    %cst_35 = arith.constant 1.000000e+00 : f32
    %51 = vector.broadcast %cst_35 : f32 to vector<2x32xf32>
    %52 = arith.addf %51, %50 : vector<2x32xf32>
    %53 = tpu.reciprocal %52 {approx = true} : vector<2x32xf32> -> vector<2x32xf32>
    %54 = vector.extract_strided_slice %39 {offsets = [0, 64], sizes = [2, 32], strides = [1, 1]} : vector<2x128xf32> to vector<2x32xf32>
    %55 = math.tanh %54 : vector<2x32xf32>
    %56 = vector.extract_strided_slice %39 {offsets = [0, 96], sizes = [2, 32], strides = [1, 1]} : vector<2x128xf32> to vector<2x32xf32>
    %cst_36 = arith.constant 0.000000e+00 : f32
    %57 = vector.broadcast %cst_36 : f32 to vector<2x32xf32>
    %58 = arith.subf %57, %56 : vector<2x32xf32>
    %59 = math.exp %58 : vector<2x32xf32>
    %cst_37 = arith.constant 1.000000e+00 : f32
    %60 = vector.broadcast %cst_37 : f32 to vector<2x32xf32>
    %61 = arith.addf %60, %59 : vector<2x32xf32>
    %62 = tpu.reciprocal %61 {approx = true} : vector<2x32xf32> -> vector<2x32xf32>
    %63 = arith.mulf %53, %25 : vector<2x32xf32>
    %64 = arith.mulf %46, %55 : vector<2x32xf32>
    %65 = arith.addf %63, %64 : vector<2x32xf32>
    %66 = math.tanh %65 : vector<2x32xf32>
    %67 = arith.mulf %62, %66 : vector<2x32xf32>
    %68 = tpu.concatenate %67, %23 in 1 : vector<2x32xf32>, vector<2x32xf32> -> vector<2x64xf32>
    %cst_38 = arith.constant dense<0.000000e+00> : vector<2x128xf32>
    %69 = tpu.matmul %68, %15, %cst_38 {dimension_numbers = #tpu.dot_dimension_numbers<[1], [0], [0], [1], [0, 0, 1, 1], [], []>} : vector<2x64xf32>, vector<64x128xf32>, vector<2x128xf32> -> vector<2x128xf32>
    %70 = vector.broadcast %17 : vector<1x128xf32> to vector<2x128xf32>
    %71 = arith.addf %69, %70 : vector<2x128xf32>
    %72 = vector.extract_strided_slice %71 {offsets = [0, 0], sizes = [2, 32], strides = [1, 1]} : vector<2x128xf32> to vector<2x32xf32>
    %cst_39 = arith.constant 0.000000e+00 : f32
    %73 = vector.broadcast %cst_39 : f32 to vector<2x32xf32>
    %74 = arith.subf %73, %72 : vector<2x32xf32>
    %75 = math.exp %74 : vector<2x32xf32>
    %cst_40 = arith.constant 1.000000e+00 : f32
    %76 = vector.broadcast %cst_40 : f32 to vector<2x32xf32>
    %77 = arith.addf %76, %75 : vector<2x32xf32>
    %78 = tpu.reciprocal %77 {approx = true} : vector<2x32xf32> -> vector<2x32xf32>
    %79 = vector.extract_strided_slice %71 {offsets = [0, 32], sizes = [2, 32], strides = [1, 1]} : vector<2x128xf32> to vector<2x32xf32>
    %cst_41 = arith.constant 0.000000e+00 : f32
    %80 = vector.broadcast %cst_41 : f32 to vector<2x32xf32>
    %81 = arith.subf %80, %79 : vector<2x32xf32>
    %82 = math.exp %81 : vector<2x32xf32>
    %cst_42 = arith.constant 1.000000e+00 : f32
    %83 = vector.broadcast %cst_42 : f32 to vector<2x32xf32>
    %84 = arith.addf %83, %82 : vector<2x32xf32>
    %85 = tpu.reciprocal %84 {approx = true} : vector<2x32xf32> -> vector<2x32xf32>
    %86 = vector.extract_strided_slice %71 {offsets = [0, 64], sizes = [2, 32], strides = [1, 1]} : vector<2x128xf32> to vector<2x32xf32>
    %87 = math.tanh %86 : vector<2x32xf32>
    %88 = vector.extract_strided_slice %71 {offsets = [0, 96], sizes = [2, 32], strides = [1, 1]} : vector<2x128xf32> to vector<2x32xf32>
    %cst_43 = arith.constant 0.000000e+00 : f32
    %89 = vector.broadcast %cst_43 : f32 to vector<2x32xf32>
    %90 = arith.subf %89, %88 : vector<2x32xf32>
    %91 = math.exp %90 : vector<2x32xf32>
    %cst_44 = arith.constant 1.000000e+00 : f32
    %92 = vector.broadcast %cst_44 : f32 to vector<2x32xf32>
    %93 = arith.addf %92, %91 : vector<2x32xf32>
    %94 = tpu.reciprocal %93 {approx = true} : vector<2x32xf32> -> vector<2x32xf32>
    %95 = arith.mulf %85, %27 : vector<2x32xf32>
    %96 = arith.mulf %78, %87 : vector<2x32xf32>
    %97 = arith.addf %95, %96 : vector<2x32xf32>
    %98 = math.tanh %97 : vector<2x32xf32>
    %99 = arith.mulf %94, %98 : vector<2x32xf32>
    %cst_45 = arith.constant dense<0.000000e+00> : vector<2x7xf32>
    %100 = tpu.matmul %99, %18, %cst_45 {dimension_numbers = #tpu.dot_dimension_numbers<[1], [0], [0], [1], [0, 0, 1, 1], [], []>} : vector<2x32xf32>, vector<32x7xf32>, vector<2x7xf32> -> vector<2x7xf32>
    %101 = vector.broadcast %19 : vector<1x7xf32> to vector<2x7xf32>
    %102 = arith.addf %100, %101 : vector<2x7xf32>
    %cst_46 = arith.constant 0xFF800000 : f32
    %103 = vector.broadcast %cst_46 : f32 to vector<2x7xf32>
    %104 = arith.select %3, %102, %103 : vector<2x7xi1>, vector<2x7xf32>
    %cst_47 = arith.constant dense<0xFF800000> : vector<2xf32>
    %105 = vector.multi_reduction <maximumf>, %104, %cst_47 [1] : vector<2x7xf32> to vector<2xf32>
    %106 = vector.shape_cast %105 : vector<2xf32> to vector<2x1xf32>
    %107 = vector.broadcast %106 : vector<2x1xf32> to vector<2x7xf32>
    %108 = arith.subf %104, %107 : vector<2x7xf32>
    %109 = math.exp %108 : vector<2x7xf32>
    %cst_48 = arith.constant dense<0.000000e+00> : vector<2xf32>
    %110 = vector.multi_reduction <add>, %109, %cst_48 [1] : vector<2x7xf32> to vector<2xf32>
    %111 = vector.shape_cast %110 : vector<2xf32> to vector<2x1xf32>
    %112 = math.log %111 : vector<2x1xf32>
    %113 = arith.addf %106, %112 : vector<2x1xf32>
    %cst_49 = arith.constant 0.000000e+00 : f32
    %114 = vector.broadcast %cst_49 : f32 to vector<2x7xf32>
    %115 = arith.minimumf %102, %114 : vector<2x7xf32>
    %116 = math.absf %102 : vector<2x7xf32>
    %cst_50 = arith.constant 0.000000e+00 : f32
    %117 = vector.broadcast %cst_50 : f32 to vector<2x7xf32>
    %118 = arith.subf %117, %116 : vector<2x7xf32>
    %119 = math.exp %118 : vector<2x7xf32>
    %cst_51 = arith.constant 1.000000e+00 : f32
    %120 = vector.broadcast %cst_51 : f32 to vector<2x7xf32>
    %121 = arith.addf %120, %119 : vector<2x7xf32>
    %122 = math.log %121 : vector<2x7xf32>
    %123 = arith.subf %115, %122 : vector<2x7xf32>
    %124 = vector.broadcast %113 : vector<2x1xf32> to vector<2x7xf32>
    %125 = arith.subf %102, %124 : vector<2x7xf32>
    %126 = arith.select %3, %125, %123 : vector<2x7xi1>, vector<2x7xf32>
    %c0_52 = arith.constant 0 : index
    %c0_53 = arith.constant 0 : index
    %127 = vector.load %arg8[%c0_52, %c0_53] : memref<2x56xf32, #tpu.memory_space<vmem>>, vector<2x7xf32>
    tpu.vector_store %arg8[%c0_52, %c0_53], %126 {strides = array<i32>} : memref<2x56xf32, #tpu.memory_space<vmem>>, vector<2x7xf32>,
    %128 = vector.broadcast %106 : vector<2x1xf32> to vector<2x7xf32>
    %129 = arith.cmpf oeq, %104, %128 : vector<2x7xf32>
    %c7_i32 = arith.constant 7 : i32
    %130 = vector.broadcast %c7_i32 : i32 to vector<2x7xi32>
    %131 = arith.select %129, %1, %130 : vector<2x7xi1>, vector<2x7xi32>
    %cst_54 = arith.constant dense<2147483647> : vector<2xi32>
    %132 = vector.multi_reduction <minsi>, %131, %cst_54 [1] : vector<2x7xi32> to vector<2xi32>
    %133 = vector.shape_cast %132 : vector<2xi32> to vector<2x1xi32>
    %134 = vector.broadcast %133 : vector<2x1xi32> to vector<2x32xi32>
    %135 = arith.cmpi eq, %0, %134 : vector<2x32xi32>
    %136 = arith.extui %135 : vector<2x32xi1> to vector<2x32xi32>
    %137 = arith.sitofp %136 : vector<2x32xi32> to vector<2x32xf32>
    %138 = vector.extract_strided_slice %102 {offsets = [0, 6], sizes = [2, 1], strides = [1, 1]} : vector<2x7xf32> to vector<2x1xf32>
    %cst_55 = arith.constant 0.000000e+00 : f32
    %139 = vector.broadcast %cst_55 : f32 to vector<2x1xf32>
    %140 = arith.subf %139, %138 : vector<2x1xf32>
    %141 = math.exp %140 : vector<2x1xf32>
    %cst_56 = arith.constant 1.000000e+00 : f32
    %142 = vector.broadcast %cst_56 : f32 to vector<2x1xf32>
    %143 = arith.addf %142, %141 : vector<2x1xf32>
    %144 = tpu.reciprocal %143 {approx = true} : vector<2x1xf32> -> vector<2x1xf32>
    %145 = tpu.concatenate %137, %67 in 1 : vector<2x32xf32>, vector<2x32xf32> -> vector<2x64xf32>
    %146 = vector.broadcast %144 : vector<2x1xf32> to vector<2x128xf32>
    %147 = vector.broadcast %5 : vector<1x128xf32> to vector<2x128xf32>
    %148 = arith.mulf %146, %147 : vector<2x128xf32>
    %149 = arith.addf %11, %148 : vector<2x128xf32>
    %cst_57 = arith.constant dense<0.000000e+00> : vector<2x128xf32>
    %150 = tpu.matmul %145, %13, %cst_57 {dimension_numbers = #tpu.dot_dimension_numbers<[1], [0], [0], [1], [0, 0, 1, 1], [], []>} : vector<2x64xf32>, vector<64x128xf32>, vector<2x128xf32> -> vector<2x128xf32>
    %151 = arith.addf %150, %149 : vector<2x128xf32>
    %152 = vector.extract_strided_slice %151 {offsets = [0, 0], sizes = [2, 32], strides = [1, 1]} : vector<2x128xf32> to vector<2x32xf32>
    %cst_58 = arith.constant 0.000000e+00 : f32
    %153 = vector.broadcast %cst_58 : f32 to vector<2x32xf32>
    %154 = arith.subf %153, %152 : vector<2x32xf32>
    %155 = math.exp %154 : vector<2x32xf32>
    %cst_59 = arith.constant 1.000000e+00 : f32
    %156 = vector.broadcast %cst_59 : f32 to vector<2x32xf32>
    %157 = arith.addf %156, %155 : vector<2x32xf32>
    %158 = tpu.reciprocal %157 {approx = true} : vector<2x32xf32> -> vector<2x32xf32>
    %159 = vector.extract_strided_slice %151 {offsets = [0, 32], sizes = [2, 32], strides = [1, 1]} : vector<2x128xf32> to vector<2x32xf32>
    %cst_60 = arith.constant 0.000000e+00 : f32
    %160 = vector.broadcast %cst_60 : f32 to vector<2x32xf32>
    %161 = arith.subf %160, %159 : vector<2x32xf32>
    %162 = math.exp %161 : vector<2x32xf32>
    %cst_61 = arith.constant 1.000000e+00 : f32
    %163 = vector.broadcast %cst_61 : f32 to vector<2x32xf32>
    %164 = arith.addf %163, %162 : vector<2x32xf32>
    %165 = tpu.reciprocal %164 {approx = true} : vector<2x32xf32> -> vector<2x32xf32>
    %166 = vector.extract_strided_slice %151 {offsets = [0, 64], sizes = [2, 32], strides = [1, 1]} : vector<2x128xf32> to vector<2x32xf32>
    %167 = math.tanh %166 : vector<2x32xf32>
    %168 = vector.extract_strided_slice %151 {offsets = [0, 96], sizes = [2, 32], strides = [1, 1]} : vector<2x128xf32> to vector<2x32xf32>
    %cst_62 = arith.constant 0.000000e+00 : f32
    %169 = vector.broadcast %cst_62 : f32 to vector<2x32xf32>
    %170 = arith.subf %169, %168 : vector<2x32xf32>
    %171 = math.exp %170 : vector<2x32xf32>
    %cst_63 = arith.constant 1.000000e+00 : f32
    %172 = vector.broadcast %cst_63 : f32 to vector<2x32xf32>
    %173 = arith.addf %172, %171 : vector<2x32xf32>
    %174 = tpu.reciprocal %173 {approx = true} : vector<2x32xf32> -> vector<2x32xf32>
    %175 = arith.mulf %165, %65 : vector<2x32xf32>
    %176 = arith.mulf %158, %167 : vector<2x32xf32>
    %177 = arith.addf %175, %176 : vector<2x32xf32>
    %178 = math.tanh %177 : vector<2x32xf32>
    %179 = arith.mulf %174, %178 : vector<2x32xf32>
    %180 = tpu.concatenate %179, %99 in 1 : vector<2x32xf32>, vector<2x32xf32> -> vector<2x64xf32>
    %cst_64 = arith.constant dense<0.000000e+00> : vector<2x128xf32>
    %181 = tpu.matmul %180, %15, %cst_64 {dimension_numbers = #tpu.dot_dimension_numbers<[1], [0], [0], [1], [0, 0, 1, 1], [], []>} : vector<2x64xf32>, vector<64x128xf32>, vector<2x128xf32> -> vector<2x128xf32>
    %182 = vector.broadcast %17 : vector<1x128xf32> to vector<2x128xf32>
    %183 = arith.addf %181, %182 : vector<2x128xf32>
    %184 = vector.extract_strided_slice %183 {offsets = [0, 0], sizes = [2, 32], strides = [1, 1]} : vector<2x128xf32> to vector<2x32xf32>
    %cst_65 = arith.constant 0.000000e+00 : f32
    %185 = vector.broadcast %cst_65 : f32 to vector<2x32xf32>
    %186 = arith.subf %185, %184 : vector<2x32xf32>
    %187 = math.exp %186 : vector<2x32xf32>
    %cst_66 = arith.constant 1.000000e+00 : f32
    %188 = vector.broadcast %cst_66 : f32 to vector<2x32xf32>
    %189 = arith.addf %188, %187 : vector<2x32xf32>
    %190 = tpu.reciprocal %189 {approx = true} : vector<2x32xf32> -> vector<2x32xf32>
    %191 = vector.extract_strided_slice %183 {offsets = [0, 32], sizes = [2, 32], strides = [1, 1]} : vector<2x128xf32> to vector<2x32xf32>
    %cst_67 = arith.constant 0.000000e+00 : f32
    %192 = vector.broadcast %cst_67 : f32 to vector<2x32xf32>
    %193 = arith.subf %192, %191 : vector<2x32xf32>
    %194 = math.exp %193 : vector<2x32xf32>
    %cst_68 = arith.constant 1.000000e+00 : f32
    %195 = vector.broadcast %cst_68 : f32 to vector<2x32xf32>
    %196 = arith.addf %195, %194 : vector<2x32xf32>
    %197 = tpu.reciprocal %196 {approx = true} : vector<2x32xf32> -> vector<2x32xf32>
    %198 = vector.extract_strided_slice %183 {offsets = [0, 64], sizes = [2, 32], strides = [1, 1]} : vector<2x128xf32> to vector<2x32xf32>
    %199 = math.tanh %198 : vector<2x32xf32>
    %200 = vector.extract_strided_slice %183 {offsets = [0, 96], sizes = [2, 32], strides = [1, 1]} : vector<2x128xf32> to vector<2x32xf32>
    %cst_69 = arith.constant 0.000000e+00 : f32
    %201 = vector.broadcast %cst_69 : f32 to vector<2x32xf32>
    %202 = arith.subf %201, %200 : vector<2x32xf32>
    %203 = math.exp %202 : vector<2x32xf32>
    %cst_70 = arith.constant 1.000000e+00 : f32
    %204 = vector.broadcast %cst_70 : f32 to vector<2x32xf32>
    %205 = arith.addf %204, %203 : vector<2x32xf32>
    %206 = tpu.reciprocal %205 {approx = true} : vector<2x32xf32> -> vector<2x32xf32>
    %207 = arith.mulf %197, %97 : vector<2x32xf32>
    %208 = arith.mulf %190, %199 : vector<2x32xf32>
    %209 = arith.addf %207, %208 : vector<2x32xf32>
    %210 = math.tanh %209 : vector<2x32xf32>
    %211 = arith.mulf %206, %210 : vector<2x32xf32>
    %cst_71 = arith.constant dense<0.000000e+00> : vector<2x7xf32>
    %212 = tpu.matmul %211, %18, %cst_71 {dimension_numbers = #tpu.dot_dimension_numbers<[1], [0], [0], [1], [0, 0, 1, 1], [], []>} : vector<2x32xf32>, vector<32x7xf32>, vector<2x7xf32> -> vector<2x7xf32>
    %213 = vector.broadcast %19 : vector<1x7xf32> to vector<2x7xf32>
    %214 = arith.addf %212, %213 : vector<2x7xf32>
    %cst_72 = arith.constant 0xFF800000 : f32
    %215 = vector.broadcast %cst_72 : f32 to vector<2x7xf32>
    %216 = arith.select %3, %214, %215 : vector<2x7xi1>, vector<2x7xf32>
    %cst_73 = arith.constant dense<0xFF800000> : vector<2xf32>
    %217 = vector.multi_reduction <maximumf>, %216, %cst_73 [1] : vector<2x7xf32> to vector<2xf32>
    %218 = vector.shape_cast %217 : vector<2xf32> to vector<2x1xf32>
    %219 = vector.broadcast %218 : vector<2x1xf32> to vector<2x7xf32>
    %220 = arith.subf %216, %219 : vector<2x7xf32>
    %221 = math.exp %220 : vector<2x7xf32>
    %cst_74 = arith.constant dense<0.000000e+00> : vector<2xf32>
    %222 = vector.multi_reduction <add>, %221, %cst_74 [1] : vector<2x7xf32> to vector<2xf32>
    %223 = vector.shape_cast %222 : vector<2xf32> to vector<2x1xf32>
    %224 = math.log %223 : vector<2x1xf32>
    %225 = arith.addf %218, %224 : vector<2x1xf32>
    %cst_75 = arith.constant 0.000000e+00 : f32
    %226 = vector.broadcast %cst_75 : f32 to vector<2x7xf32>
    %227 = arith.minimumf %214, %226 : vector<2x7xf32>
    %228 = math.absf %214 : vector<2x7xf32>
    %cst_76 = arith.constant 0.000000e+00 : f32
    %229 = vector.broadcast %cst_76 : f32 to vector<2x7xf32>
    %230 = arith.subf %229, %228 : vector<2x7xf32>
    %231 = math.exp %230 : vector<2x7xf32>
    %cst_77 = arith.constant 1.000000e+00 : f32
    %232 = vector.broadcast %cst_77 : f32 to vector<2x7xf32>
    %233 = arith.addf %232, %231 : vector<2x7xf32>
    %234 = math.log %233 : vector<2x7xf32>
    %235 = arith.subf %227, %234 : vector<2x7xf32>
    %236 = vector.broadcast %225 : vector<2x1xf32> to vector<2x7xf32>
    %237 = arith.subf %214, %236 : vector<2x7xf32>
    %238 = arith.select %3, %237, %235 : vector<2x7xi1>, vector<2x7xf32>
    %c0_78 = arith.constant 0 : index
    %c7 = arith.constant 7 : index
    %239 = vector.load %arg8[%c0_78, %c7] : memref<2x56xf32, #tpu.memory_space<vmem>>, vector<2x7xf32>
    tpu.vector_store %arg8[%c0_78, %c7], %238 {strides = array<i32>} : memref<2x56xf32, #tpu.memory_space<vmem>>, vector<2x7xf32>,
    %240 = vector.broadcast %218 : vector<2x1xf32> to vector<2x7xf32>
    %241 = arith.cmpf oeq, %216, %240 : vector<2x7xf32>
    %c7_i32_79 = arith.constant 7 : i32
    %242 = vector.broadcast %c7_i32_79 : i32 to vector<2x7xi32>
    %243 = arith.select %241, %1, %242 : vector<2x7xi1>, vector<2x7xi32>
    %cst_80 = arith.constant dense<2147483647> : vector<2xi32>
    %244 = vector.multi_reduction <minsi>, %243, %cst_80 [1] : vector<2x7xi32> to vector<2xi32>
    %245 = vector.shape_cast %244 : vector<2xi32> to vector<2x1xi32>
    %246 = vector.broadcast %245 : vector<2x1xi32> to vector<2x32xi32>
    %247 = arith.cmpi eq, %0, %246 : vector<2x32xi32>
    %248 = arith.extui %247 : vector<2x32xi1> to vector<2x32xi32>
    %249 = arith.sitofp %248 : vector<2x32xi32> to vector<2x32xf32>
    %250 = vector.extract_strided_slice %214 {offsets = [0, 6], sizes = [2, 1], strides = [1, 1]} : vector<2x7xf32> to vector<2x1xf32>
    %cst_81 = arith.constant 0.000000e+00 : f32
    %251 = vector.broadcast %cst_81 : f32 to vector<2x1xf32>
    %252 = arith.subf %251, %250 : vector<2x1xf32>
    %253 = math.exp %252 : vector<2x1xf32>
    %cst_82 = arith.constant 1.000000e+00 : f32
    %254 = vector.broadcast %cst_82 : f32 to vector<2x1xf32>
    %255 = arith.addf %254, %253 : vector<2x1xf32>
    %256 = tpu.reciprocal %255 {approx = true} : vector<2x1xf32> -> vector<2x1xf32>
    %257 = tpu.concatenate %249, %179 in 1 : vector<2x32xf32>, vector<2x32xf32> -> vector<2x64xf32>
    %258 = vector.broadcast %256 : vector<2x1xf32> to vector<2x128xf32>
    %259 = vector.broadcast %5 : vector<1x128xf32> to vector<2x128xf32>
    %260 = arith.mulf %258, %259 : vector<2x128xf32>
    %261 = arith.addf %11, %260 : vector<2x128xf32>
    %cst_83 = arith.constant dense<0.000000e+00> : vector<2x128xf32>
    %262 = tpu.matmul %257, %13, %cst_83 {dimension_numbers = #tpu.dot_dimension_numbers<[1], [0], [0], [1], [0, 0, 1, 1], [], []>} : vector<2x64xf32>, vector<64x128xf32>, vector<2x128xf32> -> vector<2x128xf32>
    %263 = arith.addf %262, %261 : vector<2x128xf32>
    %264 = vector.extract_strided_slice %263 {offsets = [0, 0], sizes = [2, 32], strides = [1, 1]} : vector<2x128xf32> to vector<2x32xf32>
    %cst_84 = arith.constant 0.000000e+00 : f32
    %265 = vector.broadcast %cst_84 : f32 to vector<2x32xf32>
    %266 = arith.subf %265, %264 : vector<2x32xf32>
    %267 = math.exp %266 : vector<2x32xf32>
    %cst_85 = arith.constant 1.000000e+00 : f32
    %268 = vector.broadcast %cst_85 : f32 to vector<2x32xf32>
    %269 = arith.addf %268, %267 : vector<2x32xf32>
    %270 = tpu.reciprocal %269 {approx = true} : vector<2x32xf32> -> vector<2x32xf32>
    %271 = vector.extract_strided_slice %263 {offsets = [0, 32], sizes = [2, 32], strides = [1, 1]} : vector<2x128xf32> to vector<2x32xf32>
    %cst_86 = arith.constant 0.000000e+00 : f32
    %272 = vector.broadcast %cst_86 : f32 to vector<2x32xf32>
    %273 = arith.subf %272, %271 : vector<2x32xf32>
    %274 = math.exp %273 : vector<2x32xf32>
    %cst_87 = arith.constant 1.000000e+00 : f32
    %275 = vector.broadcast %cst_87 : f32 to vector<2x32xf32>
    %276 = arith.addf %275, %274 : vector<2x32xf32>
    %277 = tpu.reciprocal %276 {approx = true} : vector<2x32xf32> -> vector<2x32xf32>
    %278 = vector.extract_strided_slice %263 {offsets = [0, 64], sizes = [2, 32], strides = [1, 1]} : vector<2x128xf32> to vector<2x32xf32>
    %279 = math.tanh %278 : vector<2x32xf32>
    %280 = vector.extract_strided_slice %263 {offsets = [0, 96], sizes = [2, 32], strides = [1, 1]} : vector<2x128xf32> to vector<2x32xf32>
    %cst_88 = arith.constant 0.000000e+00 : f32
    %281 = vector.broadcast %cst_88 : f32 to vector<2x32xf32>
    %282 = arith.subf %281, %280 : vector<2x32xf32>
    %283 = math.exp %282 : vector<2x32xf32>
    %cst_89 = arith.constant 1.000000e+00 : f32
    %284 = vector.broadcast %cst_89 : f32 to vector<2x32xf32>
    %285 = arith.addf %284, %283 : vector<2x32xf32>
    %286 = tpu.reciprocal %285 {approx = true} : vector<2x32xf32> -> vector<2x32xf32>
    %287 = arith.mulf %277, %177 : vector<2x32xf32>
    %288 = arith.mulf %270, %279 : vector<2x32xf32>
    %289 = arith.addf %287, %288 : vector<2x32xf32>
    %290 = math.tanh %289 : vector<2x32xf32>
    %291 = arith.mulf %286, %290 : vector<2x32xf32>
    %292 = tpu.concatenate %291, %211 in 1 : vector<2x32xf32>, vector<2x32xf32> -> vector<2x64xf32>
    %cst_90 = arith.constant dense<0.000000e+00> : vector<2x128xf32>
    %293 = tpu.matmul %292, %15, %cst_90 {dimension_numbers = #tpu.dot_dimension_numbers<[1], [0], [0], [1], [0, 0, 1, 1], [], []>} : vector<2x64xf32>, vector<64x128xf32>, vector<2x128xf32> -> vector<2x128xf32>
    %294 = vector.broadcast %17 : vector<1x128xf32> to vector<2x128xf32>
    %295 = arith.addf %293, %294 : vector<2x128xf32>
    %296 = vector.extract_strided_slice %295 {offsets = [0, 0], sizes = [2, 32], strides = [1, 1]} : vector<2x128xf32> to vector<2x32xf32>
    %cst_91 = arith.constant 0.000000e+00 : f32
    %297 = vector.broadcast %cst_91 : f32 to vector<2x32xf32>
    %298 = arith.subf %297, %296 : vector<2x32xf32>
    %299 = math.exp %298 : vector<2x32xf32>
    %cst_92 = arith.constant 1.000000e+00 : f32
    %300 = vector.broadcast %cst_92 : f32 to vector<2x32xf32>
    %301 = arith.addf %300, %299 : vector<2x32xf32>
    %302 = tpu.reciprocal %301 {approx = true} : vector<2x32xf32> -> vector<2x32xf32>
    %303 = vector.extract_strided_slice %295 {offsets = [0, 32], sizes = [2, 32], strides = [1, 1]} : vector<2x128xf32> to vector<2x32xf32>
    %cst_93 = arith.constant 0.000000e+00 : f32
    %304 = vector.broadcast %cst_93 : f32 to vector<2x32xf32>
    %305 = arith.subf %304, %303 : vector<2x32xf32>
    %306 = math.exp %305 : vector<2x32xf32>
    %cst_94 = arith.constant 1.000000e+00 : f32
    %307 = vector.broadcast %cst_94 : f32 to vector<2x32xf32>
    %308 = arith.addf %307, %306 : vector<2x32xf32>
    %309 = tpu.reciprocal %308 {approx = true} : vector<2x32xf32> -> vector<2x32xf32>
    %310 = vector.extract_strided_slice %295 {offsets = [0, 64], sizes = [2, 32], strides = [1, 1]} : vector<2x128xf32> to vector<2x32xf32>
    %311 = math.tanh %310 : vector<2x32xf32>
    %312 = vector.extract_strided_slice %295 {offsets = [0, 96], sizes = [2, 32], strides = [1, 1]} : vector<2x128xf32> to vector<2x32xf32>
    %cst_95 = arith.constant 0.000000e+00 : f32
    %313 = vector.broadcast %cst_95 : f32 to vector<2x32xf32>
    %314 = arith.subf %313, %312 : vector<2x32xf32>
    %315 = math.exp %314 : vector<2x32xf32>
    %cst_96 = arith.constant 1.000000e+00 : f32
    %316 = vector.broadcast %cst_96 : f32 to vector<2x32xf32>
    %317 = arith.addf %316, %315 : vector<2x32xf32>
    %318 = tpu.reciprocal %317 {approx = true} : vector<2x32xf32> -> vector<2x32xf32>
    %319 = arith.mulf %309, %209 : vector<2x32xf32>
    %320 = arith.mulf %302, %311 : vector<2x32xf32>
    %321 = arith.addf %319, %320 : vector<2x32xf32>
    %322 = math.tanh %321 : vector<2x32xf32>
    %323 = arith.mulf %318, %322 : vector<2x32xf32>
    %cst_97 = arith.constant dense<0.000000e+00> : vector<2x7xf32>
    %324 = tpu.matmul %323, %18, %cst_97 {dimension_numbers = #tpu.dot_dimension_numbers<[1], [0], [0], [1], [0, 0, 1, 1], [], []>} : vector<2x32xf32>, vector<32x7xf32>, vector<2x7xf32> -> vector<2x7xf32>
    %325 = vector.broadcast %19 : vector<1x7xf32> to vector<2x7xf32>
    %326 = arith.addf %324, %325 : vector<2x7xf32>
    %cst_98 = arith.constant 0xFF800000 : f32
    %327 = vector.broadcast %cst_98 : f32 to vector<2x7xf32>
    %328 = arith.select %3, %326, %327 : vector<2x7xi1>, vector<2x7xf32>
    %cst_99 = arith.constant dense<0xFF800000> : vector<2xf32>
    %329 = vector.multi_reduction <maximumf>, %328, %cst_99 [1] : vector<2x7xf32> to vector<2xf32>
    %330 = vector.shape_cast %329 : vector<2xf32> to vector<2x1xf32>
    %331 = vector.broadcast %330 : vector<2x1xf32> to vector<2x7xf32>
    %332 = arith.subf %328, %331 : vector<2x7xf32>
    %333 = math.exp %332 : vector<2x7xf32>
    %cst_100 = arith.constant dense<0.000000e+00> : vector<2xf32>
    %334 = vector.multi_reduction <add>, %333, %cst_100 [1] : vector<2x7xf32> to vector<2xf32>
    %335 = vector.shape_cast %334 : vector<2xf32> to vector<2x1xf32>
    %336 = math.log %335 : vector<2x1xf32>
    %337 = arith.addf %330, %336 : vector<2x1xf32>
    %cst_101 = arith.constant 0.000000e+00 : f32
    %338 = vector.broadcast %cst_101 : f32 to vector<2x7xf32>
    %339 = arith.minimumf %326, %338 : vector<2x7xf32>
    %340 = math.absf %326 : vector<2x7xf32>
    %cst_102 = arith.constant 0.000000e+00 : f32
    %341 = vector.broadcast %cst_102 : f32 to vector<2x7xf32>
    %342 = arith.subf %341, %340 : vector<2x7xf32>
    %343 = math.exp %342 : vector<2x7xf32>
    %cst_103 = arith.constant 1.000000e+00 : f32
    %344 = vector.broadcast %cst_103 : f32 to vector<2x7xf32>
    %345 = arith.addf %344, %343 : vector<2x7xf32>
    %346 = math.log %345 : vector<2x7xf32>
    %347 = arith.subf %339, %346 : vector<2x7xf32>
    %348 = vector.broadcast %337 : vector<2x1xf32> to vector<2x7xf32>
    %349 = arith.subf %326, %348 : vector<2x7xf32>
    %350 = arith.select %3, %349, %347 : vector<2x7xi1>, vector<2x7xf32>
    %c0_104 = arith.constant 0 : index
    %c14 = arith.constant 14 : index
    %351 = vector.load %arg8[%c0_104, %c14] : memref<2x56xf32, #tpu.memory_space<vmem>>, vector<2x7xf32>
    tpu.vector_store %arg8[%c0_104, %c14], %350 {strides = array<i32>} : memref<2x56xf32, #tpu.memory_space<vmem>>, vector<2x7xf32>,
    %352 = vector.broadcast %330 : vector<2x1xf32> to vector<2x7xf32>
    %353 = arith.cmpf oeq, %328, %352 : vector<2x7xf32>
    %c7_i32_105 = arith.constant 7 : i32
    %354 = vector.broadcast %c7_i32_105 : i32 to vector<2x7xi32>
    %355 = arith.select %353, %1, %354 : vector<2x7xi1>, vector<2x7xi32>
    %cst_106 = arith.constant dense<2147483647> : vector<2xi32>
    %356 = vector.multi_reduction <minsi>, %355, %cst_106 [1] : vector<2x7xi32> to vector<2xi32>
    %357 = vector.shape_cast %356 : vector<2xi32> to vector<2x1xi32>
    %358 = vector.broadcast %357 : vector<2x1xi32> to vector<2x32xi32>
    %359 = arith.cmpi eq, %0, %358 : vector<2x32xi32>
    %360 = arith.extui %359 : vector<2x32xi1> to vector<2x32xi32>
    %361 = arith.sitofp %360 : vector<2x32xi32> to vector<2x32xf32>
    %362 = vector.extract_strided_slice %326 {offsets = [0, 6], sizes = [2, 1], strides = [1, 1]} : vector<2x7xf32> to vector<2x1xf32>
    %cst_107 = arith.constant 0.000000e+00 : f32
    %363 = vector.broadcast %cst_107 : f32 to vector<2x1xf32>
    %364 = arith.subf %363, %362 : vector<2x1xf32>
    %365 = math.exp %364 : vector<2x1xf32>
    %cst_108 = arith.constant 1.000000e+00 : f32
    %366 = vector.broadcast %cst_108 : f32 to vector<2x1xf32>
    %367 = arith.addf %366, %365 : vector<2x1xf32>
    %368 = tpu.reciprocal %367 {approx = true} : vector<2x1xf32> -> vector<2x1xf32>
    %369 = tpu.concatenate %361, %291 in 1 : vector<2x32xf32>, vector<2x32xf32> -> vector<2x64xf32>
    %370 = vector.broadcast %368 : vector<2x1xf32> to vector<2x128xf32>
    %371 = vector.broadcast %5 : vector<1x128xf32> to vector<2x128xf32>
    %372 = arith.mulf %370, %371 : vector<2x128xf32>
    %373 = arith.addf %11, %372 : vector<2x128xf32>
    %cst_109 = arith.constant dense<0.000000e+00> : vector<2x128xf32>
    %374 = tpu.matmul %369, %13, %cst_109 {dimension_numbers = #tpu.dot_dimension_numbers<[1], [0], [0], [1], [0, 0, 1, 1], [], []>} : vector<2x64xf32>, vector<64x128xf32>, vector<2x128xf32> -> vector<2x128xf32>
    %375 = arith.addf %374, %373 : vector<2x128xf32>
    %376 = vector.extract_strided_slice %375 {offsets = [0, 0], sizes = [2, 32], strides = [1, 1]} : vector<2x128xf32> to vector<2x32xf32>
    %cst_110 = arith.constant 0.000000e+00 : f32
    %377 = vector.broadcast %cst_110 : f32 to vector<2x32xf32>
    %378 = arith.subf %377, %376 : vector<2x32xf32>
    %379 = math.exp %378 : vector<2x32xf32>
    %cst_111 = arith.constant 1.000000e+00 : f32
    %380 = vector.broadcast %cst_111 : f32 to vector<2x32xf32>
    %381 = arith.addf %380, %379 : vector<2x32xf32>
    %382 = tpu.reciprocal %381 {approx = true} : vector<2x32xf32> -> vector<2x32xf32>
    %383 = vector.extract_strided_slice %375 {offsets = [0, 32], sizes = [2, 32], strides = [1, 1]} : vector<2x128xf32> to vector<2x32xf32>
    %cst_112 = arith.constant 0.000000e+00 : f32
    %384 = vector.broadcast %cst_112 : f32 to vector<2x32xf32>
    %385 = arith.subf %384, %383 : vector<2x32xf32>
    %386 = math.exp %385 : vector<2x32xf32>
    %cst_113 = arith.constant 1.000000e+00 : f32
    %387 = vector.broadcast %cst_113 : f32 to vector<2x32xf32>
    %388 = arith.addf %387, %386 : vector<2x32xf32>
    %389 = tpu.reciprocal %388 {approx = true} : vector<2x32xf32> -> vector<2x32xf32>
    %390 = vector.extract_strided_slice %375 {offsets = [0, 64], sizes = [2, 32], strides = [1, 1]} : vector<2x128xf32> to vector<2x32xf32>
    %391 = math.tanh %390 : vector<2x32xf32>
    %392 = vector.extract_strided_slice %375 {offsets = [0, 96], sizes = [2, 32], strides = [1, 1]} : vector<2x128xf32> to vector<2x32xf32>
    %cst_114 = arith.constant 0.000000e+00 : f32
    %393 = vector.broadcast %cst_114 : f32 to vector<2x32xf32>
    %394 = arith.subf %393, %392 : vector<2x32xf32>
    %395 = math.exp %394 : vector<2x32xf32>
    %cst_115 = arith.constant 1.000000e+00 : f32
    %396 = vector.broadcast %cst_115 : f32 to vector<2x32xf32>
    %397 = arith.addf %396, %395 : vector<2x32xf32>
    %398 = tpu.reciprocal %397 {approx = true} : vector<2x32xf32> -> vector<2x32xf32>
    %399 = arith.mulf %389, %289 : vector<2x32xf32>
    %400 = arith.mulf %382, %391 : vector<2x32xf32>
    %401 = arith.addf %399, %400 : vector<2x32xf32>
    %402 = math.tanh %401 : vector<2x32xf32>
    %403 = arith.mulf %398, %402 : vector<2x32xf32>
    %404 = tpu.concatenate %403, %323 in 1 : vector<2x32xf32>, vector<2x32xf32> -> vector<2x64xf32>
    %cst_116 = arith.constant dense<0.000000e+00> : vector<2x128xf32>
    %405 = tpu.matmul %404, %15, %cst_116 {dimension_numbers = #tpu.dot_dimension_numbers<[1], [0], [0], [1], [0, 0, 1, 1], [], []>} : vector<2x64xf32>, vector<64x128xf32>, vector<2x128xf32> -> vector<2x128xf32>
    %406 = vector.broadcast %17 : vector<1x128xf32> to vector<2x128xf32>
    %407 = arith.addf %405, %406 : vector<2x128xf32>
    %408 = vector.extract_strided_slice %407 {offsets = [0, 0], sizes = [2, 32], strides = [1, 1]} : vector<2x128xf32> to vector<2x32xf32>
    %cst_117 = arith.constant 0.000000e+00 : f32
    %409 = vector.broadcast %cst_117 : f32 to vector<2x32xf32>
    %410 = arith.subf %409, %408 : vector<2x32xf32>
    %411 = math.exp %410 : vector<2x32xf32>
    %cst_118 = arith.constant 1.000000e+00 : f32
    %412 = vector.broadcast %cst_118 : f32 to vector<2x32xf32>
    %413 = arith.addf %412, %411 : vector<2x32xf32>
    %414 = tpu.reciprocal %413 {approx = true} : vector<2x32xf32> -> vector<2x32xf32>
    %415 = vector.extract_strided_slice %407 {offsets = [0, 32], sizes = [2, 32], strides = [1, 1]} : vector<2x128xf32> to vector<2x32xf32>
    %cst_119 = arith.constant 0.000000e+00 : f32
    %416 = vector.broadcast %cst_119 : f32 to vector<2x32xf32>
    %417 = arith.subf %416, %415 : vector<2x32xf32>
    %418 = math.exp %417 : vector<2x32xf32>
    %cst_120 = arith.constant 1.000000e+00 : f32
    %419 = vector.broadcast %cst_120 : f32 to vector<2x32xf32>
    %420 = arith.addf %419, %418 : vector<2x32xf32>
    %421 = tpu.reciprocal %420 {approx = true} : vector<2x32xf32> -> vector<2x32xf32>
    %422 = vector.extract_strided_slice %407 {offsets = [0, 64], sizes = [2, 32], strides = [1, 1]} : vector<2x128xf32> to vector<2x32xf32>
    %423 = math.tanh %422 : vector<2x32xf32>
    %424 = vector.extract_strided_slice %407 {offsets = [0, 96], sizes = [2, 32], strides = [1, 1]} : vector<2x128xf32> to vector<2x32xf32>
    %cst_121 = arith.constant 0.000000e+00 : f32
    %425 = vector.broadcast %cst_121 : f32 to vector<2x32xf32>
    %426 = arith.subf %425, %424 : vector<2x32xf32>
    %427 = math.exp %426 : vector<2x32xf32>
    %cst_122 = arith.constant 1.000000e+00 : f32
    %428 = vector.broadcast %cst_122 : f32 to vector<2x32xf32>
    %429 = arith.addf %428, %427 : vector<2x32xf32>
    %430 = tpu.reciprocal %429 {approx = true} : vector<2x32xf32> -> vector<2x32xf32>
    %431 = arith.mulf %421, %321 : vector<2x32xf32>
    %432 = arith.mulf %414, %423 : vector<2x32xf32>
    %433 = arith.addf %431, %432 : vector<2x32xf32>
    %434 = math.tanh %433 : vector<2x32xf32>
    %435 = arith.mulf %430, %434 : vector<2x32xf32>
    %cst_123 = arith.constant dense<0.000000e+00> : vector<2x7xf32>
    %436 = tpu.matmul %435, %18, %cst_123 {dimension_numbers = #tpu.dot_dimension_numbers<[1], [0], [0], [1], [0, 0, 1, 1], [], []>} : vector<2x32xf32>, vector<32x7xf32>, vector<2x7xf32> -> vector<2x7xf32>
    %437 = vector.broadcast %19 : vector<1x7xf32> to vector<2x7xf32>
    %438 = arith.addf %436, %437 : vector<2x7xf32>
    %cst_124 = arith.constant 0xFF800000 : f32
    %439 = vector.broadcast %cst_124 : f32 to vector<2x7xf32>
    %440 = arith.select %3, %438, %439 : vector<2x7xi1>, vector<2x7xf32>
    %cst_125 = arith.constant dense<0xFF800000> : vector<2xf32>
    %441 = vector.multi_reduction <maximumf>, %440, %cst_125 [1] : vector<2x7xf32> to vector<2xf32>
    %442 = vector.shape_cast %441 : vector<2xf32> to vector<2x1xf32>
    %443 = vector.broadcast %442 : vector<2x1xf32> to vector<2x7xf32>
    %444 = arith.subf %440, %443 : vector<2x7xf32>
    %445 = math.exp %444 : vector<2x7xf32>
    %cst_126 = arith.constant dense<0.000000e+00> : vector<2xf32>
    %446 = vector.multi_reduction <add>, %445, %cst_126 [1] : vector<2x7xf32> to vector<2xf32>
    %447 = vector.shape_cast %446 : vector<2xf32> to vector<2x1xf32>
    %448 = math.log %447 : vector<2x1xf32>
    %449 = arith.addf %442, %448 : vector<2x1xf32>
    %cst_127 = arith.constant 0.000000e+00 : f32
    %450 = vector.broadcast %cst_127 : f32 to vector<2x7xf32>
    %451 = arith.minimumf %438, %450 : vector<2x7xf32>
    %452 = math.absf %438 : vector<2x7xf32>
    %cst_128 = arith.constant 0.000000e+00 : f32
    %453 = vector.broadcast %cst_128 : f32 to vector<2x7xf32>
    %454 = arith.subf %453, %452 : vector<2x7xf32>
    %455 = math.exp %454 : vector<2x7xf32>
    %cst_129 = arith.constant 1.000000e+00 : f32
    %456 = vector.broadcast %cst_129 : f32 to vector<2x7xf32>
    %457 = arith.addf %456, %455 : vector<2x7xf32>
    %458 = math.log %457 : vector<2x7xf32>
    %459 = arith.subf %451, %458 : vector<2x7xf32>
    %460 = vector.broadcast %449 : vector<2x1xf32> to vector<2x7xf32>
    %461 = arith.subf %438, %460 : vector<2x7xf32>
    %462 = arith.select %3, %461, %459 : vector<2x7xi1>, vector<2x7xf32>
    %c0_130 = arith.constant 0 : index
    %c21 = arith.constant 21 : index
    %463 = vector.load %arg8[%c0_130, %c21] : memref<2x56xf32, #tpu.memory_space<vmem>>, vector<2x7xf32>
    tpu.vector_store %arg8[%c0_130, %c21], %462 {strides = array<i32>} : memref<2x56xf32, #tpu.memory_space<vmem>>, vector<2x7xf32>,
    %464 = vector.broadcast %442 : vector<2x1xf32> to vector<2x7xf32>
    %465 = arith.cmpf oeq, %440, %464 : vector<2x7xf32>
    %c7_i32_131 = arith.constant 7 : i32
    %466 = vector.broadcast %c7_i32_131 : i32 to vector<2x7xi32>
    %467 = arith.select %465, %1, %466 : vector<2x7xi1>, vector<2x7xi32>
    %cst_132 = arith.constant dense<2147483647> : vector<2xi32>
    %468 = vector.multi_reduction <minsi>, %467, %cst_132 [1] : vector<2x7xi32> to vector<2xi32>
    %469 = vector.shape_cast %468 : vector<2xi32> to vector<2x1xi32>
    %470 = vector.broadcast %469 : vector<2x1xi32> to vector<2x32xi32>
    %471 = arith.cmpi eq, %0, %470 : vector<2x32xi32>
    %472 = arith.extui %471 : vector<2x32xi1> to vector<2x32xi32>
    %473 = arith.sitofp %472 : vector<2x32xi32> to vector<2x32xf32>
    %474 = vector.extract_strided_slice %438 {offsets = [0, 6], sizes = [2, 1], strides = [1, 1]} : vector<2x7xf32> to vector<2x1xf32>
    %cst_133 = arith.constant 0.000000e+00 : f32
    %475 = vector.broadcast %cst_133 : f32 to vector<2x1xf32>
    %476 = arith.subf %475, %474 : vector<2x1xf32>
    %477 = math.exp %476 : vector<2x1xf32>
    %cst_134 = arith.constant 1.000000e+00 : f32
    %478 = vector.broadcast %cst_134 : f32 to vector<2x1xf32>
    %479 = arith.addf %478, %477 : vector<2x1xf32>
    %480 = tpu.reciprocal %479 {approx = true} : vector<2x1xf32> -> vector<2x1xf32>
    %481 = tpu.concatenate %473, %403 in 1 : vector<2x32xf32>, vector<2x32xf32> -> vector<2x64xf32>
    %482 = vector.broadcast %480 : vector<2x1xf32> to vector<2x128xf32>
    %483 = vector.broadcast %5 : vector<1x128xf32> to vector<2x128xf32>
    %484 = arith.mulf %482, %483 : vector<2x128xf32>
    %485 = arith.addf %11, %484 : vector<2x128xf32>
    %cst_135 = arith.constant dense<0.000000e+00> : vector<2x128xf32>
    %486 = tpu.matmul %481, %13, %cst_135 {dimension_numbers = #tpu.dot_dimension_numbers<[1], [0], [0], [1], [0, 0, 1, 1], [], []>} : vector<2x64xf32>, vector<64x128xf32>, vector<2x128xf32> -> vector<2x128xf32>
    %487 = arith.addf %486, %485 : vector<2x128xf32>
    %488 = vector.extract_strided_slice %487 {offsets = [0, 0], sizes = [2, 32], strides = [1, 1]} : vector<2x128xf32> to vector<2x32xf32>
    %cst_136 = arith.constant 0.000000e+00 : f32
    %489 = vector.broadcast %cst_136 : f32 to vector<2x32xf32>
    %490 = arith.subf %489, %488 : vector<2x32xf32>
    %491 = math.exp %490 : vector<2x32xf32>
    %cst_137 = arith.constant 1.000000e+00 : f32
    %492 = vector.broadcast %cst_137 : f32 to vector<2x32xf32>
    %493 = arith.addf %492, %491 : vector<2x32xf32>
    %494 = tpu.reciprocal %493 {approx = true} : vector<2x32xf32> -> vector<2x32xf32>
    %495 = vector.extract_strided_slice %487 {offsets = [0, 32], sizes = [2, 32], strides = [1, 1]} : vector<2x128xf32> to vector<2x32xf32>
    %cst_138 = arith.constant 0.000000e+00 : f32
    %496 = vector.broadcast %cst_138 : f32 to vector<2x32xf32>
    %497 = arith.subf %496, %495 : vector<2x32xf32>
    %498 = math.exp %497 : vector<2x32xf32>
    %cst_139 = arith.constant 1.000000e+00 : f32
    %499 = vector.broadcast %cst_139 : f32 to vector<2x32xf32>
    %500 = arith.addf %499, %498 : vector<2x32xf32>
    %501 = tpu.reciprocal %500 {approx = true} : vector<2x32xf32> -> vector<2x32xf32>
    %502 = vector.extract_strided_slice %487 {offsets = [0, 64], sizes = [2, 32], strides = [1, 1]} : vector<2x128xf32> to vector<2x32xf32>
    %503 = math.tanh %502 : vector<2x32xf32>
    %504 = vector.extract_strided_slice %487 {offsets = [0, 96], sizes = [2, 32], strides = [1, 1]} : vector<2x128xf32> to vector<2x32xf32>
    %cst_140 = arith.constant 0.000000e+00 : f32
    %505 = vector.broadcast %cst_140 : f32 to vector<2x32xf32>
    %506 = arith.subf %505, %504 : vector<2x32xf32>
    %507 = math.exp %506 : vector<2x32xf32>
    %cst_141 = arith.constant 1.000000e+00 : f32
    %508 = vector.broadcast %cst_141 : f32 to vector<2x32xf32>
    %509 = arith.addf %508, %507 : vector<2x32xf32>
    %510 = tpu.reciprocal %509 {approx = true} : vector<2x32xf32> -> vector<2x32xf32>
    %511 = arith.mulf %501, %401 : vector<2x32xf32>
    %512 = arith.mulf %494, %503 : vector<2x32xf32>
    %513 = arith.addf %511, %512 : vector<2x32xf32>
    %514 = math.tanh %513 : vector<2x32xf32>
    %515 = arith.mulf %510, %514 : vector<2x32xf32>
    %516 = tpu.concatenate %515, %435 in 1 : vector<2x32xf32>, vector<2x32xf32> -> vector<2x64xf32>
    %cst_142 = arith.constant dense<0.000000e+00> : vector<2x128xf32>
    %517 = tpu.matmul %516, %15, %cst_142 {dimension_numbers = #tpu.dot_dimension_numbers<[1], [0], [0], [1], [0, 0, 1, 1], [], []>} : vector<2x64xf32>, vector<64x128xf32>, vector<2x128xf32> -> vector<2x128xf32>
    %518 = vector.broadcast %17 : vector<1x128xf32> to vector<2x128xf32>
    %519 = arith.addf %517, %518 : vector<2x128xf32>
    %520 = vector.extract_strided_slice %519 {offsets = [0, 0], sizes = [2, 32], strides = [1, 1]} : vector<2x128xf32> to vector<2x32xf32>
    %cst_143 = arith.constant 0.000000e+00 : f32
    %521 = vector.broadcast %cst_143 : f32 to vector<2x32xf32>
    %522 = arith.subf %521, %520 : vector<2x32xf32>
    %523 = math.exp %522 : vector<2x32xf32>
    %cst_144 = arith.constant 1.000000e+00 : f32
    %524 = vector.broadcast %cst_144 : f32 to vector<2x32xf32>
    %525 = arith.addf %524, %523 : vector<2x32xf32>
    %526 = tpu.reciprocal %525 {approx = true} : vector<2x32xf32> -> vector<2x32xf32>
    %527 = vector.extract_strided_slice %519 {offsets = [0, 32], sizes = [2, 32], strides = [1, 1]} : vector<2x128xf32> to vector<2x32xf32>
    %cst_145 = arith.constant 0.000000e+00 : f32
    %528 = vector.broadcast %cst_145 : f32 to vector<2x32xf32>
    %529 = arith.subf %528, %527 : vector<2x32xf32>
    %530 = math.exp %529 : vector<2x32xf32>
    %cst_146 = arith.constant 1.000000e+00 : f32
    %531 = vector.broadcast %cst_146 : f32 to vector<2x32xf32>
    %532 = arith.addf %531, %530 : vector<2x32xf32>
    %533 = tpu.reciprocal %532 {approx = true} : vector<2x32xf32> -> vector<2x32xf32>
    %534 = vector.extract_strided_slice %519 {offsets = [0, 64], sizes = [2, 32], strides = [1, 1]} : vector<2x128xf32> to vector<2x32xf32>
    %535 = math.tanh %534 : vector<2x32xf32>
    %536 = vector.extract_strided_slice %519 {offsets = [0, 96], sizes = [2, 32], strides = [1, 1]} : vector<2x128xf32> to vector<2x32xf32>
    %cst_147 = arith.constant 0.000000e+00 : f32
    %537 = vector.broadcast %cst_147 : f32 to vector<2x32xf32>
    %538 = arith.subf %537, %536 : vector<2x32xf32>
    %539 = math.exp %538 : vector<2x32xf32>
    %cst_148 = arith.constant 1.000000e+00 : f32
    %540 = vector.broadcast %cst_148 : f32 to vector<2x32xf32>
    %541 = arith.addf %540, %539 : vector<2x32xf32>
    %542 = tpu.reciprocal %541 {approx = true} : vector<2x32xf32> -> vector<2x32xf32>
    %543 = arith.mulf %533, %433 : vector<2x32xf32>
    %544 = arith.mulf %526, %535 : vector<2x32xf32>
    %545 = arith.addf %543, %544 : vector<2x32xf32>
    %546 = math.tanh %545 : vector<2x32xf32>
    %547 = arith.mulf %542, %546 : vector<2x32xf32>
    %cst_149 = arith.constant dense<0.000000e+00> : vector<2x7xf32>
    %548 = tpu.matmul %547, %18, %cst_149 {dimension_numbers = #tpu.dot_dimension_numbers<[1], [0], [0], [1], [0, 0, 1, 1], [], []>} : vector<2x32xf32>, vector<32x7xf32>, vector<2x7xf32> -> vector<2x7xf32>
    %549 = vector.broadcast %19 : vector<1x7xf32> to vector<2x7xf32>
    %550 = arith.addf %548, %549 : vector<2x7xf32>
    %cst_150 = arith.constant 0xFF800000 : f32
    %551 = vector.broadcast %cst_150 : f32 to vector<2x7xf32>
    %552 = arith.select %3, %550, %551 : vector<2x7xi1>, vector<2x7xf32>
    %cst_151 = arith.constant dense<0xFF800000> : vector<2xf32>
    %553 = vector.multi_reduction <maximumf>, %552, %cst_151 [1] : vector<2x7xf32> to vector<2xf32>
    %554 = vector.shape_cast %553 : vector<2xf32> to vector<2x1xf32>
    %555 = vector.broadcast %554 : vector<2x1xf32> to vector<2x7xf32>
    %556 = arith.subf %552, %555 : vector<2x7xf32>
    %557 = math.exp %556 : vector<2x7xf32>
    %cst_152 = arith.constant dense<0.000000e+00> : vector<2xf32>
    %558 = vector.multi_reduction <add>, %557, %cst_152 [1] : vector<2x7xf32> to vector<2xf32>
    %559 = vector.shape_cast %558 : vector<2xf32> to vector<2x1xf32>
    %560 = math.log %559 : vector<2x1xf32>
    %561 = arith.addf %554, %560 : vector<2x1xf32>
    %cst_153 = arith.constant 0.000000e+00 : f32
    %562 = vector.broadcast %cst_153 : f32 to vector<2x7xf32>
    %563 = arith.minimumf %550, %562 : vector<2x7xf32>
    %564 = math.absf %550 : vector<2x7xf32>
    %cst_154 = arith.constant 0.000000e+00 : f32
    %565 = vector.broadcast %cst_154 : f32 to vector<2x7xf32>
    %566 = arith.subf %565, %564 : vector<2x7xf32>
    %567 = math.exp %566 : vector<2x7xf32>
    %cst_155 = arith.constant 1.000000e+00 : f32
    %568 = vector.broadcast %cst_155 : f32 to vector<2x7xf32>
    %569 = arith.addf %568, %567 : vector<2x7xf32>
    %570 = math.log %569 : vector<2x7xf32>
    %571 = arith.subf %563, %570 : vector<2x7xf32>
    %572 = vector.broadcast %561 : vector<2x1xf32> to vector<2x7xf32>
    %573 = arith.subf %550, %572 : vector<2x7xf32>
    %574 = arith.select %3, %573, %571 : vector<2x7xi1>, vector<2x7xf32>
    %c0_156 = arith.constant 0 : index
    %c28 = arith.constant 28 : index
    %575 = vector.load %arg8[%c0_156, %c28] : memref<2x56xf32, #tpu.memory_space<vmem>>, vector<2x7xf32>
    tpu.vector_store %arg8[%c0_156, %c28], %574 {strides = array<i32>} : memref<2x56xf32, #tpu.memory_space<vmem>>, vector<2x7xf32>,
    %576 = vector.broadcast %554 : vector<2x1xf32> to vector<2x7xf32>
    %577 = arith.cmpf oeq, %552, %576 : vector<2x7xf32>
    %c7_i32_157 = arith.constant 7 : i32
    %578 = vector.broadcast %c7_i32_157 : i32 to vector<2x7xi32>
    %579 = arith.select %577, %1, %578 : vector<2x7xi1>, vector<2x7xi32>
    %cst_158 = arith.constant dense<2147483647> : vector<2xi32>
    %580 = vector.multi_reduction <minsi>, %579, %cst_158 [1] : vector<2x7xi32> to vector<2xi32>
    %581 = vector.shape_cast %580 : vector<2xi32> to vector<2x1xi32>
    %582 = vector.broadcast %581 : vector<2x1xi32> to vector<2x32xi32>
    %583 = arith.cmpi eq, %0, %582 : vector<2x32xi32>
    %584 = arith.extui %583 : vector<2x32xi1> to vector<2x32xi32>
    %585 = arith.sitofp %584 : vector<2x32xi32> to vector<2x32xf32>
    %586 = vector.extract_strided_slice %550 {offsets = [0, 6], sizes = [2, 1], strides = [1, 1]} : vector<2x7xf32> to vector<2x1xf32>
    %cst_159 = arith.constant 0.000000e+00 : f32
    %587 = vector.broadcast %cst_159 : f32 to vector<2x1xf32>
    %588 = arith.subf %587, %586 : vector<2x1xf32>
    %589 = math.exp %588 : vector<2x1xf32>
    %cst_160 = arith.constant 1.000000e+00 : f32
    %590 = vector.broadcast %cst_160 : f32 to vector<2x1xf32>
    %591 = arith.addf %590, %589 : vector<2x1xf32>
    %592 = tpu.reciprocal %591 {approx = true} : vector<2x1xf32> -> vector<2x1xf32>
    %593 = tpu.concatenate %585, %515 in 1 : vector<2x32xf32>, vector<2x32xf32> -> vector<2x64xf32>
    %594 = vector.broadcast %592 : vector<2x1xf32> to vector<2x128xf32>
    %595 = vector.broadcast %5 : vector<1x128xf32> to vector<2x128xf32>
    %596 = arith.mulf %594, %595 : vector<2x128xf32>
    %597 = arith.addf %11, %596 : vector<2x128xf32>
    %cst_161 = arith.constant dense<0.000000e+00> : vector<2x128xf32>
    %598 = tpu.matmul %593, %13, %cst_161 {dimension_numbers = #tpu.dot_dimension_numbers<[1], [0], [0], [1], [0, 0, 1, 1], [], []>} : vector<2x64xf32>, vector<64x128xf32>, vector<2x128xf32> -> vector<2x128xf32>
    %599 = arith.addf %598, %597 : vector<2x128xf32>
    %600 = vector.extract_strided_slice %599 {offsets = [0, 0], sizes = [2, 32], strides = [1, 1]} : vector<2x128xf32> to vector<2x32xf32>
    %cst_162 = arith.constant 0.000000e+00 : f32
    %601 = vector.broadcast %cst_162 : f32 to vector<2x32xf32>
    %602 = arith.subf %601, %600 : vector<2x32xf32>
    %603 = math.exp %602 : vector<2x32xf32>
    %cst_163 = arith.constant 1.000000e+00 : f32
    %604 = vector.broadcast %cst_163 : f32 to vector<2x32xf32>
    %605 = arith.addf %604, %603 : vector<2x32xf32>
    %606 = tpu.reciprocal %605 {approx = true} : vector<2x32xf32> -> vector<2x32xf32>
    %607 = vector.extract_strided_slice %599 {offsets = [0, 32], sizes = [2, 32], strides = [1, 1]} : vector<2x128xf32> to vector<2x32xf32>
    %cst_164 = arith.constant 0.000000e+00 : f32
    %608 = vector.broadcast %cst_164 : f32 to vector<2x32xf32>
    %609 = arith.subf %608, %607 : vector<2x32xf32>
    %610 = math.exp %609 : vector<2x32xf32>
    %cst_165 = arith.constant 1.000000e+00 : f32
    %611 = vector.broadcast %cst_165 : f32 to vector<2x32xf32>
    %612 = arith.addf %611, %610 : vector<2x32xf32>
    %613 = tpu.reciprocal %612 {approx = true} : vector<2x32xf32> -> vector<2x32xf32>
    %614 = vector.extract_strided_slice %599 {offsets = [0, 64], sizes = [2, 32], strides = [1, 1]} : vector<2x128xf32> to vector<2x32xf32>
    %615 = math.tanh %614 : vector<2x32xf32>
    %616 = vector.extract_strided_slice %599 {offsets = [0, 96], sizes = [2, 32], strides = [1, 1]} : vector<2x128xf32> to vector<2x32xf32>
    %cst_166 = arith.constant 0.000000e+00 : f32
    %617 = vector.broadcast %cst_166 : f32 to vector<2x32xf32>
    %618 = arith.subf %617, %616 : vector<2x32xf32>
    %619 = math.exp %618 : vector<2x32xf32>
    %cst_167 = arith.constant 1.000000e+00 : f32
    %620 = vector.broadcast %cst_167 : f32 to vector<2x32xf32>
    %621 = arith.addf %620, %619 : vector<2x32xf32>
    %622 = tpu.reciprocal %621 {approx = true} : vector<2x32xf32> -> vector<2x32xf32>
    %623 = arith.mulf %613, %513 : vector<2x32xf32>
    %624 = arith.mulf %606, %615 : vector<2x32xf32>
    %625 = arith.addf %623, %624 : vector<2x32xf32>
    %626 = math.tanh %625 : vector<2x32xf32>
    %627 = arith.mulf %622, %626 : vector<2x32xf32>
    %628 = tpu.concatenate %627, %547 in 1 : vector<2x32xf32>, vector<2x32xf32> -> vector<2x64xf32>
    %cst_168 = arith.constant dense<0.000000e+00> : vector<2x128xf32>
    %629 = tpu.matmul %628, %15, %cst_168 {dimension_numbers = #tpu.dot_dimension_numbers<[1], [0], [0], [1], [0, 0, 1, 1], [], []>} : vector<2x64xf32>, vector<64x128xf32>, vector<2x128xf32> -> vector<2x128xf32>
    %630 = vector.broadcast %17 : vector<1x128xf32> to vector<2x128xf32>
    %631 = arith.addf %629, %630 : vector<2x128xf32>
    %632 = vector.extract_strided_slice %631 {offsets = [0, 0], sizes = [2, 32], strides = [1, 1]} : vector<2x128xf32> to vector<2x32xf32>
    %cst_169 = arith.constant 0.000000e+00 : f32
    %633 = vector.broadcast %cst_169 : f32 to vector<2x32xf32>
    %634 = arith.subf %633, %632 : vector<2x32xf32>
    %635 = math.exp %634 : vector<2x32xf32>
    %cst_170 = arith.constant 1.000000e+00 : f32
    %636 = vector.broadcast %cst_170 : f32 to vector<2x32xf32>
    %637 = arith.addf %636, %635 : vector<2x32xf32>
    %638 = tpu.reciprocal %637 {approx = true} : vector<2x32xf32> -> vector<2x32xf32>
    %639 = vector.extract_strided_slice %631 {offsets = [0, 32], sizes = [2, 32], strides = [1, 1]} : vector<2x128xf32> to vector<2x32xf32>
    %cst_171 = arith.constant 0.000000e+00 : f32
    %640 = vector.broadcast %cst_171 : f32 to vector<2x32xf32>
    %641 = arith.subf %640, %639 : vector<2x32xf32>
    %642 = math.exp %641 : vector<2x32xf32>
    %cst_172 = arith.constant 1.000000e+00 : f32
    %643 = vector.broadcast %cst_172 : f32 to vector<2x32xf32>
    %644 = arith.addf %643, %642 : vector<2x32xf32>
    %645 = tpu.reciprocal %644 {approx = true} : vector<2x32xf32> -> vector<2x32xf32>
    %646 = vector.extract_strided_slice %631 {offsets = [0, 64], sizes = [2, 32], strides = [1, 1]} : vector<2x128xf32> to vector<2x32xf32>
    %647 = math.tanh %646 : vector<2x32xf32>
    %648 = vector.extract_strided_slice %631 {offsets = [0, 96], sizes = [2, 32], strides = [1, 1]} : vector<2x128xf32> to vector<2x32xf32>
    %cst_173 = arith.constant 0.000000e+00 : f32
    %649 = vector.broadcast %cst_173 : f32 to vector<2x32xf32>
    %650 = arith.subf %649, %648 : vector<2x32xf32>
    %651 = math.exp %650 : vector<2x32xf32>
    %cst_174 = arith.constant 1.000000e+00 : f32
    %652 = vector.broadcast %cst_174 : f32 to vector<2x32xf32>
    %653 = arith.addf %652, %651 : vector<2x32xf32>
    %654 = tpu.reciprocal %653 {approx = true} : vector<2x32xf32> -> vector<2x32xf32>
    %655 = arith.mulf %645, %545 : vector<2x32xf32>
    %656 = arith.mulf %638, %647 : vector<2x32xf32>
    %657 = arith.addf %655, %656 : vector<2x32xf32>
    %658 = math.tanh %657 : vector<2x32xf32>
    %659 = arith.mulf %654, %658 : vector<2x32xf32>
    %cst_175 = arith.constant dense<0.000000e+00> : vector<2x7xf32>
    %660 = tpu.matmul %659, %18, %cst_175 {dimension_numbers = #tpu.dot_dimension_numbers<[1], [0], [0], [1], [0, 0, 1, 1], [], []>} : vector<2x32xf32>, vector<32x7xf32>, vector<2x7xf32> -> vector<2x7xf32>
    %661 = vector.broadcast %19 : vector<1x7xf32> to vector<2x7xf32>
    %662 = arith.addf %660, %661 : vector<2x7xf32>
    %cst_176 = arith.constant 0xFF800000 : f32
    %663 = vector.broadcast %cst_176 : f32 to vector<2x7xf32>
    %664 = arith.select %3, %662, %663 : vector<2x7xi1>, vector<2x7xf32>
    %cst_177 = arith.constant dense<0xFF800000> : vector<2xf32>
    %665 = vector.multi_reduction <maximumf>, %664, %cst_177 [1] : vector<2x7xf32> to vector<2xf32>
    %666 = vector.shape_cast %665 : vector<2xf32> to vector<2x1xf32>
    %667 = vector.broadcast %666 : vector<2x1xf32> to vector<2x7xf32>
    %668 = arith.subf %664, %667 : vector<2x7xf32>
    %669 = math.exp %668 : vector<2x7xf32>
    %cst_178 = arith.constant dense<0.000000e+00> : vector<2xf32>
    %670 = vector.multi_reduction <add>, %669, %cst_178 [1] : vector<2x7xf32> to vector<2xf32>
    %671 = vector.shape_cast %670 : vector<2xf32> to vector<2x1xf32>
    %672 = math.log %671 : vector<2x1xf32>
    %673 = arith.addf %666, %672 : vector<2x1xf32>
    %cst_179 = arith.constant 0.000000e+00 : f32
    %674 = vector.broadcast %cst_179 : f32 to vector<2x7xf32>
    %675 = arith.minimumf %662, %674 : vector<2x7xf32>
    %676 = math.absf %662 : vector<2x7xf32>
    %cst_180 = arith.constant 0.000000e+00 : f32
    %677 = vector.broadcast %cst_180 : f32 to vector<2x7xf32>
    %678 = arith.subf %677, %676 : vector<2x7xf32>
    %679 = math.exp %678 : vector<2x7xf32>
    %cst_181 = arith.constant 1.000000e+00 : f32
    %680 = vector.broadcast %cst_181 : f32 to vector<2x7xf32>
    %681 = arith.addf %680, %679 : vector<2x7xf32>
    %682 = math.log %681 : vector<2x7xf32>
    %683 = arith.subf %675, %682 : vector<2x7xf32>
    %684 = vector.broadcast %673 : vector<2x1xf32> to vector<2x7xf32>
    %685 = arith.subf %662, %684 : vector<2x7xf32>
    %686 = arith.select %3, %685, %683 : vector<2x7xi1>, vector<2x7xf32>
    %c0_182 = arith.constant 0 : index
    %c35 = arith.constant 35 : index
    %687 = vector.load %arg8[%c0_182, %c35] : memref<2x56xf32, #tpu.memory_space<vmem>>, vector<2x7xf32>
    tpu.vector_store %arg8[%c0_182, %c35], %686 {strides = array<i32>} : memref<2x56xf32, #tpu.memory_space<vmem>>, vector<2x7xf32>,
    %688 = vector.broadcast %666 : vector<2x1xf32> to vector<2x7xf32>
    %689 = arith.cmpf oeq, %664, %688 : vector<2x7xf32>
    %c7_i32_183 = arith.constant 7 : i32
    %690 = vector.broadcast %c7_i32_183 : i32 to vector<2x7xi32>
    %691 = arith.select %689, %1, %690 : vector<2x7xi1>, vector<2x7xi32>
    %cst_184 = arith.constant dense<2147483647> : vector<2xi32>
    %692 = vector.multi_reduction <minsi>, %691, %cst_184 [1] : vector<2x7xi32> to vector<2xi32>
    %693 = vector.shape_cast %692 : vector<2xi32> to vector<2x1xi32>
    %694 = vector.broadcast %693 : vector<2x1xi32> to vector<2x32xi32>
    %695 = arith.cmpi eq, %0, %694 : vector<2x32xi32>
    %696 = arith.extui %695 : vector<2x32xi1> to vector<2x32xi32>
    %697 = arith.sitofp %696 : vector<2x32xi32> to vector<2x32xf32>
    %698 = vector.extract_strided_slice %662 {offsets = [0, 6], sizes = [2, 1], strides = [1, 1]} : vector<2x7xf32> to vector<2x1xf32>
    %cst_185 = arith.constant 0.000000e+00 : f32
    %699 = vector.broadcast %cst_185 : f32 to vector<2x1xf32>
    %700 = arith.subf %699, %698 : vector<2x1xf32>
    %701 = math.exp %700 : vector<2x1xf32>
    %cst_186 = arith.constant 1.000000e+00 : f32
    %702 = vector.broadcast %cst_186 : f32 to vector<2x1xf32>
    %703 = arith.addf %702, %701 : vector<2x1xf32>
    %704 = tpu.reciprocal %703 {approx = true} : vector<2x1xf32> -> vector<2x1xf32>
    %705 = tpu.concatenate %697, %627 in 1 : vector<2x32xf32>, vector<2x32xf32> -> vector<2x64xf32>
    %706 = vector.broadcast %704 : vector<2x1xf32> to vector<2x128xf32>
    %707 = vector.broadcast %5 : vector<1x128xf32> to vector<2x128xf32>
    %708 = arith.mulf %706, %707 : vector<2x128xf32>
    %709 = arith.addf %11, %708 : vector<2x128xf32>
    %cst_187 = arith.constant dense<0.000000e+00> : vector<2x128xf32>
    %710 = tpu.matmul %705, %13, %cst_187 {dimension_numbers = #tpu.dot_dimension_numbers<[1], [0], [0], [1], [0, 0, 1, 1], [], []>} : vector<2x64xf32>, vector<64x128xf32>, vector<2x128xf32> -> vector<2x128xf32>
    %711 = arith.addf %710, %709 : vector<2x128xf32>
    %712 = vector.extract_strided_slice %711 {offsets = [0, 0], sizes = [2, 32], strides = [1, 1]} : vector<2x128xf32> to vector<2x32xf32>
    %cst_188 = arith.constant 0.000000e+00 : f32
    %713 = vector.broadcast %cst_188 : f32 to vector<2x32xf32>
    %714 = arith.subf %713, %712 : vector<2x32xf32>
    %715 = math.exp %714 : vector<2x32xf32>
    %cst_189 = arith.constant 1.000000e+00 : f32
    %716 = vector.broadcast %cst_189 : f32 to vector<2x32xf32>
    %717 = arith.addf %716, %715 : vector<2x32xf32>
    %718 = tpu.reciprocal %717 {approx = true} : vector<2x32xf32> -> vector<2x32xf32>
    %719 = vector.extract_strided_slice %711 {offsets = [0, 32], sizes = [2, 32], strides = [1, 1]} : vector<2x128xf32> to vector<2x32xf32>
    %cst_190 = arith.constant 0.000000e+00 : f32
    %720 = vector.broadcast %cst_190 : f32 to vector<2x32xf32>
    %721 = arith.subf %720, %719 : vector<2x32xf32>
    %722 = math.exp %721 : vector<2x32xf32>
    %cst_191 = arith.constant 1.000000e+00 : f32
    %723 = vector.broadcast %cst_191 : f32 to vector<2x32xf32>
    %724 = arith.addf %723, %722 : vector<2x32xf32>
    %725 = tpu.reciprocal %724 {approx = true} : vector<2x32xf32> -> vector<2x32xf32>
    %726 = vector.extract_strided_slice %711 {offsets = [0, 64], sizes = [2, 32], strides = [1, 1]} : vector<2x128xf32> to vector<2x32xf32>
    %727 = math.tanh %726 : vector<2x32xf32>
    %728 = vector.extract_strided_slice %711 {offsets = [0, 96], sizes = [2, 32], strides = [1, 1]} : vector<2x128xf32> to vector<2x32xf32>
    %cst_192 = arith.constant 0.000000e+00 : f32
    %729 = vector.broadcast %cst_192 : f32 to vector<2x32xf32>
    %730 = arith.subf %729, %728 : vector<2x32xf32>
    %731 = math.exp %730 : vector<2x32xf32>
    %cst_193 = arith.constant 1.000000e+00 : f32
    %732 = vector.broadcast %cst_193 : f32 to vector<2x32xf32>
    %733 = arith.addf %732, %731 : vector<2x32xf32>
    %734 = tpu.reciprocal %733 {approx = true} : vector<2x32xf32> -> vector<2x32xf32>
    %735 = arith.mulf %725, %625 : vector<2x32xf32>
    %736 = arith.mulf %718, %727 : vector<2x32xf32>
    %737 = arith.addf %735, %736 : vector<2x32xf32>
    %738 = math.tanh %737 : vector<2x32xf32>
    %739 = arith.mulf %734, %738 : vector<2x32xf32>
    %740 = tpu.concatenate %739, %659 in 1 : vector<2x32xf32>, vector<2x32xf32> -> vector<2x64xf32>
    %cst_194 = arith.constant dense<0.000000e+00> : vector<2x128xf32>
    %741 = tpu.matmul %740, %15, %cst_194 {dimension_numbers = #tpu.dot_dimension_numbers<[1], [0], [0], [1], [0, 0, 1, 1], [], []>} : vector<2x64xf32>, vector<64x128xf32>, vector<2x128xf32> -> vector<2x128xf32>
    %742 = vector.broadcast %17 : vector<1x128xf32> to vector<2x128xf32>
    %743 = arith.addf %741, %742 : vector<2x128xf32>
    %744 = vector.extract_strided_slice %743 {offsets = [0, 0], sizes = [2, 32], strides = [1, 1]} : vector<2x128xf32> to vector<2x32xf32>
    %cst_195 = arith.constant 0.000000e+00 : f32
    %745 = vector.broadcast %cst_195 : f32 to vector<2x32xf32>
    %746 = arith.subf %745, %744 : vector<2x32xf32>
    %747 = math.exp %746 : vector<2x32xf32>
    %cst_196 = arith.constant 1.000000e+00 : f32
    %748 = vector.broadcast %cst_196 : f32 to vector<2x32xf32>
    %749 = arith.addf %748, %747 : vector<2x32xf32>
    %750 = tpu.reciprocal %749 {approx = true} : vector<2x32xf32> -> vector<2x32xf32>
    %751 = vector.extract_strided_slice %743 {offsets = [0, 32], sizes = [2, 32], strides = [1, 1]} : vector<2x128xf32> to vector<2x32xf32>
    %cst_197 = arith.constant 0.000000e+00 : f32
    %752 = vector.broadcast %cst_197 : f32 to vector<2x32xf32>
    %753 = arith.subf %752, %751 : vector<2x32xf32>
    %754 = math.exp %753 : vector<2x32xf32>
    %cst_198 = arith.constant 1.000000e+00 : f32
    %755 = vector.broadcast %cst_198 : f32 to vector<2x32xf32>
    %756 = arith.addf %755, %754 : vector<2x32xf32>
    %757 = tpu.reciprocal %756 {approx = true} : vector<2x32xf32> -> vector<2x32xf32>
    %758 = vector.extract_strided_slice %743 {offsets = [0, 64], sizes = [2, 32], strides = [1, 1]} : vector<2x128xf32> to vector<2x32xf32>
    %759 = math.tanh %758 : vector<2x32xf32>
    %760 = vector.extract_strided_slice %743 {offsets = [0, 96], sizes = [2, 32], strides = [1, 1]} : vector<2x128xf32> to vector<2x32xf32>
    %cst_199 = arith.constant 0.000000e+00 : f32
    %761 = vector.broadcast %cst_199 : f32 to vector<2x32xf32>
    %762 = arith.subf %761, %760 : vector<2x32xf32>
    %763 = math.exp %762 : vector<2x32xf32>
    %cst_200 = arith.constant 1.000000e+00 : f32
    %764 = vector.broadcast %cst_200 : f32 to vector<2x32xf32>
    %765 = arith.addf %764, %763 : vector<2x32xf32>
    %766 = tpu.reciprocal %765 {approx = true} : vector<2x32xf32> -> vector<2x32xf32>
    %767 = arith.mulf %757, %657 : vector<2x32xf32>
    %768 = arith.mulf %750, %759 : vector<2x32xf32>
    %769 = arith.addf %767, %768 : vector<2x32xf32>
    %770 = math.tanh %769 : vector<2x32xf32>
    %771 = arith.mulf %766, %770 : vector<2x32xf32>
    %cst_201 = arith.constant dense<0.000000e+00> : vector<2x7xf32>
    %772 = tpu.matmul %771, %18, %cst_201 {dimension_numbers = #tpu.dot_dimension_numbers<[1], [0], [0], [1], [0, 0, 1, 1], [], []>} : vector<2x32xf32>, vector<32x7xf32>, vector<2x7xf32> -> vector<2x7xf32>
    %773 = vector.broadcast %19 : vector<1x7xf32> to vector<2x7xf32>
    %774 = arith.addf %772, %773 : vector<2x7xf32>
    %cst_202 = arith.constant 0xFF800000 : f32
    %775 = vector.broadcast %cst_202 : f32 to vector<2x7xf32>
    %776 = arith.select %3, %774, %775 : vector<2x7xi1>, vector<2x7xf32>
    %cst_203 = arith.constant dense<0xFF800000> : vector<2xf32>
    %777 = vector.multi_reduction <maximumf>, %776, %cst_203 [1] : vector<2x7xf32> to vector<2xf32>
    %778 = vector.shape_cast %777 : vector<2xf32> to vector<2x1xf32>
    %779 = vector.broadcast %778 : vector<2x1xf32> to vector<2x7xf32>
    %780 = arith.subf %776, %779 : vector<2x7xf32>
    %781 = math.exp %780 : vector<2x7xf32>
    %cst_204 = arith.constant dense<0.000000e+00> : vector<2xf32>
    %782 = vector.multi_reduction <add>, %781, %cst_204 [1] : vector<2x7xf32> to vector<2xf32>
    %783 = vector.shape_cast %782 : vector<2xf32> to vector<2x1xf32>
    %784 = math.log %783 : vector<2x1xf32>
    %785 = arith.addf %778, %784 : vector<2x1xf32>
    %cst_205 = arith.constant 0.000000e+00 : f32
    %786 = vector.broadcast %cst_205 : f32 to vector<2x7xf32>
    %787 = arith.minimumf %774, %786 : vector<2x7xf32>
    %788 = math.absf %774 : vector<2x7xf32>
    %cst_206 = arith.constant 0.000000e+00 : f32
    %789 = vector.broadcast %cst_206 : f32 to vector<2x7xf32>
    %790 = arith.subf %789, %788 : vector<2x7xf32>
    %791 = math.exp %790 : vector<2x7xf32>
    %cst_207 = arith.constant 1.000000e+00 : f32
    %792 = vector.broadcast %cst_207 : f32 to vector<2x7xf32>
    %793 = arith.addf %792, %791 : vector<2x7xf32>
    %794 = math.log %793 : vector<2x7xf32>
    %795 = arith.subf %787, %794 : vector<2x7xf32>
    %796 = vector.broadcast %785 : vector<2x1xf32> to vector<2x7xf32>
    %797 = arith.subf %774, %796 : vector<2x7xf32>
    %798 = arith.select %3, %797, %795 : vector<2x7xi1>, vector<2x7xf32>
    %c0_208 = arith.constant 0 : index
    %c42 = arith.constant 42 : index
    %799 = vector.load %arg8[%c0_208, %c42] : memref<2x56xf32, #tpu.memory_space<vmem>>, vector<2x7xf32>
    tpu.vector_store %arg8[%c0_208, %c42], %798 {strides = array<i32>} : memref<2x56xf32, #tpu.memory_space<vmem>>, vector<2x7xf32>,
    %800 = vector.broadcast %778 : vector<2x1xf32> to vector<2x7xf32>
    %801 = arith.cmpf oeq, %776, %800 : vector<2x7xf32>
    %c7_i32_209 = arith.constant 7 : i32
    %802 = vector.broadcast %c7_i32_209 : i32 to vector<2x7xi32>
    %803 = arith.select %801, %1, %802 : vector<2x7xi1>, vector<2x7xi32>
    %cst_210 = arith.constant dense<2147483647> : vector<2xi32>
    %804 = vector.multi_reduction <minsi>, %803, %cst_210 [1] : vector<2x7xi32> to vector<2xi32>
    %805 = vector.shape_cast %804 : vector<2xi32> to vector<2x1xi32>
    %806 = vector.broadcast %805 : vector<2x1xi32> to vector<2x32xi32>
    %807 = arith.cmpi eq, %0, %806 : vector<2x32xi32>
    %808 = arith.extui %807 : vector<2x32xi1> to vector<2x32xi32>
    %809 = arith.sitofp %808 : vector<2x32xi32> to vector<2x32xf32>
    %810 = vector.extract_strided_slice %774 {offsets = [0, 6], sizes = [2, 1], strides = [1, 1]} : vector<2x7xf32> to vector<2x1xf32>
    %cst_211 = arith.constant 0.000000e+00 : f32
    %811 = vector.broadcast %cst_211 : f32 to vector<2x1xf32>
    %812 = arith.subf %811, %810 : vector<2x1xf32>
    %813 = math.exp %812 : vector<2x1xf32>
    %cst_212 = arith.constant 1.000000e+00 : f32
    %814 = vector.broadcast %cst_212 : f32 to vector<2x1xf32>
    %815 = arith.addf %814, %813 : vector<2x1xf32>
    %816 = tpu.reciprocal %815 {approx = true} : vector<2x1xf32> -> vector<2x1xf32>
    %817 = tpu.concatenate %809, %739 in 1 : vector<2x32xf32>, vector<2x32xf32> -> vector<2x64xf32>
    %818 = vector.broadcast %816 : vector<2x1xf32> to vector<2x128xf32>
    %819 = vector.broadcast %5 : vector<1x128xf32> to vector<2x128xf32>
    %820 = arith.mulf %818, %819 : vector<2x128xf32>
    %821 = arith.addf %11, %820 : vector<2x128xf32>
    %cst_213 = arith.constant dense<0.000000e+00> : vector<2x128xf32>
    %822 = tpu.matmul %817, %13, %cst_213 {dimension_numbers = #tpu.dot_dimension_numbers<[1], [0], [0], [1], [0, 0, 1, 1], [], []>} : vector<2x64xf32>, vector<64x128xf32>, vector<2x128xf32> -> vector<2x128xf32>
    %823 = arith.addf %822, %821 : vector<2x128xf32>
    %824 = vector.extract_strided_slice %823 {offsets = [0, 0], sizes = [2, 32], strides = [1, 1]} : vector<2x128xf32> to vector<2x32xf32>
    %cst_214 = arith.constant 0.000000e+00 : f32
    %825 = vector.broadcast %cst_214 : f32 to vector<2x32xf32>
    %826 = arith.subf %825, %824 : vector<2x32xf32>
    %827 = math.exp %826 : vector<2x32xf32>
    %cst_215 = arith.constant 1.000000e+00 : f32
    %828 = vector.broadcast %cst_215 : f32 to vector<2x32xf32>
    %829 = arith.addf %828, %827 : vector<2x32xf32>
    %830 = tpu.reciprocal %829 {approx = true} : vector<2x32xf32> -> vector<2x32xf32>
    %831 = vector.extract_strided_slice %823 {offsets = [0, 32], sizes = [2, 32], strides = [1, 1]} : vector<2x128xf32> to vector<2x32xf32>
    %cst_216 = arith.constant 0.000000e+00 : f32
    %832 = vector.broadcast %cst_216 : f32 to vector<2x32xf32>
    %833 = arith.subf %832, %831 : vector<2x32xf32>
    %834 = math.exp %833 : vector<2x32xf32>
    %cst_217 = arith.constant 1.000000e+00 : f32
    %835 = vector.broadcast %cst_217 : f32 to vector<2x32xf32>
    %836 = arith.addf %835, %834 : vector<2x32xf32>
    %837 = tpu.reciprocal %836 {approx = true} : vector<2x32xf32> -> vector<2x32xf32>
    %838 = vector.extract_strided_slice %823 {offsets = [0, 64], sizes = [2, 32], strides = [1, 1]} : vector<2x128xf32> to vector<2x32xf32>
    %839 = math.tanh %838 : vector<2x32xf32>
    %840 = vector.extract_strided_slice %823 {offsets = [0, 96], sizes = [2, 32], strides = [1, 1]} : vector<2x128xf32> to vector<2x32xf32>
    %cst_218 = arith.constant 0.000000e+00 : f32
    %841 = vector.broadcast %cst_218 : f32 to vector<2x32xf32>
    %842 = arith.subf %841, %840 : vector<2x32xf32>
    %843 = math.exp %842 : vector<2x32xf32>
    %cst_219 = arith.constant 1.000000e+00 : f32
    %844 = vector.broadcast %cst_219 : f32 to vector<2x32xf32>
    %845 = arith.addf %844, %843 : vector<2x32xf32>
    %846 = tpu.reciprocal %845 {approx = true} : vector<2x32xf32> -> vector<2x32xf32>
    %847 = arith.mulf %837, %737 : vector<2x32xf32>
    %848 = arith.mulf %830, %839 : vector<2x32xf32>
    %849 = arith.addf %847, %848 : vector<2x32xf32>
    %850 = math.tanh %849 : vector<2x32xf32>
    %851 = arith.mulf %846, %850 : vector<2x32xf32>
    %852 = tpu.concatenate %851, %771 in 1 : vector<2x32xf32>, vector<2x32xf32> -> vector<2x64xf32>
    %cst_220 = arith.constant dense<0.000000e+00> : vector<2x128xf32>
    %853 = tpu.matmul %852, %15, %cst_220 {dimension_numbers = #tpu.dot_dimension_numbers<[1], [0], [0], [1], [0, 0, 1, 1], [], []>} : vector<2x64xf32>, vector<64x128xf32>, vector<2x128xf32> -> vector<2x128xf32>
    %854 = vector.broadcast %17 : vector<1x128xf32> to vector<2x128xf32>
    %855 = arith.addf %853, %854 : vector<2x128xf32>
    %856 = vector.extract_strided_slice %855 {offsets = [0, 0], sizes = [2, 32], strides = [1, 1]} : vector<2x128xf32> to vector<2x32xf32>
    %cst_221 = arith.constant 0.000000e+00 : f32
    %857 = vector.broadcast %cst_221 : f32 to vector<2x32xf32>
    %858 = arith.subf %857, %856 : vector<2x32xf32>
    %859 = math.exp %858 : vector<2x32xf32>
    %cst_222 = arith.constant 1.000000e+00 : f32
    %860 = vector.broadcast %cst_222 : f32 to vector<2x32xf32>
    %861 = arith.addf %860, %859 : vector<2x32xf32>
    %862 = tpu.reciprocal %861 {approx = true} : vector<2x32xf32> -> vector<2x32xf32>
    %863 = vector.extract_strided_slice %855 {offsets = [0, 32], sizes = [2, 32], strides = [1, 1]} : vector<2x128xf32> to vector<2x32xf32>
    %cst_223 = arith.constant 0.000000e+00 : f32
    %864 = vector.broadcast %cst_223 : f32 to vector<2x32xf32>
    %865 = arith.subf %864, %863 : vector<2x32xf32>
    %866 = math.exp %865 : vector<2x32xf32>
    %cst_224 = arith.constant 1.000000e+00 : f32
    %867 = vector.broadcast %cst_224 : f32 to vector<2x32xf32>
    %868 = arith.addf %867, %866 : vector<2x32xf32>
    %869 = tpu.reciprocal %868 {approx = true} : vector<2x32xf32> -> vector<2x32xf32>
    %870 = vector.extract_strided_slice %855 {offsets = [0, 64], sizes = [2, 32], strides = [1, 1]} : vector<2x128xf32> to vector<2x32xf32>
    %871 = math.tanh %870 : vector<2x32xf32>
    %872 = vector.extract_strided_slice %855 {offsets = [0, 96], sizes = [2, 32], strides = [1, 1]} : vector<2x128xf32> to vector<2x32xf32>
    %cst_225 = arith.constant 0.000000e+00 : f32
    %873 = vector.broadcast %cst_225 : f32 to vector<2x32xf32>
    %874 = arith.subf %873, %872 : vector<2x32xf32>
    %875 = math.exp %874 : vector<2x32xf32>
    %cst_226 = arith.constant 1.000000e+00 : f32
    %876 = vector.broadcast %cst_226 : f32 to vector<2x32xf32>
    %877 = arith.addf %876, %875 : vector<2x32xf32>
    %878 = tpu.reciprocal %877 {approx = true} : vector<2x32xf32> -> vector<2x32xf32>
    %879 = arith.mulf %869, %769 : vector<2x32xf32>
    %880 = arith.mulf %862, %871 : vector<2x32xf32>
    %881 = arith.addf %879, %880 : vector<2x32xf32>
    %882 = math.tanh %881 : vector<2x32xf32>
    %883 = arith.mulf %878, %882 : vector<2x32xf32>
    %cst_227 = arith.constant dense<0.000000e+00> : vector<2x7xf32>
    %884 = tpu.matmul %883, %18, %cst_227 {dimension_numbers = #tpu.dot_dimension_numbers<[1], [0], [0], [1], [0, 0, 1, 1], [], []>} : vector<2x32xf32>, vector<32x7xf32>, vector<2x7xf32> -> vector<2x7xf32>
    %885 = vector.broadcast %19 : vector<1x7xf32> to vector<2x7xf32>
    %886 = arith.addf %884, %885 : vector<2x7xf32>
    %cst_228 = arith.constant 0xFF800000 : f32
    %887 = vector.broadcast %cst_228 : f32 to vector<2x7xf32>
    %888 = arith.select %3, %886, %887 : vector<2x7xi1>, vector<2x7xf32>
    %cst_229 = arith.constant dense<0xFF800000> : vector<2xf32>
    %889 = vector.multi_reduction <maximumf>, %888, %cst_229 [1] : vector<2x7xf32> to vector<2xf32>
    %890 = vector.shape_cast %889 : vector<2xf32> to vector<2x1xf32>
    %891 = vector.broadcast %890 : vector<2x1xf32> to vector<2x7xf32>
    %892 = arith.subf %888, %891 : vector<2x7xf32>
    %893 = math.exp %892 : vector<2x7xf32>
    %cst_230 = arith.constant dense<0.000000e+00> : vector<2xf32>
    %894 = vector.multi_reduction <add>, %893, %cst_230 [1] : vector<2x7xf32> to vector<2xf32>
    %895 = vector.shape_cast %894 : vector<2xf32> to vector<2x1xf32>
    %896 = math.log %895 : vector<2x1xf32>
    %897 = arith.addf %890, %896 : vector<2x1xf32>
    %cst_231 = arith.constant 0.000000e+00 : f32
    %898 = vector.broadcast %cst_231 : f32 to vector<2x7xf32>
    %899 = arith.minimumf %886, %898 : vector<2x7xf32>
    %900 = math.absf %886 : vector<2x7xf32>
    %cst_232 = arith.constant 0.000000e+00 : f32
    %901 = vector.broadcast %cst_232 : f32 to vector<2x7xf32>
    %902 = arith.subf %901, %900 : vector<2x7xf32>
    %903 = math.exp %902 : vector<2x7xf32>
    %cst_233 = arith.constant 1.000000e+00 : f32
    %904 = vector.broadcast %cst_233 : f32 to vector<2x7xf32>
    %905 = arith.addf %904, %903 : vector<2x7xf32>
    %906 = math.log %905 : vector<2x7xf32>
    %907 = arith.subf %899, %906 : vector<2x7xf32>
    %908 = vector.broadcast %897 : vector<2x1xf32> to vector<2x7xf32>
    %909 = arith.subf %886, %908 : vector<2x7xf32>
    %910 = arith.select %3, %909, %907 : vector<2x7xi1>, vector<2x7xf32>
    %c0_234 = arith.constant 0 : index
    %c49 = arith.constant 49 : index
    %911 = vector.load %arg8[%c0_234, %c49] : memref<2x56xf32, #tpu.memory_space<vmem>>, vector<2x7xf32>
    tpu.vector_store %arg8[%c0_234, %c49], %910 {strides = array<i32>} : memref<2x56xf32, #tpu.memory_space<vmem>>, vector<2x7xf32>,
    return
  }
}

</mosaic_0001>

<bundles_post_ra>
// kernel: tpu_custom_call.1
= control target key start
LH: loop header
LB: loop body
LE: loop exit
PB: predicated region body
PF: predicated region fallthrough
CT: control target
= control target key end

     0   :  { %13 = vsyncpa [#allocation3], 0  ;;  %s4930_s0 = inlined_call_operand.vmem [shape: f32[2,2,32], index: 0, kind: input, shape index: {}]   ;;  %s4931_s1 = inlined_call_operand.vmem [shape: f32[2,2,32], index: 1, kind: input, shape index: {}]   ;;  %s4932_s2 = inlined_call_operand.vmem [shape: f32[2,32], index: 2, kind: input, shape index: {}]   ;;  %s4933_s3 = inlined_call_operand.vmem [shape: f32[32,128], index: 3, kind: input, shape index: {}]   ;;  %s4934_s4 = inlined_call_operand.hbm [shape: f32[2,64,128], index: 4, kind: input, shape index: {}]   ;;  %s4935_s5 = inlined_call_operand.vmem [shape: f32[2,1,128], index: 5, kind: input, shape index: {}]   ;;  %s4936_s6 = inlined_call_operand.vmem [shape: f32[32,7], index: 6, kind: input, shape index: {}]   ;;  %s4937_s7 = inlined_call_operand.vmem [shape: f32[1,7], index: 7, kind: input, shape index: {}]   ;;  %s4938_s8 = inlined_call_operand.hbm [shape: f32[2,56], index: 8, kind: output, shape index: {}]  }
   0x1   :  { %14 = vsyncpa [#allocation4], 0  ;;  %s4068_s27 = smov [#allocation2]   ;;  %s4020_s9 = scalar_lea.hbm %s4934_s4, 2048 }
   0x2   :  { %s28_s28 = sshll.u32 %s4068_s27, 4  ;;  %p4021_p0 = scmp.ne.s32.totalorder %s4934_s4, %s4020_s9  ;;  %s29_s28 = int_to_ptr.vmem [resolvable:$true] %s28_s28 }
   0x3   :  { %p4024_p1 = scmp.lt.u32.totalorder %s4020_s9, %s4934_s4 }
   0x5   :  { %p4026_p2 = pnand %p4024_p1, %p4021_p0 }
   0x7   :  { %4029 = shalt.err (!%p4026_p2)
}
   0x8   :  { %s4030_s14 = scalar_lea.vmem %s29_s28, 2048  ;;  %p4035_p4 = scmp.lt.s32.totalorder %s29_s28, %s29_s28 }
   0x9   :  { %p4031_p3 = scmp.ne.s32.totalorder %s29_s28, %s4030_s14  ;;  %p4036_p5 = scmp.lt.s32.totalorder %s4030_s14, %s4030_s14 }
   0xb   :  { %p4037_p6 = por %p4036_p5, %p4035_p4 }
   0xd   :  { %p4038_p7 = pnand %p4037_p6, %p4031_p3 }
   0xf   :  { %4041 = shalt.err (!%p4038_p7)
}
  0x10   :  { %s4069_s15 = smov 128   ;;  %s4070_s16 = smov 8  }
  0x11   :  { %34 = dma.hbm_to_vmem [thread:$0]  %s4934_s4, 2048, %s29_s28, [#allocation3], %s4069_s15, %s4069_s15, %s4070_s16  }
  0x12   :  { %4064 = dma.done.wait [#allocation3], 2048  }
  0x13   :  { %4065 = vsyncadd [#allocation3], 4294965248  ;;  %v44_v0 = vlaneseq  ;;  %v4071_v1 = vmov 0.0|0.0   ;;  %vm4072_vm0 = vmmov 0   ;;  %v4073_v3 = vmov 0.0   ;;  %v133_v6 = vld [vmem:[#allocation2] sm:$0xff] }
  0x14   :  { %3539 = vmatprep.subr.bf16.mxu1 %v4071_v1  ;;  %3533 = vmatprep.subr.bf16.mxu0 %v4071_v1  ;;  %v157_v5 = vld [vmem:[%s4930_s0] sm:$0x3]  ;;  %v134_v7 = vld [vmem:[#allocation2 + $0x8] sm:$0xff]  ;;  %s4074_s20 = smov 32   ;;  %v135_v11 = vld [vmem:[#allocation2 + $0x10] sm:$0xff]  ;;  %vm59_vm1 = vcmask 261120  }
  0x15   :  { %v172_v2 = vshrl.u32 %v44_v0, 7  ;;  %3138 = vmatprep.mubr.msk.f32.mxu0 %vm4072_vm0, %v4073_v3  ;;  %3157 = vmatprep.mubr.msk.f32.mxu1 %vm4072_vm0, %v4073_v3  ;;  %v4152_v8 = vpack.c.bf16 %v134_v7, %v133_v6  ;;  %v47_v9 = vld [vmem:[%s4933_s3] sm:$0xff]  ;;  %v48_v10 = vld [vmem:[%s4933_s3 + $0x8] sm:$0xff]  ;;  %v136_v13 = vld [vmem:[#allocation2 + $0x18] sm:$0xff]  ;;  %v4194_v27 = vand.u32 127, %v44_v0  ;;  %vm177_vm3 = vcmask 523264  }
  0x16   :  { %167 = vrot.lane.b32.xlu0 %v157_v5, %s4074_s20  ;;  %v3534_v12 = vpack.c.bf16 %v48_v10, %v47_v9  ;;  %v49_v14 = vld [vmem:[%s4933_s3 + $0x10] sm:$0xff]  ;;  %v50_v15 = vld [vmem:[%s4933_s3 + $0x18] sm:$0xff]  ;;  %v4167_v16 = vpack.c.bf16 %v136_v13, %v135_v11  ;;  %v137_v19 = vld [vmem:[#allocation2 + $0x20] sm:$0xff]  ;;  %s4075_s11 = smov 64   ;;  %vm475_vm5 = vcmask 50176   ;;  %s4079_s28 = smov 28  }
  0x17   :  { %v173_v4 = vsub.s32 7, %v172_v2  ;;  %3541 = vmatpush3.bf16.msra.mxu1 %v4152_v8  ;;  %v3537_v18 = vpack.c.bf16 %v50_v15, %v49_v14  ;;  %v138_v20 = vld [vmem:[#allocation2 + $0x28] sm:$0xff]  ;;  %v160_v21 = vld [vmem:[%s4931_s1] sm:$0x3]  ;;  %v139_v24 = vld [vmem:[#allocation2 + $0x30] sm:$0xff]  ;;  %vm163_vm2 = vcmp.eq.s32.totalorder %v4194_v27, 0 }
  0x18   :  { %3535 = vmatpush3.bf16.msra.mxu0 %v3534_v12  ;;  %3542 = vmatprep.subr.bf16.mxu1 %v4071_v1  ;;  %v4178_v22 = vpack.c.bf16 %v138_v20, %v137_v19  ;;  %v51_v23 = vld [vmem:[%s4932_s2] sm:$0x3]  ;;  %v140_v25 = vld [vmem:[#allocation2 + $0x38] sm:$0xff]  ;;  %v2907_v28 = vsel %vm163_vm2, 1.0, %v4073_v3  ;;  %v143_v53 = vld [vmem:[#allocation2 + $0x48] sm:$0xff]  ;;  %vm46_vm4 = vcmp.lt.s32.totalorder %v4194_v27, 6 }
  0x19   :  { %v4169_v17 = vrot.slane %v50_v15, %v173_v4  ;;  %3536 = vmatprep.subr.bf16.mxu0 %v4071_v1  ;;  %258 = vrot.lane.b32.xlu1 %v160_v21, %s4074_s20  ;;  %v4187_v26 = vpack.c.bf16 %v140_v25, %v139_v24  ;;  %v2902_v33 = vld [vmem:[%s4935_s5] ss:$0 sm:$0xff]  ;;  %v144_v54 = vld [vmem:[#allocation2 + $0x50] sm:$0xff]  ;;  %v145_v56 = vld [vmem:[#allocation2 + $0x58] sm:$0xff]  ;;  %s4080_s29 = smov 21   ;;  %s4081_s30 = smov 35  }
  0x1a   :  { %v142_v52 = vld [vmem:[#allocation2 + $0x40] sm:$0xff]  ;;  %v4217_v57 = vpack.c.bf16 %v145_v56, %v144_v54  ;;  %v147_v59 = vld [vmem:[#allocation2 + $0x68] sm:$0xff]  ;;  %v148_v61 = vld [vmem:[#allocation2 + $0x70] sm:$0xff]  ;;  %s4082_s3 = smov 42   ;;  %s4083_s9 = smov 49  }
  0x1b   :  { %3544 = vmatpush3.bf16.msra.mxu1 %v4167_v16  ;;  %v175_v35 = vmul.f32 0.0, %v4169_v17  ;;  %v4214_v55 = vpack.c.bf16 %v143_v53, %v142_v52  ;;  %v146_v58 = vld [vmem:[#allocation2 + $0x60] sm:$0xff]  ;;  %v149_v62 = vld [vmem:[#allocation2 + $0x78] sm:$0xff]  ;;  %s4084_s2 = smov [#allocation5]  }
  0x1c   :  { %3538 = vmatpush3.bf16.msra.mxu0 %v3537_v18  ;;  %3545 = vmatprep.subr.bf16.mxu1 %v4071_v1  ;;  %v4221_v60 = vpack.c.bf16 %v147_v59, %v146_v58  ;;  %v4226_v0 = vpack.c.bf16 %v149_v62, %v148_v61  ;;  %v2905_v2 = vld [vmem:[%s4930_s0 + $0x2] sm:$0x3]  ;;  %v4258_v11 = vld [vmem:[%s4935_s5 + $0x1] ss:$0 sm:$0xff]  ;;  %s2893_s10 = sshll.u32 %s4084_s2, 4  ;;  %s2894_s10 = int_to_ptr.vmem [resolvable:$true] %s2893_s10 }
  0x1d   :  { %3551 = vmatprep.subr.bf16.mxu0 %v4071_v1  ;;  %v2906_v4 = vld [vmem:[%s4931_s1 + $0x2] sm:$0x3]  ;;  %p4047_p9 = scmp.lt.s32.totalorder %s2894_s10, %s2894_s10 }
  0x1f   :  { %3547 = vmatpush3.bf16.msra.mxu1 %v4178_v22  ;;  %3139 = vmatmul.mubr.msk.f32.vlgmr.msra.gmra.mrb[0].mxu0 %vm59_vm1, %v51_v23 }
  0x20   :  { %3548 = vmatprep.subr.bf16.mxu1 %v4071_v1  ;;  %3176 = vmatprep.mubr.msk.f32.mxu0 %vm4072_vm0, %v4073_v3 }
  0x21   :  { %3553 = vmatpush3.bf16.msra.mxu0 %v4214_v55 }
  0x22   :  { %3554 = vmatprep.subr.bf16.mxu0 %v4071_v1 }
  0x23   :  { %3550 = vmatpush3.bf16.msra.mxu1 %v4187_v26 }
  0x24   :  { %3563 = vmatprep.subr.bf16.mxu1 %v4071_v1 }
  0x25   :  { %3556 = vmatpush3.bf16.msra.mxu0 %v4217_v57 }
  0x26   :  { %3557 = vmatprep.subr.bf16.mxu0 %v4071_v1 }
  0x29   :  { %3559 = vmatpush3.bf16.msra.mxu0 %v4221_v60 }
  0x2a   :  { %3560 = vmatprep.subr.bf16.mxu0 %v4071_v1 }
  0x2d   :  { %3562 = vmatpush3.bf16.msra.mxu0 %v4226_v0 }
  0x2e   :  { %3569 = vmatprep.subr.bf16.mxu0 %v4071_v1 }
  0x88   :  { %v168_v29 = vpop.permute.xlu0 %167 }
  0x89   :  { %v170_v30 = vsel %vm59_vm1, %v2907_v28, %v168_v29 }
  0x8a   :  { %3158 = vmatmul.mubr.msk.f32.vlgmr.msra.gmra.mrb[0].mxu1 %vm177_vm3, %v170_v30 }
  0x8b   :  { %3187 = vmatprep.mubr.msk.f32.mxu1 %vm4072_vm0, %v4073_v3  ;;  %v259_v48 = vpop.permute.xlu1 %258 }
  0xf2   :  { %v129_v31 = vpop.f32.mrb[0].mxu0 }
  0xf3   :  { %v3140_v32 = vpop.f32.mrb[1].mxu0  ;;  %v4205_v34 = vadd.f32 %v2902_v33, %v129_v31  ;;  %v153_v33 = vld [vmem:[%s4936_s6 + $0x8] sm:$0xff] }
  0xf4   :  { %v152_v32 = vld [vmem:[%s4936_s6] sm:$0xff] }
  0xf5   :  { %v176_v36 = vadd.f32 %v175_v35, %v4205_v34  ;;  %v154_v35 = vld [vmem:[%s4936_s6 + $0x10] sm:$0xff] }
 0x15d   :  { %v247_v37 = vpop.f32.mrb[0].mxu1 }
 0x15e   :  { %v248_v38 = vadd.f32 %v247_v37, %v176_v36  ;;  %v3159_v39 = vpop.f32.mrb[1].mxu1  ;;  %v4275_v36 = vpack.c.bf16 %v153_v33, %v152_v32  ;;  %v155_v37 = vld [vmem:[%s4936_s6 + $0x18] sm:$0xff] }
 0x160   :  { %3798 = vtanh.f32 %v248_v38  ;;  %v251_v41 = vsub.f32 0.0, %v248_v38  ;;  %3565 = vmatpush3.bf16.msra.mxu1 %v4275_v36  ;;  %v4281_v38 = vpack.c.bf16 %v155_v37, %v154_v35 }
 0x161   :  { %3566 = vmatprep.subr.bf16.mxu1 %v4071_v1 }
 0x162   :  { %v252_v42 = vmul.f32 1.442695, %v251_v41 }
 0x164   :  { %3800 = vpow2.f32 %v252_v42  ;;  %3568 = vmatpush3.bf16.msra.mxu1 %v4281_v38 }
 0x165   :  { %3581 = vmatprep.subr.bf16.mxu1 %v4071_v1 }
 0x16a   :  { %v3799_v40 = vpop.eup %3798 }
 0x16b   :  { %263 = vrot.lane.b32.xlu0 %v3799_v40, %s4075_s11 }
 0x16e   :  { %v3801_v43 = vpop.eup %3800 }
 0x16f   :  { %v254_v44 = vadd.f32 1.0, %v3801_v43  ;;  %v4305_v43 = vld [vmem:[%s4937_s7] ss:$0 sm:$0xff] }
 0x171   :  { %3802 = vrcp.f32 %v254_v44 }
 0x17b   :  { %v3803_v45 = vpop.eup %3802 }
 0x17c   :  { %v261_v49 = vmul.f32 %v3803_v45, %v259_v48 }
 0x1dd   :  { %v264_v46 = vpop.permute.xlu0 %263 }
 0x1de   :  { %v266_v47 = vmul.f32 %v3803_v45, %v264_v46 }
 0x1e0   :  { %268 = vrot.lane.b32.xlu1 %v266_v47, %s4074_s20 }
 0x252   :  { %v269_v50 = vpop.permute.xlu1 %268 }
 0x253   :  { %v4211_v51 = vadd.f32 %v269_v50, %v261_v49  ;;  %v4076_v49 = vmov 6  }
 0x254   :  { %3796 = vset.pattern.permute.xlu1 %v4076_v49  ;;  %3797 = vset.pattern.permute.xlu0 %v4076_v49 }
 0x255   :  { %3804 = vtanh.f32 %v4211_v51 }
 0x25f   :  { %v3805_v63 = vpop.eup %3804 }
 0x260   :  { %274 = vrot.lane.b32.xlu0 %v3805_v63, %s4075_s11 }
 0x264   :  { %283 = vrot.lane.b32.xlu0 %v2905_v2, %s4074_s20 }
 0x268   :  { %373 = vrot.lane.b32.xlu0 %v2906_v4, %s4074_s20 }
 0x2d2   :  { %v275_v5 = vpop.permute.xlu0 %274 }
 0x2d3   :  { %v4239_v6 = vmul.f32 %v3803_v45, %v275_v5 }
 0x2d5   :  { %279 = vrot.lane.b32.xlu1 %v4239_v6, %s4074_s20 }
 0x2d6   :  { %v284_v7 = vpop.permute.xlu0 %283 }
 0x2da   :  { %v374_v28 = vpop.permute.xlu0 %373 }
 0x347   :  { %v280_v9 = vpop.permute.xlu1 %279 }
 0x348   :  { %v286_v10 = vsel %vm59_vm1, %v280_v9, %v284_v7 }
 0x349   :  { %3177 = vmatmul.mubr.msk.f32.vlgmr.msra.gmra.mrb[2].mxu0 %vm177_vm3, %v286_v10 }
 0x34a   :  { %3571 = vmatpush3.bf16.msra.mxu0 %v4152_v8  ;;  %3206 = vmatprep.mubr.msk.f32.mxu0 %vm4072_vm0, %v4073_v3 }
 0x34b   :  { %3572 = vmatprep.subr.bf16.mxu0 %v4071_v1 }
 0x34e   :  { %3574 = vmatpush3.bf16.msra.mxu0 %v4167_v16 }
 0x34f   :  { %3575 = vmatprep.subr.bf16.mxu0 %v4071_v1 }
 0x352   :  { %3577 = vmatpush3.bf16.msra.mxu0 %v4178_v22 }
 0x353   :  { %3578 = vmatprep.subr.bf16.mxu0 %v4071_v1 }
 0x356   :  { %3580 = vmatpush3.bf16.msra.mxu0 %v4187_v26 }
 0x357   :  { %3593 = vmatprep.subr.bf16.mxu0 %v4071_v1 }
 0x41c   :  { %v362_v12 = vpop.f32.mrb[2].mxu0 }
 0x41d   :  { %v363_v13 = vadd.f32 %v4258_v11, %v362_v12  ;;  %v3178_v14 = vpop.f32.mrb[3].mxu0 }
 0x41f   :  { %3806 = vtanh.f32 %v363_v13  ;;  %v366_v18 = vsub.f32 0.0, %v363_v13 }
 0x421   :  { %v367_v19 = vmul.f32 1.442695, %v366_v18 }
 0x423   :  { %3808 = vpow2.f32 %v367_v19 }
 0x429   :  { %v3807_v15 = vpop.eup %3806 }
 0x42a   :  { %378 = vrot.lane.b32.xlu1 %v3807_v15, %s4075_s11 }
 0x42d   :  { %v3809_v20 = vpop.eup %3808 }
 0x42e   :  { %v369_v21 = vadd.f32 1.0, %v3809_v20 }
 0x430   :  { %3810 = vrcp.f32 %v369_v21 }
 0x43a   :  { %v3811_v23 = vpop.eup %3810 }
 0x43b   :  { %v376_v29 = vmul.f32 %v3811_v23, %v374_v28 }
 0x49c   :  { %v379_v24 = vpop.permute.xlu1 %378 }
 0x49d   :  { %v381_v25 = vmul.f32 %v3811_v23, %v379_v24 }
 0x49f   :  { %383 = vrot.lane.b32.xlu1 %v381_v25, %s4074_s20 }
 0x511   :  { %v384_v30 = vpop.permute.xlu1 %383 }
 0x512   :  { %v4263_v31 = vadd.f32 %v384_v30, %v376_v29 }
 0x514   :  { %3812 = vtanh.f32 %v4263_v31 }
 0x51e   :  { %v3813_v39 = vpop.eup %3812 }
 0x51f   :  { %389 = vrot.lane.b32.xlu0 %v3813_v39, %s4075_s11 }
 0x591   :  { %v390_v40 = vpop.permute.xlu0 %389 }
 0x592   :  { %v4287_v41 = vmul.f32 %v3811_v23, %v390_v40 }
 0x594   :  { %400 = vrot.lane.b32.xlu1 %v4287_v41, %s4074_s20 }
 0x606   :  { %v401_v42 = vpop.permute.xlu1 %400 }
 0x607   :  { %3188 = vmatmul.mubr.msk.f32.vlgmr.msra.gmra.mrb[2].mxu1 %vm59_vm1, %v401_v42 }
 0x608   :  { %3583 = vmatpush3.bf16.msra.mxu1 %v4214_v55  ;;  %3225 = vmatprep.mubr.msk.f32.mxu1 %vm4072_vm0, %v4073_v3 }
 0x609   :  { %3584 = vmatprep.subr.bf16.mxu1 %v4071_v1 }
 0x60c   :  { %3586 = vmatpush3.bf16.msra.mxu1 %v4217_v57 }
 0x60d   :  { %3587 = vmatprep.subr.bf16.mxu1 %v4071_v1 }
 0x610   :  { %3589 = vmatpush3.bf16.msra.mxu1 %v4221_v60 }
 0x611   :  { %3590 = vmatprep.subr.bf16.mxu1 %v4071_v1 }
 0x614   :  { %3592 = vmatpush3.bf16.msra.mxu1 %v4226_v0 }
 0x615   :  { %3599 = vmatprep.subr.bf16.mxu1 %v4071_v1 }
 0x6da   :  { %v470_v44 = vpop.f32.mrb[2].mxu1 }
 0x6db   :  { %v4309_v45 = vadd.f32 %v4305_v43, %v470_v44  ;;  %v3189_v46 = vpop.f32.mrb[3].mxu1 }
 0x6dd   :  { %v4314_v47 = vsel %vm46_vm4, %v4309_v45, -inf  ;;  %v520_v50 = vsub.f32 0.0, %v4309_v45 }
 0x6de   :  { %v476_v48 = vsel %vm475_vm5, %v4314_v47, -inf }
 0x6df   :  { %477 = vmax.xlane.f32.xlu0 %v476_v48  ;;  %v521_v52 = vmul.f32 1.442695, %v520_v50 }
 0x6e1   :  { %3814 = vpow2.f32 %v521_v52 }
 0x6eb   :  { %v3815_v61 = vpop.eup %3814 }
 0x6ec   :  { %v523_v62 = vadd.f32 1.0, %v3815_v61 }
 0x6ee   :  { %3816 = vrcp.f32 %v523_v62 }
 0x6f8   :  { %v3817_v63 = vpop.eup %3816 }
 0x76c   :  { %v4319_v53 = vpop.xlane.xlu0 %477 }
 0x76d   :  { %vm500_vm6 = vcmp.eq.f32.partialorder %v4314_v47, %v4319_v53 }
 0x76e   :  { %v501_v54 = vsel %vm500_vm6, %v4194_v27, 7 }
 0x76f   :  { %v502_v56 = vsel %vm475_vm5, %v501_v54, 2147483647 }
 0x770   :  { %v504_v58 = vshra.s32 %v502_v56, 16  ;;  %v503_v2 = vand.u32 65535, %v502_v56 }
 0x772   :  { %v506_v59 = vcvt.s32.f32 %v504_v58  ;;  %v505_v5 = vcvt.s32.f32 %v503_v2 }
 0x774   :  { %507 = vmin.xlane.f32.xlu1 %v506_v59 }
 0x785   :  { %531 = vperm.xlu1 %3796, %v3817_v63  }
 0x801   :  { %v508_v4 = vpop.xlane.xlu1 %507 }
 0x802   :  { %vm509_vm7 = vcmp.eq.f32.partialorder %v506_v59, %v508_v4  ;;  %v514_v9 = vcvt.f32.s32 %v508_v4 }
 0x803   :  { %v510_v7 = vsel %vm509_vm7, %v505_v5, inf }
 0x804   :  { %511 = vmin.xlane.f32.xlu0 %v510_v7  ;;  %v515_v12 = vshll.u32 %v514_v9, 16 }
 0x81a   :  { %525 = vrot.lane.b32.xlu0 %v4239_v6, %s4075_s11  ;;  %v532_v6 = vpop.permute.xlu1 %531 }
 0x81b   :  { %v534_v20 = vmul.f32 %v532_v6, %v4169_v17 }
 0x81d   :  { %v535_v21 = vadd.f32 %v534_v20, %v4205_v34 }
 0x891   :  { %v512_v10 = vpop.xlane.xlu0 %511 }
 0x892   :  { %v513_v13 = vcvt.f32.s32 %v512_v10 }
 0x894   :  { %v516_v14 = vadd.s32 %v515_v12, %v513_v13 }
 0x895   :  { %v526_v18 = vpop.permute.xlu0 %525 }
 0x896   :  { %vm517_vm8 = vcmp.eq.s32.totalorder %v4194_v27, %v516_v14 }
 0x897   :  { %v2913_v15 = vsel %vm517_vm8, 1.0, %v4073_v3 }
 0x898   :  { %v528_v19 = vsel %vm59_vm1, %v2913_v15, %v526_v18 }
 0x899   :  { %3207 = vmatmul.mubr.msk.f32.vlgmr.msra.gmra.mrb[4].mxu0 %vm177_vm3, %v528_v19 }
 0x89a   :  { %3595 = vmatpush3.bf16.msra.mxu0 %v4275_v36  ;;  %3236 = vmatprep.mubr.msk.f32.mxu0 %vm4072_vm0, %v4073_v3 }
 0x89b   :  { %3596 = vmatprep.subr.bf16.mxu0 %v4071_v1 }
 0x89e   :  { %3598 = vmatpush3.bf16.msra.mxu0 %v4281_v38 }
 0x89f   :  { %3611 = vmatprep.subr.bf16.mxu0 %v4071_v1 }
 0x96c   :  { %v605_v23 = vpop.f32.mrb[4].mxu0 }
 0x96d   :  { %v606_v24 = vadd.f32 %v605_v23, %v535_v21  ;;  %v3208_v25 = vpop.f32.mrb[5].mxu0 }
 0x96f   :  { %3818 = vtanh.f32 %v606_v24  ;;  %v609_v29 = vsub.f32 0.0, %v606_v24 }
 0x971   :  { %v610_v30 = vmul.f32 1.442695, %v609_v29 }
 0x973   :  { %3820 = vpow2.f32 %v610_v30 }
 0x979   :  { %v3819_v28 = vpop.eup %3818 }
 0x97a   :  { %617 = vrot.lane.b32.xlu1 %v3819_v28, %s4075_s11 }
 0x97d   :  { %v3821_v32 = vpop.eup %3820 }
 0x97e   :  { %v612_v33 = vadd.f32 1.0, %v3821_v32 }
 0x980   :  { %3822 = vrcp.f32 %v612_v33 }
 0x98a   :  { %v3823_v35 = vpop.eup %3822 }
 0x98b   :  { %v615_v40 = vmul.f32 %v3823_v35, %v4211_v51 }
 0x9ec   :  { %v618_v37 = vpop.permute.xlu1 %617 }
 0x9ed   :  { %v620_v39 = vmul.f32 %v3823_v35, %v618_v37 }
 0x9ef   :  { %622 = vrot.lane.b32.xlu0 %v620_v39, %s4074_s20 }
 0xa61   :  { %v623_v42 = vpop.permute.xlu0 %622 }
 0xa62   :  { %v4342_v44 = vadd.f32 %v623_v42, %v615_v40 }
 0xa64   :  { %3824 = vtanh.f32 %v4342_v44 }
 0xa6e   :  { %v3825_v46 = vpop.eup %3824 }
 0xa6f   :  { %628 = vrot.lane.b32.xlu1 %v3825_v46, %s4075_s11 }
 0xa73   :  { %636 = vrot.lane.b32.xlu1 %v4287_v41, %s4075_s11 }
 0xae1   :  { %v629_v48 = vpop.permute.xlu1 %628 }
 0xae2   :  { %v4348_v49 = vmul.f32 %v3823_v35, %v629_v48 }
 0xae4   :  { %633 = vrot.lane.b32.xlu0 %v4348_v49, %s4074_s20 }
 0xae5   :  { %v637_v50 = vpop.permute.xlu1 %636 }
 0xb56   :  { %v634_v52 = vpop.permute.xlu0 %633 }
 0xb57   :  { %v639_v51 = vsel %vm59_vm1, %v634_v52, %v637_v50 }
 0xb58   :  { %3226 = vmatmul.mubr.msk.f32.vlgmr.msra.gmra.mrb[4].mxu1 %vm177_vm3, %v639_v51 }
 0xb59   :  { %3601 = vmatpush3.bf16.msra.mxu1 %v4152_v8  ;;  %3255 = vmatprep.mubr.msk.f32.mxu1 %vm4072_vm0, %v4073_v3 }
 0xb5a   :  { %3602 = vmatprep.subr.bf16.mxu1 %v4071_v1 }
 0xb5d   :  { %3604 = vmatpush3.bf16.msra.mxu1 %v4167_v16 }
 0xb5e   :  { %3605 = vmatprep.subr.bf16.mxu1 %v4071_v1 }
 0xb61   :  { %3607 = vmatpush3.bf16.msra.mxu1 %v4178_v22 }
 0xb62   :  { %3608 = vmatprep.subr.bf16.mxu1 %v4071_v1 }
 0xb65   :  { %3610 = vmatpush3.bf16.msra.mxu1 %v4187_v26 }
 0xb66   :  { %3623 = vmatprep.subr.bf16.mxu1 %v4071_v1 }
 0xc2b   :  { %v709_v41 = vpop.f32.mrb[4].mxu1 }
 0xc2c   :  { %v710_v54 = vadd.f32 %v4258_v11, %v709_v41  ;;  %v3227_v56 = vpop.f32.mrb[5].mxu1 }
 0xc2e   :  { %3826 = vtanh.f32 %v710_v54  ;;  %v713_v59 = vsub.f32 0.0, %v710_v54 }
 0xc30   :  { %v714_v61 = vmul.f32 1.442695, %v713_v59 }
 0xc32   :  { %3828 = vpow2.f32 %v714_v61 }
 0xc38   :  { %v3827_v58 = vpop.eup %3826 }
 0xc39   :  { %721 = vrot.lane.b32.xlu0 %v3827_v58, %s4075_s11 }
 0xc3c   :  { %v3829_v62 = vpop.eup %3828 }
 0xc3d   :  { %v716_v63 = vadd.f32 1.0, %v3829_v62 }
 0xc3f   :  { %3830 = vrcp.f32 %v716_v63 }
 0xc49   :  { %v3831_v2 = vpop.eup %3830 }
 0xc4a   :  { %v719_v7 = vmul.f32 %v3831_v2, %v4263_v31 }
 0xcab   :  { %v722_v4 = vpop.permute.xlu0 %721 }
 0xcac   :  { %v724_v5 = vmul.f32 %v3831_v2, %v722_v4 }
 0xcae   :  { %726 = vrot.lane.b32.xlu1 %v724_v5, %s4074_s20 }
 0xd20   :  { %v727_v9 = vpop.permute.xlu1 %726 }
 0xd21   :  { %v4368_v10 = vadd.f32 %v727_v9, %v719_v7 }
 0xd23   :  { %3832 = vtanh.f32 %v4368_v10 }
 0xd2d   :  { %v3833_v12 = vpop.eup %3832 }
 0xd2e   :  { %732 = vrot.lane.b32.xlu0 %v3833_v12, %s4075_s11 }
 0xda0   :  { %v733_v13 = vpop.permute.xlu0 %732 }
 0xda1   :  { %v4372_v14 = vmul.f32 %v3831_v2, %v733_v13 }
 0xda3   :  { %737 = vrot.lane.b32.xlu1 %v4372_v14, %s4074_s20 }
 0xe15   :  { %v738_v15 = vpop.permute.xlu1 %737 }
 0xe16   :  { %3237 = vmatmul.mubr.msk.f32.vlgmr.msra.gmra.mrb[6].mxu0 %vm59_vm1, %v738_v15 }
 0xe17   :  { %3613 = vmatpush3.bf16.msra.mxu0 %v4214_v55  ;;  %3274 = vmatprep.mubr.msk.f32.mxu0 %vm4072_vm0, %v4073_v3 }
 0xe18   :  { %3614 = vmatprep.subr.bf16.mxu0 %v4071_v1 }
 0xe1b   :  { %3616 = vmatpush3.bf16.msra.mxu0 %v4217_v57 }
 0xe1c   :  { %3617 = vmatprep.subr.bf16.mxu0 %v4071_v1 }
 0xe1f   :  { %3619 = vmatpush3.bf16.msra.mxu0 %v4221_v60 }
 0xe20   :  { %3620 = vmatprep.subr.bf16.mxu0 %v4071_v1 }
 0xe23   :  { %3622 = vmatpush3.bf16.msra.mxu0 %v4226_v0 }
 0xe24   :  { %3629 = vmatprep.subr.bf16.mxu0 %v4071_v1 }
 0xee9   :  { %v807_v31 = vpop.f32.mrb[6].mxu0 }
 0xeea   :  { %v4388_v18 = vadd.f32 %v4305_v43, %v807_v31  ;;  %v3238_v19 = vpop.f32.mrb[7].mxu0 }
 0xeec   :  { %v4393_v6 = vsel %vm46_vm4, %v4388_v18, -inf  ;;  %v861_v21 = vsub.f32 0.0, %v4388_v18 }
 0xeed   :  { %v812_v20 = vsel %vm475_vm5, %v4393_v6, -inf }
 0xeee   :  { %813 = vmax.xlane.f32.xlu0 %v812_v20  ;;  %v862_v23 = vmul.f32 1.442695, %v861_v21 }
 0xef0   :  { %3834 = vpow2.f32 %v862_v23 }
 0xefa   :  { %v3835_v32 = vpop.eup %3834 }
 0xefb   :  { %v864_v33 = vadd.f32 1.0, %v3835_v32 }
 0xefd   :  { %3836 = vrcp.f32 %v864_v33 }
 0xf07   :  { %v3837_v35 = vpop.eup %3836 }
 0xf7b   :  { %v4398_v24 = vpop.xlane.xlu0 %813 }
 0xf7c   :  { %vm841_vm9 = vcmp.eq.f32.partialorder %v4393_v6, %v4398_v24 }
 0xf7d   :  { %v842_v25 = vsel %vm841_vm9, %v4194_v27, 7 }
 0xf7e   :  { %v843_v28 = vsel %vm475_vm5, %v842_v25, 2147483647 }
 0xf7f   :  { %v845_v29 = vshra.s32 %v843_v28, 16  ;;  %v844_v37 = vand.u32 65535, %v843_v28 }
 0xf81   :  { %v847_v30 = vcvt.s32.f32 %v845_v29  ;;  %v846_v40 = vcvt.s32.f32 %v844_v37 }
 0xf83   :  { %848 = vmin.xlane.f32.xlu1 %v847_v30 }
 0xf94   :  { %872 = vperm.xlu1 %3796, %v3837_v35  }
0x1010   :  { %v849_v39 = vpop.xlane.xlu1 %848 }
0x1011   :  { %vm850_vm10 = vcmp.eq.f32.partialorder %v847_v30, %v849_v39  ;;  %v855_v46 = vcvt.f32.s32 %v849_v39 }
0x1012   :  { %v851_v42 = vsel %vm850_vm10, %v846_v40, inf }
0x1013   :  { %852 = vmin.xlane.f32.xlu0 %v851_v42  ;;  %v856_v50 = vshll.u32 %v855_v46, 16 }
0x1029   :  { %866 = vrot.lane.b32.xlu0 %v4348_v49, %s4075_s11  ;;  %v873_v49 = vpop.permute.xlu1 %872 }
0x102a   :  { %v875_v58 = vmul.f32 %v873_v49, %v4169_v17 }
0x102c   :  { %v876_v59 = vadd.f32 %v875_v58, %v4205_v34 }
0x10a0   :  { %v853_v48 = vpop.xlane.xlu0 %852 }
0x10a1   :  { %v854_v52 = vcvt.f32.s32 %v853_v48 }
0x10a3   :  { %v857_v51 = vadd.s32 %v856_v50, %v854_v52 }
0x10a4   :  { %v867_v54 = vpop.permute.xlu0 %866 }
0x10a5   :  { %vm858_vm11 = vcmp.eq.s32.totalorder %v4194_v27, %v857_v51 }
0x10a6   :  { %v2917_v41 = vsel %vm858_vm11, 1.0, %v4073_v3 }
0x10a7   :  { %v869_v56 = vsel %vm59_vm1, %v2917_v41, %v867_v54 }
0x10a8   :  { %3256 = vmatmul.mubr.msk.f32.vlgmr.msra.gmra.mrb[6].mxu1 %vm177_vm3, %v869_v56 }
0x10a9   :  { %3625 = vmatpush3.bf16.msra.mxu1 %v4275_v36  ;;  %3285 = vmatprep.mubr.msk.f32.mxu1 %vm4072_vm0, %v4073_v3 }
0x10aa   :  { %3626 = vmatprep.subr.bf16.mxu1 %v4071_v1 }
0x10ad   :  { %3628 = vmatpush3.bf16.msra.mxu1 %v4281_v38 }
0x10ae   :  { %3641 = vmatprep.subr.bf16.mxu1 %v4071_v1 }
0x117b   :  { %v946_v61 = vpop.f32.mrb[6].mxu1 }
0x117c   :  { %v947_v62 = vadd.f32 %v946_v61, %v876_v59  ;;  %v3257_v63 = vpop.f32.mrb[7].mxu1 }
0x117e   :  { %3838 = vtanh.f32 %v947_v62  ;;  %v950_v4 = vsub.f32 0.0, %v947_v62 }
0x1180   :  { %v951_v5 = vmul.f32 1.442695, %v950_v4 }
0x1182   :  { %3840 = vpow2.f32 %v951_v5 }
0x1188   :  { %v3839_v2 = vpop.eup %3838 }
0x1189   :  { %958 = vrot.lane.b32.xlu1 %v3839_v2, %s4075_s11 }
0x118c   :  { %v3841_v7 = vpop.eup %3840 }
0x118d   :  { %v953_v9 = vadd.f32 1.0, %v3841_v7 }
0x118f   :  { %3842 = vrcp.f32 %v953_v9 }
0x1199   :  { %v3843_v12 = vpop.eup %3842 }
0x119a   :  { %v956_v31 = vmul.f32 %v3843_v12, %v4342_v44 }
0x11fb   :  { %v959_v13 = vpop.permute.xlu1 %958 }
0x11fc   :  { %v961_v15 = vmul.f32 %v3843_v12, %v959_v13 }
0x11fe   :  { %963 = vrot.lane.b32.xlu0 %v961_v15, %s4074_s20 }
0x1270   :  { %v964_v19 = vpop.permute.xlu0 %963 }
0x1271   :  { %v4421_v20 = vadd.f32 %v964_v19, %v956_v31 }
0x1273   :  { %3844 = vtanh.f32 %v4421_v20 }
0x127d   :  { %v3845_v21 = vpop.eup %3844 }
0x127e   :  { %969 = vrot.lane.b32.xlu1 %v3845_v21, %s4075_s11 }
0x1282   :  { %977 = vrot.lane.b32.xlu1 %v4372_v14, %s4075_s11 }
0x12f0   :  { %v970_v23 = vpop.permute.xlu1 %969 }
0x12f1   :  { %v4427_v25 = vmul.f32 %v3843_v12, %v970_v23 }
0x12f3   :  { %974 = vrot.lane.b32.xlu0 %v4427_v25, %s4074_s20 }
0x12f4   :  { %v978_v28 = vpop.permute.xlu1 %977 }
0x1365   :  { %v975_v29 = vpop.permute.xlu0 %974 }
0x1366   :  { %v980_v44 = vsel %vm59_vm1, %v975_v29, %v978_v28 }
0x1367   :  { %3275 = vmatmul.mubr.msk.f32.vlgmr.msra.gmra.mrb[8].mxu0 %vm177_vm3, %v980_v44 }
0x1368   :  { %3631 = vmatpush3.bf16.msra.mxu0 %v4152_v8  ;;  %3304 = vmatprep.mubr.msk.f32.mxu0 %vm4072_vm0, %v4073_v3 }
0x1369   :  { %3632 = vmatprep.subr.bf16.mxu0 %v4071_v1 }
0x136c   :  { %3634 = vmatpush3.bf16.msra.mxu0 %v4167_v16 }
0x136d   :  { %3635 = vmatprep.subr.bf16.mxu0 %v4071_v1 }
0x1370   :  { %3637 = vmatpush3.bf16.msra.mxu0 %v4178_v22 }
0x1371   :  { %3638 = vmatprep.subr.bf16.mxu0 %v4071_v1 }
0x1374   :  { %3640 = vmatpush3.bf16.msra.mxu0 %v4187_v26 }
0x1375   :  { %3653 = vmatprep.subr.bf16.mxu0 %v4071_v1 }
0x143a   :  { %v1050_v14 = vpop.f32.mrb[8].mxu0 }
0x143b   :  { %v1051_v30 = vadd.f32 %v4258_v11, %v1050_v14  ;;  %v3276_v32 = vpop.f32.mrb[9].mxu0 }
0x143d   :  { %3846 = vtanh.f32 %v1051_v30  ;;  %v1054_v35 = vsub.f32 0.0, %v1051_v30 }
0x143f   :  { %v1055_v37 = vmul.f32 1.442695, %v1054_v35 }
0x1441   :  { %3848 = vpow2.f32 %v1055_v37 }
0x1447   :  { %v3847_v33 = vpop.eup %3846 }
0x1448   :  { %1062 = vrot.lane.b32.xlu0 %v3847_v33, %s4075_s11 }
0x144b   :  { %v3849_v39 = vpop.eup %3848 }
0x144c   :  { %v1057_v40 = vadd.f32 1.0, %v3849_v39 }
0x144e   :  { %3850 = vrcp.f32 %v1057_v40 }
0x1458   :  { %v3851_v42 = vpop.eup %3850 }
0x1459   :  { %v1060_v50 = vmul.f32 %v3851_v42, %v4368_v10 }
0x14ba   :  { %v1063_v46 = vpop.permute.xlu0 %1062 }
0x14bb   :  { %v1065_v48 = vmul.f32 %v3851_v42, %v1063_v46 }
0x14bd   :  { %1067 = vrot.lane.b32.xlu1 %v1065_v48, %s4074_s20 }
0x152f   :  { %v1068_v52 = vpop.permute.xlu1 %1067 }
0x1530   :  { %v4447_v51 = vadd.f32 %v1068_v52, %v1060_v50 }
0x1532   :  { %3852 = vtanh.f32 %v4447_v51 }
0x153c   :  { %v3853_v41 = vpop.eup %3852 }
0x153d   :  { %1073 = vrot.lane.b32.xlu0 %v3853_v41, %s4075_s11 }
0x15af   :  { %v1074_v54 = vpop.permute.xlu0 %1073 }
0x15b0   :  { %v4451_v56 = vmul.f32 %v3851_v42, %v1074_v54 }
0x15b2   :  { %1078 = vrot.lane.b32.xlu1 %v4451_v56, %s4074_s20 }
0x1624   :  { %v1079_v49 = vpop.permute.xlu1 %1078 }
0x1625   :  { %3286 = vmatmul.mubr.msk.f32.vlgmr.msra.gmra.mrb[8].mxu1 %vm59_vm1, %v1079_v49 }
0x1626   :  { %3643 = vmatpush3.bf16.msra.mxu1 %v4214_v55  ;;  %3323 = vmatprep.mubr.msk.f32.mxu1 %vm4072_vm0, %v4073_v3 }
0x1627   :  { %3644 = vmatprep.subr.bf16.mxu1 %v4071_v1 }
0x162a   :  { %3646 = vmatpush3.bf16.msra.mxu1 %v4217_v57 }
0x162b   :  { %3647 = vmatprep.subr.bf16.mxu1 %v4071_v1 }
0x162e   :  { %3649 = vmatpush3.bf16.msra.mxu1 %v4221_v60 }
0x162f   :  { %3650 = vmatprep.subr.bf16.mxu1 %v4071_v1 }
0x1632   :  { %3652 = vmatpush3.bf16.msra.mxu1 %v4226_v0 }
0x1633   :  { %3659 = vmatprep.subr.bf16.mxu1 %v4071_v1 }
0x16f8   :  { %v1148_v10 = vpop.f32.mrb[8].mxu1 }
0x16f9   :  { %v4467_v58 = vadd.f32 %v4305_v43, %v1148_v10  ;;  %v3287_v59 = vpop.f32.mrb[9].mxu1 }
0x16fb   :  { %v4472_v61 = vsel %vm46_vm4, %v4467_v58, -inf  ;;  %v1202_v63 = vsub.f32 0.0, %v4467_v58 }
0x16fc   :  { %v1153_v62 = vsel %vm475_vm5, %v4472_v61, -inf }
0x16fd   :  { %1154 = vmax.xlane.f32.xlu0 %v1153_v62  ;;  %v1203_v2 = vmul.f32 1.442695, %v1202_v63 }
0x16ff   :  { %3854 = vpow2.f32 %v1203_v2 }
0x1709   :  { %v3855_v13 = vpop.eup %3854 }
0x170a   :  { %v1205_v15 = vadd.f32 1.0, %v3855_v13 }
0x170c   :  { %3856 = vrcp.f32 %v1205_v15 }
0x1716   :  { %v3857_v31 = vpop.eup %3856 }
0x178a   :  { %v4477_v4 = vpop.xlane.xlu0 %1154 }
0x178b   :  { %vm1182_vm12 = vcmp.eq.f32.partialorder %v4472_v61, %v4477_v4 }
0x178c   :  { %v1183_v5 = vsel %vm1182_vm12, %v4194_v27, 7 }
0x178d   :  { %v1184_v7 = vsel %vm475_vm5, %v1183_v5, 2147483647 }
0x178e   :  { %v1186_v9 = vshra.s32 %v1184_v7, 16  ;;  %v1185_v19 = vand.u32 65535, %v1184_v7 }
0x1790   :  { %v1188_v12 = vcvt.s32.f32 %v1186_v9  ;;  %v1187_v23 = vcvt.s32.f32 %v1185_v19 }
0x1792   :  { %1189 = vmin.xlane.f32.xlu1 %v1188_v12 }
0x17a3   :  { %1213 = vperm.xlu1 %3796, %v3857_v31  }
0x181f   :  { %v1190_v21 = vpop.xlane.xlu1 %1189 }
0x1820   :  { %vm1191_vm13 = vcmp.eq.f32.partialorder %v1188_v12, %v1190_v21  ;;  %v1196_v29 = vcvt.f32.s32 %v1190_v21 }
0x1821   :  { %v1192_v28 = vsel %vm1191_vm13, %v1187_v23, inf }
0x1822   :  { %1193 = vmin.xlane.f32.xlu0 %v1192_v28  ;;  %v1197_v14 = vshll.u32 %v1196_v29, 16 }
0x1838   :  { %1207 = vrot.lane.b32.xlu0 %v4427_v25, %s4075_s11  ;;  %v1214_v25 = vpop.permute.xlu1 %1213 }
0x1839   :  { %v1216_v39 = vmul.f32 %v1214_v25, %v4169_v17 }
0x183b   :  { %v1217_v40 = vadd.f32 %v1216_v39, %v4205_v34 }
0x18af   :  { %v1194_v44 = vpop.xlane.xlu0 %1193 }
0x18b0   :  { %v1195_v30 = vcvt.f32.s32 %v1194_v44 }
0x18b2   :  { %v1198_v32 = vadd.s32 %v1197_v14, %v1195_v30 }
0x18b3   :  { %v1208_v35 = vpop.permute.xlu0 %1207 }
0x18b4   :  { %vm1199_vm14 = vcmp.eq.s32.totalorder %v4194_v27, %v1198_v32 }
0x18b5   :  { %v2921_v33 = vsel %vm1199_vm14, 1.0, %v4073_v3 }
0x18b6   :  { %v1210_v37 = vsel %vm59_vm1, %v2921_v33, %v1208_v35 }
0x18b7   :  { %3305 = vmatmul.mubr.msk.f32.vlgmr.msra.gmra.mrb[10].mxu0 %vm177_vm3, %v1210_v37 }
0x18b8   :  { %3655 = vmatpush3.bf16.msra.mxu0 %v4275_v36  ;;  %3334 = vmatprep.mubr.msk.f32.mxu0 %vm4072_vm0, %v4073_v3 }
0x18b9   :  { %3656 = vmatprep.subr.bf16.mxu0 %v4071_v1 }
0x18bc   :  { %3658 = vmatpush3.bf16.msra.mxu0 %v4281_v38 }
0x18bd   :  { %3671 = vmatprep.subr.bf16.mxu0 %v4071_v1 }
0x198a   :  { %v1287_v42 = vpop.f32.mrb[10].mxu0 }
0x198b   :  { %v1288_v46 = vadd.f32 %v1287_v42, %v1217_v40  ;;  %v3306_v48 = vpop.f32.mrb[11].mxu0 }
0x198d   :  { %3858 = vtanh.f32 %v1288_v46  ;;  %v1291_v52 = vsub.f32 0.0, %v1288_v46 }
0x198f   :  { %v1292_v41 = vmul.f32 1.442695, %v1291_v52 }
0x1991   :  { %3860 = vpow2.f32 %v1292_v41 }
0x1997   :  { %v3859_v50 = vpop.eup %3858 }
0x1998   :  { %1299 = vrot.lane.b32.xlu1 %v3859_v50, %s4075_s11 }
0x199b   :  { %v3861_v54 = vpop.eup %3860 }
0x199c   :  { %v1294_v49 = vadd.f32 1.0, %v3861_v54 }
0x199e   :  { %3862 = vrcp.f32 %v1294_v49 }
0x19a8   :  { %v3863_v10 = vpop.eup %3862 }
0x19a9   :  { %v1297_v63 = vmul.f32 %v3863_v10, %v4421_v20 }
0x1a0a   :  { %v1300_v59 = vpop.permute.xlu1 %1299 }
0x1a0b   :  { %v1302_v62 = vmul.f32 %v3863_v10, %v1300_v59 }
0x1a0d   :  { %1304 = vrot.lane.b32.xlu0 %v1302_v62, %s4074_s20 }
0x1a7f   :  { %v1305_v2 = vpop.permute.xlu0 %1304 }
0x1a80   :  { %v4500_v5 = vadd.f32 %v1305_v2, %v1297_v63 }
0x1a82   :  { %3864 = vtanh.f32 %v4500_v5 }
0x1a8c   :  { %v3865_v7 = vpop.eup %3864 }
0x1a8d   :  { %1310 = vrot.lane.b32.xlu1 %v3865_v7, %s4075_s11 }
0x1a91   :  { %1318 = vrot.lane.b32.xlu1 %v4451_v56, %s4075_s11 }
0x1aff   :  { %v1311_v9 = vpop.permute.xlu1 %1310 }
0x1b00   :  { %v4506_v12 = vmul.f32 %v3863_v10, %v1311_v9 }
0x1b02   :  { %1315 = vrot.lane.b32.xlu0 %v4506_v12, %s4074_s20 }
0x1b03   :  { %v1319_v13 = vpop.permute.xlu1 %1318 }
0x1b74   :  { %v1316_v15 = vpop.permute.xlu0 %1315 }
0x1b75   :  { %v1321_v20 = vsel %vm59_vm1, %v1316_v15, %v1319_v13 }
0x1b76   :  { %3324 = vmatmul.mubr.msk.f32.vlgmr.msra.gmra.mrb[10].mxu1 %vm177_vm3, %v1321_v20 }
0x1b77   :  { %3661 = vmatpush3.bf16.msra.mxu1 %v4152_v8  ;;  %3353 = vmatprep.mubr.msk.f32.mxu1 %vm4072_vm0, %v4073_v3 }
0x1b78   :  { %3662 = vmatprep.subr.bf16.mxu1 %v4071_v1 }
0x1b7b   :  { %3664 = vmatpush3.bf16.msra.mxu1 %v4167_v16 }
0x1b7c   :  { %3665 = vmatprep.subr.bf16.mxu1 %v4071_v1 }
0x1b7f   :  { %3667 = vmatpush3.bf16.msra.mxu1 %v4178_v22 }
0x1b80   :  { %3668 = vmatprep.subr.bf16.mxu1 %v4071_v1 }
0x1b83   :  { %3670 = vmatpush3.bf16.msra.mxu1 %v4187_v26 }
0x1b84   :  { %3683 = vmatprep.subr.bf16.mxu1 %v4071_v1 }
0x1c49   :  { %v1391_v56 = vpop.f32.mrb[10].mxu1 }
0x1c4a   :  { %v1392_v31 = vadd.f32 %v4258_v11, %v1391_v56  ;;  %v3325_v19 = vpop.f32.mrb[11].mxu1 }
0x1c4c   :  { %3866 = vtanh.f32 %v1392_v31  ;;  %v1395_v23 = vsub.f32 0.0, %v1392_v31 }
0x1c4e   :  { %v1396_v28 = vmul.f32 1.442695, %v1395_v23 }
0x1c50   :  { %3868 = vpow2.f32 %v1396_v28 }
0x1c56   :  { %v3867_v21 = vpop.eup %3866 }
0x1c57   :  { %1403 = vrot.lane.b32.xlu0 %v3867_v21, %s4075_s11 }
0x1c5a   :  { %v3869_v29 = vpop.eup %3868 }
0x1c5b   :  { %v1398_v44 = vadd.f32 1.0, %v3869_v29 }
0x1c5d   :  { %3870 = vrcp.f32 %v1398_v44 }
0x1c67   :  { %v3871_v14 = vpop.eup %3870 }
0x1c68   :  { %v1401_v33 = vmul.f32 %v3871_v14, %v4447_v51 }
0x1cc9   :  { %v1404_v30 = vpop.permute.xlu0 %1403 }
0x1cca   :  { %v1406_v32 = vmul.f32 %v3871_v14, %v1404_v30 }
0x1ccc   :  { %1408 = vrot.lane.b32.xlu1 %v1406_v32, %s4074_s20 }
0x1d3e   :  { %v1409_v35 = vpop.permute.xlu1 %1408 }
0x1d3f   :  { %v4526_v37 = vadd.f32 %v1409_v35, %v1401_v33 }
0x1d41   :  { %3872 = vtanh.f32 %v4526_v37 }
0x1d4b   :  { %v3873_v25 = vpop.eup %3872 }
0x1d4c   :  { %1414 = vrot.lane.b32.xlu0 %v3873_v25, %s4075_s11 }
0x1dbe   :  { %v1415_v39 = vpop.permute.xlu0 %1414 }
0x1dbf   :  { %v4530_v40 = vmul.f32 %v3871_v14, %v1415_v39 }
0x1dc1   :  { %1419 = vrot.lane.b32.xlu1 %v4530_v40, %s4074_s20 }
0x1e33   :  { %v1420_v42 = vpop.permute.xlu1 %1419 }
0x1e34   :  { %3335 = vmatmul.mubr.msk.f32.vlgmr.msra.gmra.mrb[12].mxu0 %vm59_vm1, %v1420_v42 }
0x1e35   :  { %3673 = vmatpush3.bf16.msra.mxu0 %v4214_v55  ;;  %3372 = vmatprep.mubr.msk.f32.mxu0 %vm4072_vm0, %v4073_v3 }
0x1e36   :  { %3674 = vmatprep.subr.bf16.mxu0 %v4071_v1 }
0x1e39   :  { %3676 = vmatpush3.bf16.msra.mxu0 %v4217_v57 }
0x1e3a   :  { %3677 = vmatprep.subr.bf16.mxu0 %v4071_v1 }
0x1e3d   :  { %3679 = vmatpush3.bf16.msra.mxu0 %v4221_v60 }
0x1e3e   :  { %3680 = vmatprep.subr.bf16.mxu0 %v4071_v1 }
0x1e41   :  { %3682 = vmatpush3.bf16.msra.mxu0 %v4226_v0 }
0x1e42   :  { %3689 = vmatprep.subr.bf16.mxu0 %v4071_v1 }
0x1f07   :  { %v1489_v51 = vpop.f32.mrb[12].mxu0 }
0x1f08   :  { %v4546_v46 = vadd.f32 %v4305_v43, %v1489_v51  ;;  %v3336_v48 = vpop.f32.mrb[13].mxu0 }
0x1f0a   :  { %v4551_v50 = vsel %vm46_vm4, %v4546_v46, -inf  ;;  %v1543_v41 = vsub.f32 0.0, %v4546_v46 }
0x1f0b   :  { %v1494_v52 = vsel %vm475_vm5, %v4551_v50, -inf }
0x1f0c   :  { %1495 = vmax.xlane.f32.xlu0 %v1494_v52  ;;  %v1544_v54 = vmul.f32 1.442695, %v1543_v41 }
0x1f0e   :  { %3874 = vpow2.f32 %v1544_v54 }
0x1f18   :  { %v3875_v2 = vpop.eup %3874 }
0x1f19   :  { %v1546_v7 = vadd.f32 1.0, %v3875_v2 }
0x1f1b   :  { %3876 = vrcp.f32 %v1546_v7 }
0x1f25   :  { %v3877_v9 = vpop.eup %3876 }
0x1f99   :  { %v4556_v49 = vpop.xlane.xlu0 %1495 }
0x1f9a   :  { %vm1523_vm15 = vcmp.eq.f32.partialorder %v4551_v50, %v4556_v49 }
0x1f9b   :  { %v1524_v10 = vsel %vm1523_vm15, %v4194_v27, 7 }
0x1f9c   :  { %v1525_v59 = vsel %vm475_vm5, %v1524_v10, 2147483647 }
0x1f9d   :  { %v1527_v62 = vshra.s32 %v1525_v59, 16  ;;  %v1526_v13 = vand.u32 65535, %v1525_v59 }
0x1f9f   :  { %v1529_v63 = vcvt.s32.f32 %v1527_v62  ;;  %v1528_v20 = vcvt.s32.f32 %v1526_v13 }
0x1fa1   :  { %1530 = vmin.xlane.f32.xlu1 %v1529_v63 }
0x1fb2   :  { %1554 = vperm.xlu1 %3796, %v3877_v9  }
0x202e   :  { %v1531_v15 = vpop.xlane.xlu1 %1530 }
0x202f   :  { %vm1532_vm2 = vcmp.eq.f32.partialorder %v1529_v63, %v1531_v15  ;;  %v1537_v31 = vcvt.f32.s32 %v1531_v15 }
0x2030   :  { %v1533_v56 = vsel %vm1532_vm2, %v1528_v20, inf  ;;  %vm2203_vm2 = vcmask 337176  }
0x2031   :  { %1534 = vmin.xlane.f32.xlu0 %v1533_v56  ;;  %v1538_v21 = vshll.u32 %v1537_v31, 16 }
0x2047   :  { %1548 = vrot.lane.b32.xlu0 %v4506_v12, %s4075_s11  ;;  %v1555_v12 = vpop.permute.xlu1 %1554 }
0x2048   :  { %v1557_v30 = vmul.f32 %v1555_v12, %v4169_v17 }
0x204a   :  { %v1558_v32 = vadd.f32 %v1557_v30, %v4205_v34 }
0x20be   :  { %v1535_v19 = vpop.xlane.xlu0 %1534 }
0x20bf   :  { %v1536_v23 = vcvt.f32.s32 %v1535_v19 }
0x20c1   :  { %v1539_v28 = vadd.s32 %v1538_v21, %v1536_v23 }
0x20c2   :  { %v1549_v44 = vpop.permute.xlu0 %1548 }
0x20c3   :  { %vm1540_vm6 = vcmp.eq.s32.totalorder %v4194_v27, %v1539_v28 }
0x20c4   :  { %v2925_v29 = vsel %vm1540_vm6, 1.0, %v4073_v3  ;;  %vm2544_vm6 = vcmask 394576  }
0x20c5   :  { %v1551_v14 = vsel %vm59_vm1, %v2925_v29, %v1549_v44 }
0x20c6   :  { %3354 = vmatmul.mubr.msk.f32.vlgmr.msra.gmra.mrb[12].mxu1 %vm177_vm3, %v1551_v14 }
0x20c7   :  { %3685 = vmatpush3.bf16.msra.mxu1 %v4275_v36  ;;  %3383 = vmatprep.mubr.msk.f32.mxu1 %vm4072_vm0, %v4073_v3 }
0x20c8   :  { %3686 = vmatprep.subr.bf16.mxu1 %v4071_v1 }
0x20cb   :  { %3688 = vmatpush3.bf16.msra.mxu1 %v4281_v38 }
0x20cc   :  { %3701 = vmatprep.subr.bf16.mxu1 %v4071_v1 }
0x2199   :  { %v1628_v33 = vpop.f32.mrb[12].mxu1 }
0x219a   :  { %v1629_v35 = vadd.f32 %v1628_v33, %v1558_v32  ;;  %v3355_v25 = vpop.f32.mrb[13].mxu1 }
0x219c   :  { %3878 = vtanh.f32 %v1629_v35  ;;  %v1632_v42 = vsub.f32 0.0, %v1629_v35 }
0x219e   :  { %v1633_v51 = vmul.f32 1.442695, %v1632_v42 }
0x21a0   :  { %3880 = vpow2.f32 %v1633_v51 }
0x21a6   :  { %v3879_v39 = vpop.eup %3878 }
0x21a7   :  { %1640 = vrot.lane.b32.xlu1 %v3879_v39, %s4075_s11 }
0x21aa   :  { %v3881_v48 = vpop.eup %3880 }
0x21ab   :  { %v1635_v52 = vadd.f32 1.0, %v3881_v48 }
0x21ad   :  { %3882 = vrcp.f32 %v1635_v52 }
0x21b7   :  { %v3883_v41 = vpop.eup %3882 }
0x21b8   :  { %v1638_v59 = vmul.f32 %v3883_v41, %v4500_v5 }
0x2219   :  { %v1641_v54 = vpop.permute.xlu1 %1640 }
0x221a   :  { %v1643_v10 = vmul.f32 %v3883_v41, %v1641_v54 }
0x221c   :  { %1645 = vrot.lane.b32.xlu0 %v1643_v10, %s4074_s20 }
0x228e   :  { %v1646_v62 = vpop.permute.xlu0 %1645 }
0x228f   :  { %v4579_v63 = vadd.f32 %v1646_v62, %v1638_v59 }
0x2291   :  { %3884 = vtanh.f32 %v4579_v63 }
0x229b   :  { %v3885_v2 = vpop.eup %3884 }
0x229c   :  { %1651 = vrot.lane.b32.xlu1 %v3885_v2, %s4075_s11 }
0x22a0   :  { %1659 = vrot.lane.b32.xlu1 %v4530_v40, %s4075_s11 }
0x230e   :  { %v1652_v7 = vpop.permute.xlu1 %1651 }
0x230f   :  { %v4585_v9 = vmul.f32 %v3883_v41, %v1652_v7 }
0x2311   :  { %1656 = vrot.lane.b32.xlu0 %v4585_v9, %s4074_s20 }
0x2312   :  { %v1660_v13 = vpop.permute.xlu1 %1659 }
0x2383   :  { %v1657_v15 = vpop.permute.xlu0 %1656 }
0x2384   :  { %v1662_v5 = vsel %vm59_vm1, %v1657_v15, %v1660_v13 }
0x2385   :  { %3373 = vmatmul.mubr.msk.f32.vlgmr.msra.gmra.mrb[14].mxu0 %vm177_vm3, %v1662_v5 }
0x2386   :  { %3691 = vmatpush3.bf16.msra.mxu0 %v4152_v8  ;;  %3402 = vmatprep.mubr.msk.f32.mxu0 %vm4072_vm0, %v4073_v3 }
0x2387   :  { %3692 = vmatprep.subr.bf16.mxu0 %v4071_v1 }
0x238a   :  { %3694 = vmatpush3.bf16.msra.mxu0 %v4167_v16 }
0x238b   :  { %3695 = vmatprep.subr.bf16.mxu0 %v4071_v1 }
0x238e   :  { %3697 = vmatpush3.bf16.msra.mxu0 %v4178_v22 }
0x238f   :  { %3698 = vmatprep.subr.bf16.mxu0 %v4071_v1 }
0x2392   :  { %3700 = vmatpush3.bf16.msra.mxu0 %v4187_v26 }
0x2393   :  { %3713 = vmatprep.subr.bf16.mxu0 %v4071_v1 }
0x2458   :  { %v1732_v40 = vpop.f32.mrb[14].mxu0 }
0x2459   :  { %v1733_v20 = vadd.f32 %v4258_v11, %v1732_v40  ;;  %v3374_v56 = vpop.f32.mrb[15].mxu0 }
0x245b   :  { %3886 = vtanh.f32 %v1733_v20  ;;  %v1736_v19 = vsub.f32 0.0, %v1733_v20 }
0x245d   :  { %v1737_v21 = vmul.f32 1.442695, %v1736_v19 }
0x245f   :  { %3888 = vpow2.f32 %v1737_v21 }
0x2465   :  { %v3887_v31 = vpop.eup %3886 }
0x2466   :  { %1744 = vrot.lane.b32.xlu0 %v3887_v31, %s4075_s11 }
0x2469   :  { %v3889_v23 = vpop.eup %3888 }
0x246a   :  { %v1739_v28 = vadd.f32 1.0, %v3889_v23 }
0x246c   :  { %3890 = vrcp.f32 %v1739_v28 }
0x2476   :  { %v3891_v29 = vpop.eup %3890 }
0x2477   :  { %v1742_v12 = vmul.f32 %v3891_v29, %v4526_v37 }
0x24d8   :  { %v1745_v44 = vpop.permute.xlu0 %1744 }
0x24d9   :  { %v1747_v14 = vmul.f32 %v3891_v29, %v1745_v44 }
0x24db   :  { %1749 = vrot.lane.b32.xlu1 %v1747_v14, %s4074_s20 }
0x254d   :  { %v1750_v30 = vpop.permute.xlu1 %1749 }
0x254e   :  { %v4605_v11 = vadd.f32 %v1750_v30, %v1742_v12 }
0x2550   :  { %3892 = vtanh.f32 %v4605_v11 }
0x255a   :  { %v3893_v32 = vpop.eup %3892 }
0x255b   :  { %1755 = vrot.lane.b32.xlu0 %v3893_v32, %s4075_s11 }
0x25cd   :  { %v1756_v33 = vpop.permute.xlu0 %1755 }
0x25ce   :  { %v4609_v35 = vmul.f32 %v3891_v29, %v1756_v33 }
0x25d0   :  { %1760 = vrot.lane.b32.xlu1 %v4609_v35, %s4074_s20 }
0x2642   :  { %v1761_v25 = vpop.permute.xlu1 %1760 }
0x2643   :  { %3384 = vmatmul.mubr.msk.f32.vlgmr.msra.gmra.mrb[14].mxu1 %vm59_vm1, %v1761_v25 }
0x2644   :  { %3703 = vmatpush3.bf16.msra.mxu1 %v4214_v55  ;;  %3421 = vmatprep.mubr.msk.f32.mxu1 %vm4072_vm0, %v4073_v3 }
0x2645   :  { %3704 = vmatprep.subr.bf16.mxu1 %v4071_v1 }
0x2648   :  { %3706 = vmatpush3.bf16.msra.mxu1 %v4217_v57 }
0x2649   :  { %3707 = vmatprep.subr.bf16.mxu1 %v4071_v1 }
0x264c   :  { %3709 = vmatpush3.bf16.msra.mxu1 %v4221_v60 }
0x264d   :  { %3710 = vmatprep.subr.bf16.mxu1 %v4071_v1 }
0x2650   :  { %3712 = vmatpush3.bf16.msra.mxu1 %v4226_v0 }
0x2651   :  { %3719 = vmatprep.subr.bf16.mxu1 %v4071_v1 }
0x2716   :  { %v1830_v37 = vpop.f32.mrb[14].mxu1 }
0x2717   :  { %v4625_v39 = vadd.f32 %v4305_v43, %v1830_v37  ;;  %v3385_v42 = vpop.f32.mrb[15].mxu1 }
0x2719   :  { %v4630_v51 = vsel %vm46_vm4, %v4625_v39, -inf  ;;  %v1884_v52 = vsub.f32 0.0, %v4625_v39 }
0x271a   :  { %v1835_v48 = vsel %vm475_vm5, %v4630_v51, -inf }
0x271b   :  { %1836 = vmax.xlane.f32.xlu0 %v1835_v48  ;;  %v1885_v41 = vmul.f32 1.442695, %v1884_v52 }
0x271d   :  { %3894 = vpow2.f32 %v1885_v41 }
0x2727   :  { %v3895_v2 = vpop.eup %3894 }
0x2728   :  { %v1887_v7 = vadd.f32 1.0, %v3895_v2 }
0x272a   :  { %3896 = vrcp.f32 %v1887_v7 }
0x2734   :  { %v3897_v13 = vpop.eup %3896 }
0x27a8   :  { %v4635_v54 = vpop.xlane.xlu0 %1836 }
0x27a9   :  { %vm1864_vm7 = vcmp.eq.f32.partialorder %v4630_v51, %v4635_v54 }
0x27aa   :  { %v1865_v43 = vsel %vm1864_vm7, %v4194_v27, 7  ;;  %vm2885_vm7 = vcmask 451976  }
0x27ab   :  { %v1866_v10 = vsel %vm475_vm5, %v1865_v43, 2147483647 }
0x27ac   :  { %v1868_v59 = vshra.s32 %v1866_v10, 16  ;;  %v1867_v15 = vand.u32 65535, %v1866_v10 }
0x27ae   :  { %v1870_v62 = vcvt.s32.f32 %v1868_v59  ;;  %v1869_v40 = vcvt.s32.f32 %v1867_v15 }
0x27b0   :  { %1871 = vmin.xlane.f32.xlu1 %v1870_v62 }
0x27c1   :  { %1895 = vperm.xlu1 %3796, %v3897_v13  }
0x283d   :  { %v1872_v5 = vpop.xlane.xlu1 %1871 }
0x283e   :  { %vm1873_vm8 = vcmp.eq.f32.partialorder %v1870_v62, %v1872_v5  ;;  %v1878_v56 = vcvt.f32.s32 %v1872_v5 }
0x283f   :  { %v1874_v20 = vsel %vm1873_vm8, %v1869_v40, inf }
0x2840   :  { %1875 = vmin.xlane.f32.xlu0 %v1874_v20  ;;  %v1879_v19 = vshll.u32 %v1878_v56, 16  ;;  %v4683_v20 = vld [vmem:[%s4935_s5 + $0x1] ss:$0 sm:$0xff] }
0x2856   :  { %1889 = vrot.lane.b32.xlu0 %v4585_v9, %s4075_s11  ;;  %v1896_v9 = vpop.permute.xlu1 %1895 }
0x2857   :  { %v1898_v14 = vmul.f32 %v1896_v9, %v4169_v17 }
0x2859   :  { %v1899_v12 = vadd.f32 %v1898_v14, %v4205_v34 }
0x28cd   :  { %v1876_v31 = vpop.xlane.xlu0 %1875 }
0x28ce   :  { %v1877_v21 = vcvt.f32.s32 %v1876_v31 }
0x28d0   :  { %v1880_v23 = vadd.s32 %v1879_v19, %v1877_v21 }
0x28d1   :  { %v1890_v29 = vpop.permute.xlu0 %1889 }
0x28d2   :  { %vm1881_vm9 = vcmp.eq.s32.totalorder %v4194_v27, %v1880_v23 }
0x28d3   :  { %v2929_v28 = vsel %vm1881_vm9, 1.0, %v4073_v3 }
0x28d4   :  { %v1892_v44 = vsel %vm59_vm1, %v2929_v28, %v1890_v29 }
0x28d5   :  { %3403 = vmatmul.mubr.msk.f32.vlgmr.msra.gmra.mrb[16].mxu0 %vm177_vm3, %v1892_v44 }
0x28d6   :  { %3715 = vmatpush3.bf16.msra.mxu0 %v4275_v36  ;;  %3432 = vmatprep.mubr.msk.f32.mxu0 %vm4072_vm0, %v4073_v3 }
0x28d7   :  { %3716 = vmatprep.subr.bf16.mxu0 %v4071_v1 }
0x28da   :  { %3718 = vmatpush3.bf16.msra.mxu0 %v4281_v38 }
0x28db   :  { %3731 = vmatprep.subr.bf16.mxu0 %v4071_v1 }
0x29a8   :  { %v1969_v30 = vpop.f32.mrb[16].mxu0 }
0x29a9   :  { %v1970_v32 = vadd.f32 %v1969_v30, %v1899_v12  ;;  %v3404_v33 = vpop.f32.mrb[17].mxu0 }
0x29ab   :  { %3898 = vtanh.f32 %v1970_v32  ;;  %v1973_v37 = vsub.f32 0.0, %v1970_v32 }
0x29ad   :  { %v1974_v42 = vmul.f32 1.442695, %v1973_v37 }
0x29af   :  { %3900 = vpow2.f32 %v1974_v42 }
0x29b5   :  { %v3899_v25 = vpop.eup %3898 }
0x29b6   :  { %1981 = vrot.lane.b32.xlu1 %v3899_v25, %s4075_s11 }
0x29b9   :  { %v3901_v48 = vpop.eup %3900 }
0x29ba   :  { %v1976_v52 = vadd.f32 1.0, %v3901_v48  ;;  %v4711_v48 = vld [vmem:[%s4937_s7] ss:$0 sm:$0xff]  ;;  %s4077_s7 = smov 7  }
0x29bc   :  { %3902 = vrcp.f32 %v1976_v52 }
0x29c6   :  { %v3903_v41 = vpop.eup %3902 }
0x29c7   :  { %v1979_v59 = vmul.f32 %v3903_v41, %v4579_v63 }
0x2a28   :  { %v1982_v43 = vpop.permute.xlu1 %1981 }
0x2a29   :  { %v1984_v10 = vmul.f32 %v3903_v41, %v1982_v43 }
0x2a2b   :  { %1986 = vrot.lane.b32.xlu0 %v1984_v10, %s4074_s20 }
0x2a9d   :  { %v1987_v62 = vpop.permute.xlu0 %1986 }
0x2a9e   :  { %v4658_v2 = vadd.f32 %v1987_v62, %v1979_v59 }
0x2aa0   :  { %3904 = vtanh.f32 %v4658_v2 }
0x2aaa   :  { %v3905_v7 = vpop.eup %3904 }
0x2aab   :  { %1992 = vrot.lane.b32.xlu1 %v3905_v7, %s4075_s11 }
0x2aaf   :  { %2000 = vrot.lane.b32.xlu1 %v4609_v35, %s4075_s11 }
0x2b1d   :  { %v1993_v13 = vpop.permute.xlu1 %1992 }
0x2b1e   :  { %v4664_v15 = vmul.f32 %v3903_v41, %v1993_v13 }
0x2b20   :  { %1997 = vrot.lane.b32.xlu0 %v4664_v15, %s4074_s20 }
0x2b21   :  { %v2001_v5 = vpop.permute.xlu1 %2000 }
0x2b92   :  { %v1998_v40 = vpop.permute.xlu0 %1997 }
0x2b93   :  { %v2003_v63 = vsel %vm59_vm1, %v1998_v40, %v2001_v5 }
0x2b94   :  { %3422 = vmatmul.mubr.msk.f32.vlgmr.msra.gmra.mrb[16].mxu1 %vm177_vm3, %v2003_v63 }
0x2b95   :  { %3721 = vmatpush3.bf16.msra.mxu1 %v4152_v8  ;;  %3451 = vmatprep.mubr.msk.f32.mxu1 %vm4072_vm0, %v4073_v3 }
0x2b96   :  { %3722 = vmatprep.subr.bf16.mxu1 %v4071_v1 }
0x2b99   :  { %3724 = vmatpush3.bf16.msra.mxu1 %v4167_v16 }
0x2b9a   :  { %3725 = vmatprep.subr.bf16.mxu1 %v4071_v1 }
0x2b9d   :  { %3727 = vmatpush3.bf16.msra.mxu1 %v4178_v22 }
0x2b9e   :  { %3728 = vmatprep.subr.bf16.mxu1 %v4071_v1 }
0x2ba1   :  { %3730 = vmatpush3.bf16.msra.mxu1 %v4187_v26 }
0x2ba2   :  { %3743 = vmatprep.subr.bf16.mxu1 %v4071_v1 }
0x2c67   :  { %v2073_v35 = vpop.f32.mrb[16].mxu1 }
0x2c68   :  { %v2074_v56 = vadd.f32 %v4683_v20, %v2073_v35  ;;  %v3423_v31 = vpop.f32.mrb[17].mxu1 }
0x2c6a   :  { %3906 = vtanh.f32 %v2074_v56  ;;  %v2077_v21 = vsub.f32 0.0, %v2074_v56 }
0x2c6c   :  { %v2078_v23 = vmul.f32 1.442695, %v2077_v21 }
0x2c6e   :  { %3908 = vpow2.f32 %v2078_v23 }
0x2c74   :  { %v3907_v19 = vpop.eup %3906 }
0x2c75   :  { %2085 = vrot.lane.b32.xlu0 %v3907_v19, %s4075_s11 }
0x2c78   :  { %v3909_v28 = vpop.eup %3908 }
0x2c79   :  { %v2080_v29 = vadd.f32 1.0, %v3909_v28 }
0x2c7b   :  { %3910 = vrcp.f32 %v2080_v29 }
0x2c85   :  { %v3911_v44 = vpop.eup %3910 }
0x2c86   :  { %v2083_v12 = vmul.f32 %v3911_v44, %v4605_v11 }
0x2ce7   :  { %v2086_v9 = vpop.permute.xlu0 %2085 }
0x2ce8   :  { %v2088_v14 = vmul.f32 %v3911_v44, %v2086_v9 }
0x2cea   :  { %2090 = vrot.lane.b32.xlu1 %v2088_v14, %s4074_s20 }
0x2d5c   :  { %v2091_v30 = vpop.permute.xlu1 %2090 }
0x2d5d   :  { %v4689_v32 = vadd.f32 %v2091_v30, %v2083_v12 }
0x2d5f   :  { %3912 = vtanh.f32 %v4689_v32 }
0x2d69   :  { %v3913_v33 = vpop.eup %3912 }
0x2d6a   :  { %2096 = vrot.lane.b32.xlu0 %v3913_v33, %s4075_s11 }
0x2ddc   :  { %v2097_v25 = vpop.permute.xlu0 %2096 }
0x2ddd   :  { %v4693_v37 = vmul.f32 %v3911_v44, %v2097_v25 }
0x2ddf   :  { %2101 = vrot.lane.b32.xlu1 %v4693_v37, %s4074_s20 }
0x2e51   :  { %v2102_v42 = vpop.permute.xlu1 %2101 }
0x2e52   :  { %3433 = vmatmul.mubr.msk.f32.vlgmr.msra.gmra.mrb[18].mxu0 %vm59_vm1, %v2102_v42 }
0x2e53   :  { %3733 = vmatpush3.bf16.msra.mxu0 %v4214_v55  ;;  %3470 = vmatprep.mubr.msk.f32.mxu0 %vm4072_vm0, %v4073_v3 }
0x2e54   :  { %3734 = vmatprep.subr.bf16.mxu0 %v4071_v1 }
0x2e57   :  { %3736 = vmatpush3.bf16.msra.mxu0 %v4217_v57 }
0x2e58   :  { %3737 = vmatprep.subr.bf16.mxu0 %v4071_v1 }
0x2e5b   :  { %3739 = vmatpush3.bf16.msra.mxu0 %v4221_v60 }
0x2e5c   :  { %3740 = vmatprep.subr.bf16.mxu0 %v4071_v1 }
0x2e5f   :  { %3742 = vmatpush3.bf16.msra.mxu0 %v4226_v0 }
0x2e60   :  { %3749 = vmatprep.subr.bf16.mxu0 %v4071_v1 }
0x2f25   :  { %v2171_v11 = vpop.f32.mrb[18].mxu0 }
0x2f26   :  { %v4714_v52 = vadd.f32 %v4711_v48, %v2171_v11  ;;  %v3434_v41 = vpop.f32.mrb[19].mxu0 }
0x2f28   :  { %v4719_v43 = vsel %vm46_vm4, %v4714_v52, -inf  ;;  %v2225_v59 = vsub.f32 0.0, %v4714_v52 }
0x2f29   :  { %v2176_v10 = vsel %vm475_vm5, %v4719_v43, -inf }
0x2f2a   :  { %2177 = vmax.xlane.f32.xlu0 %v2176_v10  ;;  %v2226_v62 = vmul.f32 1.442695, %v2225_v59 }
0x2f2c   :  { %3914 = vpow2.f32 %v2226_v62 }
0x2f36   :  { %v3915_v35 = vpop.eup %3914 }
0x2f37   :  { %v2228_v56 = vadd.f32 1.0, %v3915_v35 }
0x2f39   :  { %3916 = vrcp.f32 %v2228_v56 }
0x2f43   :  { %v3917_v31 = vpop.eup %3916 }
0x2fb7   :  { %v4724_v7 = vpop.xlane.xlu0 %2177 }
0x2fb8   :  { %vm2205_vm10 = vcmp.eq.f32.partialorder %v4719_v43, %v4724_v7 }
0x2fb9   :  { %v2206_v13 = vsel %vm2205_vm10, %v4194_v27, 7 }
0x2fba   :  { %v2207_v5 = vsel %vm475_vm5, %v2206_v13, 2147483647 }
0x2fbb   :  { %v2209_v40 = vshra.s32 %v2207_v5, 16  ;;  %v2208_v19 = vand.u32 65535, %v2207_v5 }
0x2fbd   :  { %v2211_v63 = vcvt.s32.f32 %v2209_v40  ;;  %v2210_v23 = vcvt.s32.f32 %v2208_v19 }
0x2fbf   :  { %2212 = vmin.xlane.f32.xlu1 %v2211_v63 }
0x2fd0   :  { %2236 = vperm.xlu1 %3796, %v3917_v31  }
0x304c   :  { %v2213_v21 = vpop.xlane.xlu1 %2212 }
0x304d   :  { %vm2214_vm11 = vcmp.eq.f32.partialorder %v2211_v63, %v2213_v21  ;;  %v2219_v29 = vcvt.f32.s32 %v2213_v21 }
0x304e   :  { %v2215_v28 = vsel %vm2214_vm11, %v2210_v23, inf }
0x304f   :  { %2216 = vmin.xlane.f32.xlu0 %v2215_v28  ;;  %v2220_v9 = vshll.u32 %v2219_v29, 16 }
0x3065   :  { %2230 = vrot.lane.b32.xlu0 %v4664_v15, %s4075_s11  ;;  %v2237_v15 = vpop.permute.xlu1 %2236 }
0x3066   :  { %v2239_v42 = vmul.f32 %v2237_v15, %v4169_v17 }
0x3068   :  { %v2240_v11 = vadd.f32 %v2239_v42, %v4205_v34 }
0x30dc   :  { %v2217_v44 = vpop.xlane.xlu0 %2216 }
0x30dd   :  { %v2218_v14 = vcvt.f32.s32 %v2217_v44 }
0x30df   :  { %v2221_v12 = vadd.s32 %v2220_v9, %v2218_v14 }
0x30e0   :  { %v2231_v33 = vpop.permute.xlu0 %2230 }
0x30e1   :  { %vm2222_vm12 = vcmp.eq.s32.totalorder %v4194_v27, %v2221_v12 }
0x30e2   :  { %v2933_v30 = vsel %vm2222_vm12, 1.0, %v4073_v3 }
0x30e3   :  { %v2233_v25 = vsel %vm59_vm1, %v2933_v30, %v2231_v33 }
0x30e4   :  { %3452 = vmatmul.mubr.msk.f32.vlgmr.msra.gmra.mrb[18].mxu1 %vm177_vm3, %v2233_v25 }
0x30e5   :  { %3745 = vmatpush3.bf16.msra.mxu1 %v4275_v36  ;;  %3481 = vmatprep.mubr.msk.f32.mxu1 %vm4072_vm0, %v4073_v3 }
0x30e6   :  { %3746 = vmatprep.subr.bf16.mxu1 %v4071_v1 }
0x30e9   :  { %3748 = vmatpush3.bf16.msra.mxu1 %v4281_v38 }
0x30ea   :  { %3761 = vmatprep.subr.bf16.mxu1 %v4071_v1 }
0x31b7   :  { %v2310_v41 = vpop.f32.mrb[18].mxu1 }
0x31b8   :  { %v2311_v10 = vadd.f32 %v2310_v41, %v2240_v11  ;;  %v3453_v59 = vpop.f32.mrb[19].mxu1 }
0x31ba   :  { %3918 = vtanh.f32 %v2311_v10  ;;  %v2314_v13 = vsub.f32 0.0, %v2311_v10 }
0x31bc   :  { %v2315_v5 = vmul.f32 1.442695, %v2314_v13 }
0x31be   :  { %3920 = vpow2.f32 %v2315_v5 }
0x31c4   :  { %v3919_v62 = vpop.eup %3918 }
0x31c5   :  { %2322 = vrot.lane.b32.xlu1 %v3919_v62, %s4075_s11 }
0x31c8   :  { %v3921_v40 = vpop.eup %3920 }
0x31c9   :  { %v2317_v63 = vadd.f32 1.0, %v3921_v40 }
0x31cb   :  { %3922 = vrcp.f32 %v2317_v63 }
0x31d5   :  { %v3923_v35 = vpop.eup %3922 }
0x31d6   :  { %v2320_v19 = vmul.f32 %v3923_v35, %v4658_v2 }
0x3237   :  { %v2323_v56 = vpop.permute.xlu1 %2322 }
0x3238   :  { %v2325_v31 = vmul.f32 %v3923_v35, %v2323_v56 }
0x323a   :  { %2327 = vrot.lane.b32.xlu0 %v2325_v31, %s4074_s20 }
0x32ac   :  { %v2328_v21 = vpop.permute.xlu0 %2327 }
0x32ad   :  { %v4747_v23 = vadd.f32 %v2328_v21, %v2320_v19 }
0x32af   :  { %3924 = vtanh.f32 %v4747_v23 }
0x32b9   :  { %v3925_v28 = vpop.eup %3924 }
0x32ba   :  { %2333 = vrot.lane.b32.xlu1 %v3925_v28, %s4075_s11 }
0x32be   :  { %2341 = vrot.lane.b32.xlu1 %v4693_v37, %s4075_s11 }
0x332c   :  { %v2334_v29 = vpop.permute.xlu1 %2333 }
0x332d   :  { %v4753_v44 = vmul.f32 %v3923_v35, %v2334_v29 }
0x332f   :  { %2338 = vrot.lane.b32.xlu0 %v4753_v44, %s4074_s20 }
0x3330   :  { %v2342_v9 = vpop.permute.xlu1 %2341 }
0x33a1   :  { %v2339_v14 = vpop.permute.xlu0 %2338 }
0x33a2   :  { %v2344_v2 = vsel %vm59_vm1, %v2339_v14, %v2342_v9 }
0x33a3   :  { %3471 = vmatmul.mubr.msk.f32.vlgmr.msra.gmra.mrb[20].mxu0 %vm177_vm3, %v2344_v2 }
0x33a4   :  { %3751 = vmatpush3.bf16.msra.mxu0 %v4152_v8  ;;  %3500 = vmatprep.mubr.msk.f32.mxu0 %vm4072_vm0, %v4073_v3 }
0x33a5   :  { %3752 = vmatprep.subr.bf16.mxu0 %v4071_v1 }
0x33a8   :  { %3754 = vmatpush3.bf16.msra.mxu0 %v4167_v16 }
0x33a9   :  { %3755 = vmatprep.subr.bf16.mxu0 %v4071_v1 }
0x33ac   :  { %3757 = vmatpush3.bf16.msra.mxu0 %v4178_v22 }
0x33ad   :  { %3758 = vmatprep.subr.bf16.mxu0 %v4071_v1 }
0x33b0   :  { %3760 = vmatpush3.bf16.msra.mxu0 %v4187_v26 }
0x33b1   :  { %3773 = vmatprep.subr.bf16.mxu0 %v4071_v1 }
0x3476   :  { %v2414_v37 = vpop.f32.mrb[20].mxu0 }
0x3477   :  { %v2415_v8 = vadd.f32 %v4683_v20, %v2414_v37  ;;  %v3472_v12 = vpop.f32.mrb[21].mxu0 }
0x3479   :  { %3926 = vtanh.f32 %v2415_v8  ;;  %v2418_v33 = vsub.f32 0.0, %v2415_v8 }
0x347b   :  { %v2419_v16 = vmul.f32 1.442695, %v2418_v33 }
0x347d   :  { %3928 = vpow2.f32 %v2419_v16 }
0x3483   :  { %v3927_v30 = vpop.eup %3926 }
0x3484   :  { %2426 = vrot.lane.b32.xlu0 %v3927_v30, %s4075_s11 }
0x3487   :  { %v3929_v25 = vpop.eup %3928 }
0x3488   :  { %v2421_v15 = vadd.f32 1.0, %v3929_v25 }
0x348a   :  { %3930 = vrcp.f32 %v2421_v15 }
0x3494   :  { %v3931_v22 = vpop.eup %3930 }
0x3495   :  { %v2424_v26 = vmul.f32 %v3931_v22, %v4689_v32 }
0x34f6   :  { %v2427_v42 = vpop.permute.xlu0 %2426 }
0x34f7   :  { %v2429_v11 = vmul.f32 %v3931_v22, %v2427_v42 }
0x34f9   :  { %2431 = vrot.lane.b32.xlu1 %v2429_v11, %s4074_s20 }
0x356b   :  { %v2432_v41 = vpop.permute.xlu1 %2431 }
0x356c   :  { %v4773_v10 = vadd.f32 %v2432_v41, %v2424_v26 }
0x356e   :  { %3932 = vtanh.f32 %v4773_v10 }
0x3578   :  { %v3933_v59 = vpop.eup %3932 }
0x3579   :  { %2437 = vrot.lane.b32.xlu0 %v3933_v59, %s4075_s11 }
0x35eb   :  { %v2438_v62 = vpop.permute.xlu0 %2437 }
0x35ec   :  { %v4777_v13 = vmul.f32 %v3931_v22, %v2438_v62 }
0x35ee   :  { %2442 = vrot.lane.b32.xlu1 %v4777_v13, %s4074_s20 }
0x3660   :  { %v2443_v5 = vpop.permute.xlu1 %2442 }
0x3661   :  { %3482 = vmatmul.mubr.msk.f32.vlgmr.msra.gmra.mrb[20].mxu1 %vm59_vm1, %v2443_v5 }
0x3662   :  { %3763 = vmatpush3.bf16.msra.mxu1 %v4214_v55  ;;  %3519 = vmatprep.mubr.msk.f32.mxu1 %vm4072_vm0, %v4073_v3 }
0x3663   :  { %3764 = vmatprep.subr.bf16.mxu1 %v4071_v1 }
0x3666   :  { %3766 = vmatpush3.bf16.msra.mxu1 %v4217_v57 }
0x3667   :  { %3767 = vmatprep.subr.bf16.mxu1 %v4071_v1 }
0x366a   :  { %3769 = vmatpush3.bf16.msra.mxu1 %v4221_v60 }
0x366b   :  { %3770 = vmatprep.subr.bf16.mxu1 %v4071_v1 }
0x366e   :  { %3772 = vmatpush3.bf16.msra.mxu1 %v4226_v0 }
0x3734   :  { %v2512_v32 = vpop.f32.mrb[20].mxu1 }
0x3735   :  { %v4792_v40 = vadd.f32 %v4711_v48, %v2512_v32  ;;  %v3483_v55 = vpop.f32.mrb[21].mxu1 }
0x3737   :  { %v4797_v63 = vsel %vm46_vm4, %v4792_v40, -inf  ;;  %v2566_v60 = vsub.f32 0.0, %v4792_v40 }
0x3738   :  { %v2517_v57 = vsel %vm475_vm5, %v4797_v63, -inf }
0x3739   :  { %2518 = vmax.xlane.f32.xlu0 %v2517_v57  ;;  %v2567_v35 = vmul.f32 1.442695, %v2566_v60 }
0x373b   :  { %3934 = vpow2.f32 %v2567_v35 }
0x3745   :  { %v3935_v28 = vpop.eup %3934 }
0x3746   :  { %v2569_v29 = vadd.f32 1.0, %v3935_v28 }
0x3748   :  { %3936 = vrcp.f32 %v2569_v29 }
0x3752   :  { %v3937_v9 = vpop.eup %3936 }
0x37c6   :  { %v4802_v56 = vpop.xlane.xlu0 %2518 }
0x37c7   :  { %vm2546_vm13 = vcmp.eq.f32.partialorder %v4797_v63, %v4802_v56 }
0x37c8   :  { %v2547_v0 = vsel %vm2546_vm13, %v4194_v27, 7 }
0x37c9   :  { %v2548_v31 = vsel %vm475_vm5, %v2547_v0, 2147483647 }
0x37ca   :  { %v2550_v19 = vshra.s32 %v2548_v31, 16  ;;  %v2549_v14 = vand.u32 65535, %v2548_v31 }
0x37cc   :  { %v2552_v21 = vcvt.s32.f32 %v2550_v19  ;;  %v2551_v37 = vcvt.s32.f32 %v2549_v14 }
0x37ce   :  { %2553 = vmin.xlane.f32.xlu1 %v2552_v21 }
0x37df   :  { %2577 = vperm.xlu1 %3796, %v3937_v9  }
0x385b   :  { %v2554_v2 = vpop.xlane.xlu1 %2553 }
0x385c   :  { %vm2555_vm14 = vcmp.eq.f32.partialorder %v2552_v21, %v2554_v2  ;;  %v2560_v12 = vcvt.f32.s32 %v2554_v2 }
0x385d   :  { %v2556_v8 = vsel %vm2555_vm14, %v2551_v37, inf }
0x385e   :  { %2557 = vmin.xlane.f32.xlu0 %v2556_v8  ;;  %v2561_v33 = vshll.u32 %v2560_v12, 16 }
0x3874   :  { %2571 = vrot.lane.b32.xlu0 %v4753_v44, %s4075_s11  ;;  %v2578_v44 = vpop.permute.xlu1 %2577 }
0x3875   :  { %v2580_v11 = vmul.f32 %v2578_v44, %v4169_v17  ;;  %v479_v44 = vsub.f32 %v4314_v47, %v4319_v53 }
0x3877   :  { %v2581_v26 = vadd.f32 %v2580_v11, %v4205_v34  ;;  %v480_v11 = vmul.f32 1.442695, %v479_v44 }
0x38eb   :  { %v2558_v30 = vpop.xlane.xlu0 %2557 }
0x38ec   :  { %v2559_v16 = vcvt.f32.s32 %v2558_v30 }
0x38ee   :  { %v2562_v25 = vadd.s32 %v2561_v33, %v2559_v16 }
0x38ef   :  { %v2572_v22 = vpop.permute.xlu0 %2571 }
0x38f0   :  { %vm2563_vm15 = vcmp.eq.s32.totalorder %v4194_v27, %v2562_v25 }
0x38f1   :  { %v2937_v15 = vsel %vm2563_vm15, 1.0, %v4073_v3 }
0x38f2   :  { %v2574_v42 = vsel %vm59_vm1, %v2937_v15, %v2572_v22 }
0x38f3   :  { %3501 = vmatmul.mubr.msk.f32.vlgmr.msra.gmra.mrb[22].mxu0 %vm177_vm3, %v2574_v42 }
0x38f4   :  { %3775 = vmatpush3.bf16.msra.mxu0 %v4275_v36  ;;  %3530 = vmatprep.mubr.msk.f32.mxu0 %vm4072_vm0, %v4073_v3  ;;  %vm839_vm0 = vcmask 107576  }
0x38f5   :  { %3776 = vmatprep.subr.bf16.mxu0 %v4071_v1 }
0x38f8   :  { %3778 = vmatpush3.bf16.msra.mxu0 %v4281_v38 }
0x39c6   :  { %v2651_v41 = vpop.f32.mrb[22].mxu0 }
0x39c7   :  { %v2652_v59 = vadd.f32 %v2651_v41, %v2581_v26  ;;  %v3502_v62 = vpop.f32.mrb[23].mxu0  ;;  %v1156_v26 = vsub.f32 %v4472_v61, %v4477_v4  ;;  %v2520_v61 = vsub.f32 %v4797_v63, %v4802_v56 }
0x39c8   :  { %v1838_v62 = vsub.f32 %v4630_v51, %v4635_v54 }
0x39c9   :  { %3938 = vtanh.f32 %v2652_v59  ;;  %v2655_v36 = vsub.f32 0.0, %v2652_v59  ;;  %v1157_v41 = vmul.f32 1.442695, %v1156_v26 }
0x39cb   :  { %v2656_v32 = vmul.f32 1.442695, %v2655_v36  ;;  %v2179_v36 = vsub.f32 %v4719_v43, %v4724_v7 }
0x39cd   :  { %3940 = vpow2.f32 %v2656_v32  ;;  %v2180_v32 = vmul.f32 1.442695, %v2179_v36 }
0x39d3   :  { %v3939_v5 = vpop.eup %3938 }
0x39d4   :  { %2663 = vrot.lane.b32.xlu1 %v3939_v5, %s4075_s11  ;;  %v1839_v5 = vmul.f32 1.442695, %v1838_v62 }
0x39d7   :  { %v3941_v3 = vpop.eup %3940 }
0x39d8   :  { %v2658_v55 = vadd.f32 1.0, %v3941_v3 }
0x39da   :  { %3942 = vrcp.f32 %v2658_v55 }
0x39e4   :  { %v3943_v1 = vpop.eup %3942 }
0x39e5   :  { %v2661_v17 = vmul.f32 %v3943_v1, %v4747_v23 }
0x3a46   :  { %v2664_v38 = vpop.permute.xlu1 %2663 }
0x3a47   :  { %v2666_v57 = vmul.f32 %v3943_v1, %v2664_v38 }
0x3a49   :  { %2668 = vrot.lane.b32.xlu0 %v2666_v57, %s4074_s20 }
0x3abb   :  { %v2669_v34 = vpop.permute.xlu0 %2668 }
0x3abc   :  { %v2671_v60 = vadd.f32 %v2669_v34, %v2661_v17 }
0x3abe   :  { %3944 = vtanh.f32 %v2671_v60 }
0x3ac8   :  { %v3945_v35 = vpop.eup %3944 }
0x3ac9   :  { %2674 = vrot.lane.b32.xlu1 %v3945_v35, %s4075_s11 }
0x3acd   :  { %2682 = vrot.lane.b32.xlu1 %v4777_v13, %s4075_s11 }
0x3b3b   :  { %v2675_v0 = vpop.permute.xlu1 %2674 }
0x3b3c   :  { %v2677_v31 = vmul.f32 %v3943_v1, %v2675_v0  ;;  %v489_v0 = vand.u32 2147483647, %v4309_v45 }
0x3b3e   :  { %2679 = vrot.lane.b32.xlu0 %v2677_v31, %s4074_s20  ;;  %v490_v31 = vsub.f32 0.0, %v489_v0 }
0x3b3f   :  { %v2683_v19 = vpop.permute.xlu1 %2682 }
0x3bb0   :  { %v2680_v21 = vpop.permute.xlu0 %2679 }
0x3bb1   :  { %v2685_v28 = vsel %vm59_vm1, %v2680_v21, %v2683_v19  ;;  %v491_v19 = vmul.f32 1.442695, %v490_v31 }
0x3bb2   :  { %3520 = vmatmul.mubr.msk.f32.vlgmr.msra.gmra.mrb[22].mxu1 %vm177_vm3, %v2685_v28  ;;  %vm1521_vm3 = vcmask 222376  }
0x3c85   :  { %v2755_v23 = vpop.f32.mrb[22].mxu1 }
0x3c86   :  { %v2756_v29 = vadd.f32 %v4683_v20, %v2755_v23  ;;  %v3521_v9 = vpop.f32.mrb[23].mxu1 }
0x3c88   :  { %3946 = vtanh.f32 %v2756_v29  ;;  %v2759_v2 = vsub.f32 0.0, %v2756_v29 }
0x3c8a   :  { %v2760_v13 = vmul.f32 1.442695, %v2759_v2 }
0x3c8c   :  { %3948 = vpow2.f32 %v2760_v13  ;;  %v488_v13 = vmin.f32 %v4309_v45, 0.0 }
0x3c92   :  { %v3947_v14 = vpop.eup %3946 }
0x3c93   :  { %2767 = vrot.lane.b32.xlu0 %v3947_v14, %s4075_s11 }
0x3c96   :  { %v3949_v37 = vpop.eup %3948 }
0x3c97   :  { %v2762_v8 = vadd.f32 1.0, %v3949_v37 }
0x3c99   :  { %3950 = vrcp.f32 %v2762_v8 }
0x3ca3   :  { %v3951_v12 = vpop.eup %3950 }
0x3ca4   :  { %v2765_v16 = vmul.f32 %v3951_v12, %v4773_v10  ;;  %v1497_v10 = vsub.f32 %v4551_v50, %v4556_v49  ;;  %v2521_v50 = vmul.f32 1.442695, %v2520_v61 }
0x3ca6   :  { %v1498_v59 = vmul.f32 1.442695, %v1497_v10  ;;  %v1507_v10 = vand.u32 2147483647, %v4546_v46 }
0x3d05   :  { %v2768_v30 = vpop.permute.xlu0 %2767 }
0x3d06   :  { %v2770_v33 = vmul.f32 %v3951_v12, %v2768_v30 }
0x3d08   :  { %2772 = vrot.lane.b32.xlu1 %v2770_v33, %s4074_s20  ;;  %v815_v33 = vsub.f32 %v4393_v6, %v4398_v24  ;;  %v825_v6 = vand.u32 2147483647, %v4388_v18 }
0x3d0a   :  { %v826_v44 = vsub.f32 0.0, %v825_v6 }
0x3d0c   :  { %v827_v26 = vmul.f32 1.442695, %v826_v44 }
0x3d7a   :  { %v2773_v25 = vpop.permute.xlu1 %2772 }
0x3d7b   :  { %v2775_v20 = vadd.f32 %v2773_v25, %v2765_v16  ;;  %v816_v16 = vmul.f32 1.442695, %v815_v33 }
0x3d7d   :  { %3952 = vtanh.f32 %v2775_v20 }
0x3d7e   :  { %3954 = vpow2.f32 %v480_v11  ;;  %v1166_v11 = vand.u32 2147483647, %v4467_v58 }
0x3d7f   :  { %3956 = vpow2.f32 %v1157_v41  ;;  %v1848_v41 = vand.u32 2147483647, %v4625_v39 }
0x3d80   :  { %3958 = vpow2.f32 %v1498_v59 }
0x3d81   :  { %3960 = vpow2.f32 %v1839_v5  ;;  %v1849_v62 = vsub.f32 0.0, %v1848_v41  ;;  %v2189_v5 = vand.u32 2147483647, %v4714_v52 }
0x3d82   :  { %3962 = vpow2.f32 %v2180_v32 }
0x3d83   :  { %3964 = vpow2.f32 %v2521_v50  ;;  %v1850_v32 = vmul.f32 1.442695, %v1849_v62  ;;  %v2190_v61 = vsub.f32 0.0, %v2189_v5 }
0x3d84   :  { %3966 = vpow2.f32 %v491_v19 }
0x3d87   :  { %v3953_v15 = vpop.eup %3952 }
0x3d88   :  { %2778 = vrot.lane.b32.xlu0 %v3953_v15, %s4075_s11  ;;  %v3955_v47 = vpop.eup %3954  ;;  %s4042_s11 = scalar_lea.vmem %s2894_s10, 32 }
0x3d89   :  { %v482_v3 = vsel %vm475_vm5, %v3955_v47, 0.0  ;;  %v3957_v55 = vpop.eup %3956  ;;  %v1508_v47 = vsub.f32 0.0, %v1507_v10  ;;  %p4043_p8 = scmp.ne.s32.totalorder %s2894_s10, %s4042_s11  ;;  %p4048_p10 = scmp.lt.s32.totalorder %s4042_s11, %s4042_s11 }
0x3d8a   :  { %v1159_v1 = vsel %vm475_vm5, %v3957_v55, 0.0  ;;  %v3959_v51 = vpop.eup %3958 }
0x3d8b   :  { %v1500_v38 = vsel %vm475_vm5, %v3959_v51, 0.0  ;;  %v3961_v43 = vpop.eup %3960  ;;  %v1509_v55 = vmul.f32 1.442695, %v1508_v47  ;;  %v2191_v51 = vmul.f32 1.442695, %v2190_v61  ;;  %p4049_p11 = por %p4048_p10, %p4047_p9 }
0x3d8c   :  { %v1841_v57 = vsel %vm475_vm5, %v3961_v43, 0.0  ;;  %v3963_v17 = vpop.eup %3962 }
0x3d8d   :  { %v2182_v63 = vsel %vm475_vm5, %v3963_v17, 0.0  ;;  %v3965_v34 = vpop.eup %3964  ;;  %p4050_p12 = pnand %p4049_p11, %p4043_p8 }
0x3d8e   :  { %v2523_v60 = vsel %vm475_vm5, %v3965_v34, 0.0  ;;  %v3967_v21 = vpop.eup %3966 }
0x3d8f   :  { %v493_v28 = vadd.f32 1.0, %v3967_v21 }
0x3d91   :  { %3968 = vlog2.f32 %v493_v28 }
0x3d9b   :  { %v3969_v29 = vpop.eup %3968 }
0x3d9c   :  { %v495_v2 = vmul.f32 0.6931472, %v3969_v29 }
0x3dfa   :  { %v2779_v22 = vpop.permute.xlu0 %2778 }
0x3dfb   :  { %v2781_v42 = vmul.f32 %v3951_v12, %v2779_v22  ;;  %v496_v12 = vsub.f32 %v488_v13, %v495_v2 }
0x3dfd   :  { %2783 = vrot.lane.b32.xlu1 %v2781_v42, %s4074_s20  ;;  %s4078_s20 = smov 14  }
0x3e21   :  { %483 = vadd.xlane.f32.xlu1 %v482_v3  ;;  %v2530_v3 = vand.u32 2147483647, %v4792_v40 }
0x3e25   :  { %1160 = vadd.xlane.f32.xlu1 %v1159_v1 }
0x3e29   :  { %1501 = vadd.xlane.f32.xlu1 %v1500_v38  ;;  %v2531_v38 = vsub.f32 0.0, %v2530_v3 }
0x3e2d   :  { %1842 = vadd.xlane.f32.xlu1 %v1841_v57  ;;  %v2532_v57 = vmul.f32 1.442695, %v2531_v38 }
0x3e31   :  { %2183 = vadd.xlane.f32.xlu1 %v2182_v63 }
0x3e35   :  { %2524 = vadd.xlane.f32.xlu1 %v2523_v60 }
0x3e6f   :  { %v2784_v35 = vpop.permute.xlu1 %2783 }
0x3e70   :  { %3531 = vmatmul.mubr.msk.f32.vlgmr.msra.gmra.mrb[24].mxu0 %vm59_vm1, %v2784_v35  ;;  %vm1180_vm1 = vcmask 164976  }
0x3eae   :  { %v484_v23 = vpop.xlane.xlu1 %483 }
0x3eaf   :  { %3970 = vlog2.f32 %v484_v23 }
0x3eb0   :  { %3972 = vpow2.f32 %v816_v16 }
0x3eb1   :  { %3974 = vpow2.f32 %v827_v26  ;;  %v824_v26 = vmin.f32 %v4388_v18, 0.0 }
0x3eb2   :  { %v1161_v36 = vpop.xlane.xlu1 %1160 }
0x3eb6   :  { %v1502_v50 = vpop.xlane.xlu1 %1501 }
0x3eb9   :  { %v3971_v9 = vpop.eup %3970 }
0x3eba   :  { %v486_v14 = vmul.f32 0.6931472, %v3971_v9  ;;  %v3973_v22 = vpop.eup %3972  ;;  %v1843_v17 = vpop.xlane.xlu1 %1842 }
0x3ebb   :  { %v818_v42 = vsel %vm475_vm5, %v3973_v22, 0.0  ;;  %v3975_v1 = vpop.eup %3974 }
0x3ebc   :  { %v487_v37 = vadd.f32 %v486_v14, %v4319_v53  ;;  %v829_v43 = vadd.f32 1.0, %v3975_v1 }
0x3ebe   :  { %v497_v8 = vsub.f32 %v4309_v45, %v487_v37  ;;  %v2184_v21 = vpop.xlane.xlu1 %2183 }
0x3ec0   :  { %v498_v30 = vsel %vm46_vm4, %v497_v8, %v496_v12 }
0x3ec1   :  { %499 = vst.msk [vmem:[#allocation5] sm:$0x3] %vm475_vm5, %v498_v30 }
0x3ec2   :  { %v2525_v2 = vpop.xlane.xlu1 %2524 }
0x3f43   :  { %v2853_v25 = vpop.f32.mrb[24].mxu0 }
0x3f44   :  { %v4865_v20 = vadd.f32 %v4711_v48, %v2853_v25  ;;  %v3532_v15 = vpop.f32.mrb[25].mxu0  ;;  %v1167_v48 = vsub.f32 0.0, %v1166_v11 }
0x3f46   :  { %v2857_v45 = vsel %vm46_vm4, %v4865_v20, -inf  ;;  %v1168_v59 = vmul.f32 1.442695, %v1167_v48 }
0x3f47   :  { %v2858_v53 = vsel %vm475_vm5, %v2857_v45, -inf }
0x3f48   :  { %2859 = vmax.xlane.f32.xlu0 %v2858_v53  ;;  %3976 = vpow2.f32 %v1168_v59 }
0x3f49   :  { %3978 = vpow2.f32 %v1850_v32 }
0x3f4a   :  { %3980 = vpow2.f32 %v1509_v55 }
0x3f4b   :  { %3982 = vpow2.f32 %v2191_v51  ;;  %v1847_v51 = vmin.f32 %v4625_v39, 0.0 }
0x3f4c   :  { %819 = vadd.xlane.f32.xlu0 %v818_v42  ;;  %3984 = vlog2.f32 %v829_v43 }
0x3f4d   :  { %3986 = vlog2.f32 %v1161_v36  ;;  %v1165_v36 = vmin.f32 %v4467_v58, 0.0 }
0x3f4e   :  { %3988 = vpow2.f32 %v2532_v57 }
0x3f4f   :  { %3990 = vlog2.f32 %v1843_v17  ;;  %v1506_v17 = vmin.f32 %v4546_v46, 0.0 }
0x3f52   :  { %v3977_v63 = vpop.eup %3976 }
0x3f53   :  { %v1170_v0 = vadd.f32 1.0, %v3977_v63  ;;  %v3979_v19 = vpop.eup %3978 }
0x3f54   :  { %v3981_v28 = vpop.eup %3980  ;;  %v1852_v23 = vadd.f32 1.0, %v3979_v19  ;;  %v2188_v19 = vmin.f32 %v4714_v52, 0.0 }
0x3f55   :  { %v3983_v29 = vpop.eup %3982  ;;  %v1511_v9 = vadd.f32 1.0, %v3981_v28 }
0x3f56   :  { %v3985_v14 = vpop.eup %3984  ;;  %v2193_v37 = vadd.f32 1.0, %v3983_v29 }
0x3f57   :  { %v3987_v13 = vpop.eup %3986  ;;  %v831_v22 = vmul.f32 0.6931472, %v3985_v14  ;;  %v2871_v14 = vand.u32 2147483647, %v4865_v20 }
0x3f58   :  { %v3989_v8 = vpop.eup %3988  ;;  %v1163_v33 = vmul.f32 0.6931472, %v3987_v13 }
0x3f59   :  { %v3991_v12 = vpop.eup %3990  ;;  %v2534_v15 = vadd.f32 1.0, %v3989_v8  ;;  %v832_v59 = vsub.f32 %v824_v26, %v831_v22 }
0x3f5a   :  { %v1164_v6 = vadd.f32 %v1163_v33, %v4477_v4  ;;  %v1845_v44 = vmul.f32 0.6931472, %v3991_v12 }
0x3f5c   :  { %v1174_v32 = vsub.f32 %v4467_v58, %v1164_v6  ;;  %v1846_v4 = vadd.f32 %v1845_v44, %v4635_v54  ;;  %v2870_v6 = vmin.f32 %v4865_v20, 0.0 }
0x3f5e   :  { %v1856_v43 = vsub.f32 %v4625_v39, %v1846_v4 }
0x3fd5   :  { %v4878_v34 = vpop.xlane.xlu0 %2859 }
0x3fd6   :  { %v2861_v60 = vsub.f32 %v2857_v45, %v4878_v34 }
0x3fd8   :  { %v2862_v35 = vmul.f32 1.442695, %v2861_v60 }
0x3fd9   :  { %v820_v31 = vpop.xlane.xlu0 %819 }
0x3fda   :  { %3992 = vpow2.f32 %v2862_v35 }
0x3fdb   :  { %3994 = vlog2.f32 %v820_v31 }
0x3fdc   :  { %3996 = vlog2.f32 %v1170_v0 }
0x3fdd   :  { %3998 = vlog2.f32 %v1502_v50 }
0x3fde   :  { %4000 = vlog2.f32 %v2184_v21 }
0x3fdf   :  { %4002 = vlog2.f32 %v1852_v23 }
0x3fe0   :  { %4004 = vlog2.f32 %v1511_v9 }
0x3fe1   :  { %4006 = vlog2.f32 %v2525_v2  ;;  %v2872_v2 = vsub.f32 0.0, %v2871_v14 }
0x3fe2   :  { %4008 = vlog2.f32 %v2193_v37 }
0x3fe3   :  { %4010 = vlog2.f32 %v2534_v15  ;;  %v2873_v13 = vmul.f32 1.442695, %v2872_v2 }
0x3fe4   :  { %v3993_v30 = vpop.eup %3992 }
0x3fe5   :  { %v3995_v16 = vpop.eup %3994  ;;  %v2864_v25 = vsel %vm475_vm5, %v3993_v30, 0.0  ;;  %4012 = vpow2.f32 %v2873_v13  ;;  %vm1862_vm5 = vcmask 279776  }
0x3fe6   :  { %v3997_v45 = vpop.eup %3996  ;;  %v822_v53 = vmul.f32 0.6931472, %v3995_v16  ;;  %2865 = vadd.xlane.f32.xlu1 %v2864_v25 }
0x3fe7   :  { %v3999_v42 = vpop.eup %3998  ;;  %v1172_v62 = vmul.f32 0.6931472, %v3997_v45 }
0x3fe8   :  { %v823_v11 = vadd.f32 %v822_v53, %v4398_v24  ;;  %v4001_v48 = vpop.eup %4000  ;;  %v1504_v41 = vmul.f32 0.6931472, %v3999_v42 }
0x3fe9   :  { %v4003_v5 = vpop.eup %4002  ;;  %v2186_v61 = vmul.f32 0.6931472, %v4001_v48 }
0x3fea   :  { %v833_v10 = vsub.f32 %v4388_v18, %v823_v11  ;;  %v4005_v47 = vpop.eup %4004  ;;  %v1505_v55 = vadd.f32 %v1504_v41, %v4556_v49  ;;  %v1173_v18 = vsub.f32 %v1165_v36, %v1172_v62  ;;  %v1854_v50 = vmul.f32 0.6931472, %v4003_v5 }
0x3feb   :  { %v4007_v3 = vpop.eup %4006  ;;  %v1513_v38 = vmul.f32 0.6931472, %v4005_v47  ;;  %v2187_v58 = vadd.f32 %v2186_v61, %v4724_v7 }
0x3fec   :  { %v834_v24 = vsel %vm46_vm4, %v833_v10, %v832_v59  ;;  %v4009_v1 = vpop.eup %4008  ;;  %v2527_v54 = vmul.f32 0.6931472, %v4007_v3  ;;  %v1175_v57 = vsel %vm46_vm4, %v1174_v32, %v1173_v18  ;;  %v1515_v49 = vsub.f32 %v4546_v46, %v1505_v55 }
0x3fed   :  { %836 = vrot.lane.b32.xlu0 %v834_v24, %s4077_s7  ;;  %v1855_v63 = vsub.f32 %v1847_v51, %v1854_v50  ;;  %v2195_v60 = vmul.f32 0.6931472, %v4009_v1  ;;  %v4011_v35 = vpop.eup %4010  ;;  %v1514_v0 = vsub.f32 %v1506_v17, %v1513_v38  ;;  %v2197_v31 = vsub.f32 %v4714_v52, %v2187_v58 }
0x3fee   :  { %v2528_v39 = vadd.f32 %v2527_v54, %v4802_v56  ;;  %v2536_v46 = vmul.f32 0.6931472, %v4011_v35  ;;  %v2529_v56 = vmin.f32 %v4792_v40, 0.0 }
0x3fef   :  { %v1857_v7 = vsel %vm46_vm4, %v1856_v43, %v1855_v63  ;;  %v1516_v21 = vsel %vm46_vm4, %v1515_v49, %v1514_v0  ;;  %v2196_v28 = vsub.f32 %v2188_v19, %v2195_v60 }
0x3ff0   :  { %v2538_v23 = vsub.f32 %v4792_v40, %v2528_v39  ;;  %v2537_v9 = vsub.f32 %v2529_v56, %v2536_v46  ;;  %v4013_v40 = vpop.eup %4012 }
0x3ff1   :  { %1177 = vrot.lane.b32.xlu0 %v1175_v57, %s4078_s20  ;;  %v2198_v29 = vsel %vm46_vm4, %v2197_v31, %v2196_v28  ;;  %v2875_v12 = vadd.f32 1.0, %v4013_v40 }
0x3ff2   :  { %v2539_v52 = vsel %vm46_vm4, %v2538_v23, %v2537_v9 }
0x3ff3   :  { %4014 = vlog2.f32 %v2875_v12 }
0x3ff5   :  { %1859 = vrot.lane.b32.xlu0 %v1857_v7, %s4079_s28 }
0x3ff7   :  { %1518 = vrot.lane.b32.xlu1 %v1516_v21, %s4080_s29 }
0x3ff9   :  { %2200 = vrot.lane.b32.xlu0 %v2198_v29, %s4081_s30 }
0x3ffd   :  { %2541 = vrot.lane.b32.xlu0 %v2539_v52, %s4082_s3  ;;  %v4015_v45 = vpop.eup %4014 }
0x3ffe   :  { %v2877_v42 = vmul.f32 0.6931472, %v4015_v45 }
0x4000   :  { %v2878_v26 = vsub.f32 %v2870_v6, %v2877_v42 }
0x405f   :  { %v837_v37 = vpop.permute.xlu0 %836 }
0x4060   :  { %840 = vst.msk [vmem:[#allocation5] sm:$0x3] %vm839_vm0, %v837_v37 }
0x4063   :  { %v1178_v8 = vpop.permute.xlu0 %1177 }
0x4064   :  { %1181 = vst.msk [vmem:[#allocation5] sm:$0x3] %vm1180_vm1, %v1178_v8 }
0x4067   :  { %v1860_v30 = vpop.permute.xlu0 %1859 }
0x406b   :  { %v2201_v16 = vpop.permute.xlu0 %2200 }
0x406f   :  { %v2542_v15 = vpop.permute.xlu0 %2541 }
0x4073   :  { %v2866_v33 = vpop.xlane.xlu1 %2865 }
0x4074   :  { %4016 = vlog2.f32 %v2866_v33 }
0x4077   :  { %v1519_v25 = vpop.permute.xlu1 %1518 }
0x4078   :  { %1522 = vst.msk [vmem:[#allocation5] sm:$0x3] %vm1521_vm3, %v1519_v25 }
0x4079   :  { %1863 = vst.msk [vmem:[#allocation5] sm:$0x3] %vm1862_vm5, %v1860_v30 }
0x407a   :  { %2204 = vst.msk [vmem:[#allocation5] sm:$0x3] %vm2203_vm2, %v2201_v16 }
0x407b   :  { %2545 = vst.msk [vmem:[#allocation5] sm:$0x3] %vm2544_vm6, %v2542_v15 }
0x407e   :  { %v4017_v53 = vpop.eup %4016 }
0x407f   :  { %v2868_v22 = vmul.f32 0.6931472, %v4017_v53 }
0x4081   :  { %v2869_v44 = vadd.f32 %v2868_v22, %v4878_v34 }
0x4083   :  { %v2879_v11 = vsub.f32 %v4865_v20, %v2869_v44 }
0x4085   :  { %v2880_v48 = vsel %vm46_vm4, %v2879_v11, %v2878_v26 }
0x4086   :  { %2882 = vrot.lane.b32.xlu0 %v2880_v48, %s4083_s9 }
0x40f8   :  { %v2883_v41 = vpop.permute.xlu0 %2882 }
0x40f9   :  { %2886 = vst.msk [vmem:[#allocation5] sm:$0x3] %vm2885_vm7, %v2883_v41 }
0x40fa   :  { %4053 = shalt.err (!%p4050_p12)
}
0x40fb   :  { %s4054_s14 = scalar_lea.hbm %s4938_s8, 32 }
0x40fc   :  { %p4055_p13 = scmp.ne.s32.totalorder %s4938_s8, %s4054_s14  ;;  %p4058_p0 = scmp.lt.u32.totalorder %s4054_s14, %s4938_s8 }
0x40fe   :  { %p4060_p1 = pnand %p4058_p0, %p4055_p13 }
0x4100   :  { %4063 = shalt.err (!%p4060_p1)
}
0x4101   :  { %2896 = dma.vmem_to_hbm [thread:$0]  %s2894_s10, 32, %s4938_s8, [#allocation4]  }
0x4102   :  { %4066 = dma.done.wait [#allocation4], 32  }
0x4103   :  { %4067 = vsyncadd [#allocation4], 4294967264 }
0x4104   :  { %2900 = vsyncpa [#allocation3], 1 }
0x4105   :  { %2901 = vsyncpa [#allocation4], 1 }

</bundles_post_ra>
